<compile_context>
chip_gen: v6e
topology: v6e:2x2x1
jax: 0.10.0
libtpu: 0.0.40
codegen_flags: <defaults>
</compile_context>

<pallas_src>
import functools

import jax
import jax.numpy as jnp
from jax.experimental import pallas as pl
from jax.experimental.pallas import tpu as pltpu

# ----------------------------- scaled-down ViT-g config -----------------------------
PATCH = 14            # TUMViTG.patch_size (kept)
EMBED_DIM = 128       # stands in for feature_dim = 1536 (kept lane-dense: multiple of 128)
DEPTH = 2             # stands in for 40 blocks
NUM_HEADS = 2         # stands in for 24 heads
HEAD_DIM = EMBED_DIM // NUM_HEADS
LN_EPS = 1e-6         # DINOv2 LayerNorm eps
LAYERSCALE_INIT = 0.1

# DINOv2 SwiGLUFFNFused hidden rule: round(4*dim * 2/3); real ViT-g gives 4096 (128-aligned),
# so at toy scale we round up to a multiple of 128 to keep the same lane alignment.
_H_RAW = int(int(EMBED_DIM * 4) * 2 / 3)
HIDDEN = ((_H_RAW + 127) // 128) * 128

K_RAW = 3 * PATCH * PATCH             # 588 (Conv2d k=14, s=14 unfolded)
K_PAD = ((K_RAW + 127) // 128) * 128  # 640, lane/sublane friendly


# ----------------------------- patch-embed matmul kernel -----------------------------
def _patch_embed_kernel(p_ref, w_ref, b_ref, o_ref):
    # (TM, K) @ (K, D) + (1, D)  -- Conv2d(k=14, s=14) expressed as a tiled matmul
    o_ref[...] = (
        jnp.dot(p_ref[...], w_ref[...], preferred_element_type=jnp.float32)
        + b_ref[...]
    )


def patch_embed(patches, w, b, *, tm=16):
    M, K = patches.shape
    D = w.shape[1]
    Mp = ((M + tm - 1) // tm) * tm
    if Mp != M:
        patches = jnp.pad(patches, ((0, Mp - M), (0, 0)))
    out = pl.pallas_call(
        _patch_embed_kernel,
        grid=(Mp // tm,),
        out_shape=jax.ShapeDtypeStruct((Mp, D), jnp.float32),
        in_specs=[
            pl.BlockSpec((tm, K), lambda i: (i, 0)),
            pl.BlockSpec((K, D), lambda i: (0, 0)),
            pl.BlockSpec((1, D), lambda i: (0, 0)),
        ],
        out_specs=pl.BlockSpec((tm, D), lambda i: (i, 0)),
        compiler_params=pltpu.CompilerParams(dimension_semantics=("parallel",)),
    )(patches, w, b)
    return out[:M]


# ----------------------------- fused all-blocks transformer kernel -----------------------------
def _blocks_kernel(x_ref,
                   ln1w, ln1b, wq, bq, wk, bk, wv, bv, wproj, bproj, g1,
                   ln2w, ln2b, w1, b1, w2, b2, w3, b3, g2,
                   o_ref):
    # grid = (batch, depth): depth is the inner "arbitrary" axis, so o_ref's tile
    # stays resident in VMEM across all layers of one image (no per-layer HBM trip).
    layer = pl.program_id(1)

    @pl.when(layer == 0)
    def _():
        o_ref[0] = x_ref[0]

    x = o_ref[0]                       # (S, D), carried in VMEM across the depth axis
    S = x.shape[0]

    def layer_norm(v, w, b):
        mu = jnp.mean(v, axis=-1, keepdims=True)
        var = jnp.mean((v - mu) ** 2, axis=-1, keepdims=True)
        return (v - mu) * jax.lax.rsqrt(var + LN_EPS) * w + b

    # --- attention branch: x + ls1(attn(norm1(x))) ---
    h = layer_norm(x, ln1w[0], ln1b[0])
    # separate lane-dense Q/K/V projections (no lane-axis slicing of a fused qkv)
    q = jnp.dot(h, wq[0], preferred_element_type=jnp.float32) + bq[0]
    k = jnp.dot(h, wk[0], preferred_element_type=jnp.float32) + bk[0]
    v = jnp.dot(h, wv[0], preferred_element_type=jnp.float32) + bv[0]

    scale = HEAD_DIM ** -0.5
    qh = (q * scale).reshape(S, NUM_HEADS, HEAD_DIM).transpose(1, 0, 2)   # (H, S, hd)
    kh = k.reshape(S, NUM_HEADS, HEAD_DIM).transpose(1, 0, 2)
    vh = v.reshape(S, NUM_HEADS, HEAD_DIM).transpose(1, 0, 2)

    s = jnp.einsum('hqd,hkd->hqk', qh, kh, preferred_element_type=jnp.float32)  # (H, S, S)
    s = s - jnp.max(s, axis=-1, keepdims=True)
    p = jnp.exp(s)                                                               # EUP
    p = p * pl.reciprocal(jnp.sum(p, axis=-1, keepdims=True), approx=True)       # EUP, no VALU divide
    o = jnp.einsum('hqk,hkd->hqd', p, vh, preferred_element_type=jnp.float32)    # (H, S, hd)
    attn = o.transpose(1, 0, 2).reshape(S, EMBED_DIM)                            # (S, D)

    attn = jnp.dot(attn, wproj[0], preferred_element_type=jnp.float32) + bproj[0]
    x = x + attn * g1[0]                                                         # LayerScale + residual

    # --- SwiGLU MLP branch: x + ls2(swiglu(norm2(x))) ---
    h = layer_norm(x, ln2w[0], ln2b[0])
    x1 = jnp.dot(h, w1[0], preferred_element_type=jnp.float32) + b1[0]           # lane-dense
    x2 = jnp.dot(h, w2[0], preferred_element_type=jnp.float32) + b2[0]           # lane-dense
    sig = pl.reciprocal(1.0 + jnp.exp(-x1), approx=True)                         # sigmoid via EUP
    hid = (x1 * sig) * x2                                                        # silu(x1) * x2
    mlp = jnp.dot(hid, w3[0], preferred_element_type=jnp.float32) + b3[0]
    x = x + mlp * g2[0]

    o_ref[0] = x


def vit_blocks(x, stacked_params):
    """Run all DEPTH transformer blocks in a single pallas_call (grid = (B, DEPTH))."""
    B, S, D = x.shape
    w_specs = []
    for p in stacked_params:
        blk_shape = (1,) + p.shape[1:]
        w_specs.append(
            pl.BlockSpec(blk_shape, lambda b, l, nd=p.ndim: (l,) + (0,) * (nd - 1))
        )
    return pl.pallas_call(
        _blocks_kernel,
        grid=(B, DEPTH),
        out_shape=jax.ShapeDtypeStruct((B, S, D), jnp.float32),
        in_specs=[pl.BlockSpec((1, S, D), lambda b, l: (b, 0, 0))] + w_specs,
        out_specs=pl.BlockSpec((1, S, D), lambda b, l: (b, 0, 0)),
        compiler_params=pltpu.CompilerParams(
            dimension_semantics=("parallel", "arbitrary")),
    )(x, *stacked_params)


# ----------------------------- final norm + pooling kernel -----------------------------
def _head_kernel(x_ref, lnw, lnb, o_ref):
    x = x_ref[0]  # (S, D)
    mu = jnp.mean(x, axis=-1, keepdims=True)
    var = jnp.mean((x - mu) ** 2, axis=-1, keepdims=True)
    xn = (x - mu) * jax.lax.rsqrt(var + LN_EPS) * lnw[...] + lnb[...]
    cls = xn[0:1, :]                                    # x_norm_clstoken
    pmean = jnp.mean(xn[1:, :], axis=0, keepdims=True)  # mean of x_norm_patchtokens
    o_ref[0] = jnp.concatenate([cls, pmean], axis=0)    # (2, D): one lane-dense store


def final_head(x, lnw, lnb):
    B, S, D = x.shape
    return pl.pallas_call(
        _head_kernel,
        grid=(B,),
        out_shape=jax.ShapeDtypeStruct((B, 2, D), jnp.float32),
        in_specs=[
            pl.BlockSpec((1, S, D), lambda b: (b, 0, 0)),
            pl.BlockSpec((1, D), lambda b: (0, 0)),
            pl.BlockSpec((1, D), lambda b: (0, 0)),
        ],
        out_specs=pl.BlockSpec((1, 2, D), lambda b: (b, 0, 0)),
        compiler_params=pltpu.CompilerParams(dimension_semantics=("parallel",)),
    )(x, lnw, lnb)


# ----------------------------- parameters -----------------------------
def init_params(key, num_patches):
    D, Hd = EMBED_DIM, HIDDEN
    S = num_patches + 1
    counter = [0]

    def nrm(shape, scale=0.02):
        counter[0] += 1
        k = jax.random.fold_in(key, counter[0])
        return (scale * jax.random.normal(k, shape)).astype(jnp.float32)

    # flattened Conv2d weight in (C, ph, pw) order, zero-padded along K to K_PAD
    patch_w = nrm((K_RAW, D))
    patch_w = jnp.pad(patch_w, ((0, K_PAD - K_RAW), (0, 0)))

    params = {
        "patch_w": patch_w,
        "patch_b": nrm((1, D)),
        "cls_token": nrm((1, 1, D)),
        # TODO(synk): no positional-embedding interpolation; pos_embed fixed to S=num_patches+1.
        "pos_embed": nrm((1, S, D)),
        "norm_w": jnp.ones((1, D), jnp.float32),
        "norm_b": jnp.zeros((1, D), jnp.float32),
    }

    blocks = []
    for _ in range(DEPTH):
        blocks.append([
            jnp.ones((1, D), jnp.float32),                     # ln1 weight
            jnp.zeros((1, D), jnp.float32),                    # ln1 bias
            nrm((D, D)), nrm((1, D)),                          # wq, bq
            nrm((D, D)), nrm((1, D)),                          # wk, bk
            nrm((D, D)), nrm((1, D)),                          # wv, bv
            nrm((D, D)), nrm((1, D)),                          # proj weight, bias
            jnp.full((1, D), LAYERSCALE_INIT, jnp.float32),    # layerscale gamma1
            jnp.ones((1, D), jnp.float32),                     # ln2 weight
            jnp.zeros((1, D), jnp.float32),                    # ln2 bias
            nrm((D, Hd)), nrm((1, Hd)),                        # swiglu w1, b1
            nrm((D, Hd)), nrm((1, Hd)),                        # swiglu w2, b2
            nrm((Hd, D)), nrm((1, D)),                         # swiglu w3, b3
            jnp.full((1, D), LAYERSCALE_INIT, jnp.float32),    # layerscale gamma2
        ])
    # stack per-layer weights along a leading depth axis for the fused-blocks kernel
    params["block_stack"] = [
        jnp.stack([blocks[l][i] for l in range(DEPTH)], axis=0)
        for i in range(len(blocks[0]))
    ]
    return params


# ----------------------------- forward -----------------------------
def tum_vitg_forward(x, params, output_mode="class"):
    """x: (B, C, H, W) NCHW float32. Returns (B, D) or (B, 2D)."""
    B, C, H, W = x.shape
    Hn, Wn = H // PATCH, W // PATCH
    # glue: unfold Conv2d(k=14, s=14) into patch rows flattened in (C, ph, pw) order.
    # TODO(synk): the unfold could be folded into the patch-embed kernel via per-patch
    # index_maps; kept host-side at this toy scale, K padded to a lane multiple instead.
    patches = x.reshape(B, C, Hn, PATCH, Wn, PATCH)
    patches = patches.transpose(0, 2, 4, 1, 3, 5).reshape(B * Hn * Wn, K_RAW)
    patches = jnp.pad(patches, ((0, 0), (0, K_PAD - K_RAW)))

    tok = patch_embed(patches, params["patch_w"], params["patch_b"])
    tok = tok.reshape(B, Hn * Wn, EMBED_DIM)

    cls = jnp.broadcast_to(params["cls_token"], (B, 1, EMBED_DIM))
    x_tok = jnp.concatenate([cls, tok], axis=1) + params["pos_embed"]

    x_tok = vit_blocks(x_tok, params["block_stack"])

    head = final_head(x_tok, params["norm_w"], params["norm_b"])  # (B, 2, D)
    if output_mode == "class":
        return head[:, 0, :]
    # (B, 2, D) -> (B, 2D) == concat([cls, patch_mean], axis=-1)
    return head.reshape(B, 2 * EMBED_DIM)


# ----------------------------- demo -----------------------------
if __name__ == "__main__":
    key = jax.random.PRNGKey(0)
    kx, kp = jax.random.split(key)

    B, C = 2, 3
    H = W = 4 * PATCH  # 56x56 -> 4x4 = 16 patches -> 17 tokens (incl. cls)
    x = jax.random.normal(kx, (B, C, H, W), jnp.float32)
    params = init_params(kp, num_patches=(H // PATCH) * (W // PATCH))

    fwd_class = jax.jit(functools.partial(tum_vitg_forward, output_mode="class"))
    fwd_cm = jax.jit(functools.partial(tum_vitg_forward, output_mode="class+mean"))

    out_class = fwd_class(x, params)
    out_cm = fwd_cm(x, params)
    jax.block_until_ready((out_class, out_cm))

    assert out_class.shape == (B, EMBED_DIM)
    assert out_cm.shape == (B, 2 * EMBED_DIM)
    assert bool(jnp.all(jnp.isfinite(out_class))) and bool(jnp.all(jnp.isfinite(out_cm)))
    # 'class' must equal the cls half of 'class+mean'
    assert bool(jnp.allclose(out_class, out_cm[:, :EMBED_DIM]))
    print("KERNEL_OK")
</pallas_src>

<mosaic_0001>
module attributes {stable_mosaic.version = 11 : i64} {
  func.func @_patch_embed_kernel(%arg0: i32, %arg1: memref<16x640xf32, #tpu.memory_space<vmem>>, %arg2: memref<640x128xf32, #tpu.memory_space<vmem>>, %arg3: memref<1x128xf32, #tpu.memory_space<vmem>>, %arg4: memref<16x128xf32, #tpu.memory_space<vmem>>) attributes {dimension_semantics = [#tpu.dimension_semantics<parallel>], iteration_bounds = array<i64: 2>, scalar_prefetch = 0 : i64, scratch_operands = 0 : i64, tpu.core_type = #tpu.core_type<tc>, window_params = [{transform_indices = @transform_0, window_bounds = array<i64: 16, 640>}, {pipeline_mode = #tpu.pipeline_mode<synchronous>, transform_indices = @transform_1, window_bounds = array<i64: 640, 128>}, {pipeline_mode = #tpu.pipeline_mode<synchronous>, transform_indices = @transform_2, window_bounds = array<i64: 1, 128>}, {transform_indices = @transform_3, window_bounds = array<i64: 16, 128>}]} {
    %c0 = arith.constant 0 : index
    %c0_0 = arith.constant 0 : index
    %0 = vector.load %arg1[%c0, %c0_0] : memref<16x640xf32, #tpu.memory_space<vmem>>, vector<16x640xf32>
    %c0_1 = arith.constant 0 : index
    %c0_2 = arith.constant 0 : index
    %1 = vector.load %arg2[%c0_1, %c0_2] : memref<640x128xf32, #tpu.memory_space<vmem>>, vector<640x128xf32>
    %cst = arith.constant dense<0.000000e+00> : vector<16x128xf32>
    %2 = tpu.matmul %0, %1, %cst {dimension_numbers = #tpu.dot_dimension_numbers<[1], [0], [0], [1], [0, 0, 1, 1], [], []>} : vector<16x640xf32>, vector<640x128xf32>, vector<16x128xf32> -> vector<16x128xf32>
    %c0_3 = arith.constant 0 : index
    %c0_4 = arith.constant 0 : index
    %3 = vector.load %arg3[%c0_3, %c0_4] : memref<1x128xf32, #tpu.memory_space<vmem>>, vector<1x128xf32>
    %4 = vector.broadcast %3 : vector<1x128xf32> to vector<16x128xf32>
    %5 = arith.addf %2, %4 : vector<16x128xf32>
    %c0_5 = arith.constant 0 : index
    %c0_6 = arith.constant 0 : index
    %6 = vector.load %arg4[%c0_5, %c0_6] : memref<16x128xf32, #tpu.memory_space<vmem>>, vector<16x128xf32>
    tpu.vector_store %arg4[%c0_5, %c0_6], %5 {strides = array<i32>} : memref<16x128xf32, #tpu.memory_space<vmem>>, vector<16x128xf32>,
    return
  }
  func.func @transform_0(%arg0: i32) -> (i32, i32) {
    %c0_i32 = arith.constant 0 : i32
    %c0_i32_0 = arith.constant 0 : i32
    return %arg0, %c0_i32 : i32, i32
  }
  func.func @transform_1(%arg0: i32) -> (i32, i32) {
    %c0_i32 = arith.constant 0 : i32
    %c0_i32_0 = arith.constant 0 : i32
    %c0_i32_1 = arith.constant 0 : i32
    return %c0_i32, %c0_i32_0 : i32, i32
  }
  func.func @transform_2(%arg0: i32) -> (i32, i32) {
    %c0_i32 = arith.constant 0 : i32
    %c0_i32_0 = arith.constant 0 : i32
    %c0_i32_1 = arith.constant 0 : i32
    return %c0_i32, %c0_i32_0 : i32, i32
  }
  func.func @transform_3(%arg0: i32) -> (i32, i32) {
    %c0_i32 = arith.constant 0 : i32
    %c0_i32_0 = arith.constant 0 : i32
    return %arg0, %c0_i32 : i32, i32
  }
}

module attributes {stable_mosaic.version = 11 : i64} {
  func.func @_blocks_kernel(%arg0: i32, %arg1: i32, %arg2: memref<1x17x128xf32, #tpu.memory_space<vmem>>, %arg3: memref<1x1x128xf32, #tpu.memory_space<vmem>>, %arg4: memref<1x1x128xf32, #tpu.memory_space<vmem>>, %arg5: memref<1x128x128xf32, #tpu.memory_space<vmem>>, %arg6: memref<1x1x128xf32, #tpu.memory_space<vmem>>, %arg7: memref<1x128x128xf32, #tpu.memory_space<vmem>>, %arg8: memref<1x1x128xf32, #tpu.memory_space<vmem>>, %arg9: memref<1x128x128xf32, #tpu.memory_space<vmem>>, %arg10: memref<1x1x128xf32, #tpu.memory_space<vmem>>, %arg11: memref<1x128x128xf32, #tpu.memory_space<vmem>>, %arg12: memref<1x1x128xf32, #tpu.memory_space<vmem>>, %arg13: memref<1x1x128xf32, #tpu.memory_space<vmem>>, %arg14: memref<1x1x128xf32, #tpu.memory_space<vmem>>, %arg15: memref<1x1x128xf32, #tpu.memory_space<vmem>>, %arg16: memref<1x128x384xf32, #tpu.memory_space<vmem>>, %arg17: memref<1x1x384xf32, #tpu.memory_space<vmem>>, %arg18: memref<1x128x384xf32, #tpu.memory_space<vmem>>, %arg19: memref<1x1x384xf32, #tpu.memory_space<vmem>>, %arg20: memref<1x384x128xf32, #tpu.memory_space<vmem>>, %arg21: memref<1x1x128xf32, #tpu.memory_space<vmem>>, %arg22: memref<1x1x128xf32, #tpu.memory_space<vmem>>, %arg23: memref<1x17x128xf32, #tpu.memory_space<vmem>>) attributes {dimension_semantics = [#tpu.dimension_semantics<parallel>, #tpu.dimension_semantics<arbitrary>], iteration_bounds = array<i64: 2, 2>, scalar_prefetch = 0 : i64, scratch_operands = 0 : i64, tpu.core_type = #tpu.core_type<tc>, window_params = [{transform_indices = @transform_0, window_bounds = array<i64: 1, 17, 128>}, {transform_indices = @transform_1, window_bounds = array<i64: 1, 1, 128>}, {transform_indices = @transform_2, window_bounds = array<i64: 1, 1, 128>}, {transform_indices = @transform_3, window_bounds = array<i64: 1, 128, 128>}, {transform_indices = @transform_4, window_bounds = array<i64: 1, 1, 128>}, {transform_indices = @transform_5, window_bounds = array<i64: 1, 128, 128>}, {transform_indices = @transform_6, window_bounds = array<i64: 1, 1, 128>}, {transform_indices = @transform_7, window_bounds = array<i64: 1, 128, 128>}, {transform_indices = @transform_8, window_bounds = array<i64: 1, 1, 128>}, {transform_indices = @transform_9, window_bounds = array<i64: 1, 128, 128>}, {transform_indices = @transform_10, window_bounds = array<i64: 1, 1, 128>}, {transform_indices = @transform_11, window_bounds = array<i64: 1, 1, 128>}, {transform_indices = @transform_12, window_bounds = array<i64: 1, 1, 128>}, {transform_indices = @transform_13, window_bounds = array<i64: 1, 1, 128>}, {transform_indices = @transform_14, window_bounds = array<i64: 1, 128, 384>}, {transform_indices = @transform_15, window_bounds = array<i64: 1, 1, 384>}, {transform_indices = @transform_16, window_bounds = array<i64: 1, 128, 384>}, {transform_indices = @transform_17, window_bounds = array<i64: 1, 1, 384>}, {transform_indices = @transform_18, window_bounds = array<i64: 1, 384, 128>}, {transform_indices = @transform_19, window_bounds = array<i64: 1, 1, 128>}, {transform_indices = @transform_20, window_bounds = array<i64: 1, 1, 128>}, {transform_indices = @transform_21, window_bounds = array<i64: 1, 17, 128>}]} {
    %c0_i32 = arith.constant 0 : i32
    %0 = arith.cmpi eq, %arg1, %c0_i32 : i32
    %1 = arith.extui %0 : i1 to i32
    %c0_i32_0 = arith.constant 0 : i32
    %2 = arith.cmpi ne, %1, %c0_i32_0 : i32
    scf.if %2 {
      %c0_89 = arith.constant 0 : index
      %c0_90 = arith.constant 0 : index
      %c0_91 = arith.constant 0 : index
      %149 = vector.load %arg2[%c0_89, %c0_90, %c0_91] : memref<1x17x128xf32, #tpu.memory_space<vmem>>, vector<1x17x128xf32>
      %150 = vector.shape_cast %149 : vector<1x17x128xf32> to vector<17x128xf32>
      %c0_92 = arith.constant 0 : index
      %c0_93 = arith.constant 0 : index
      %c0_94 = arith.constant 0 : index
      %151 = vector.load %arg23[%c0_92, %c0_93, %c0_94] : memref<1x17x128xf32, #tpu.memory_space<vmem>>, vector<1x17x128xf32>
      %152 = vector.shape_cast %151 : vector<1x17x128xf32> to vector<17x128xf32>
      %153 = vector.shape_cast %150 : vector<17x128xf32> to vector<1x17x128xf32>
      tpu.vector_store %arg23[%c0_92, %c0_93, %c0_94], %153 {strides = array<i32>} : memref<1x17x128xf32, #tpu.memory_space<vmem>>, vector<1x17x128xf32>,
    } else {
    }
    %c0 = arith.constant 0 : index
    %c0_1 = arith.constant 0 : index
    %c0_2 = arith.constant 0 : index
    %3 = vector.load %arg23[%c0, %c0_1, %c0_2] : memref<1x17x128xf32, #tpu.memory_space<vmem>>, vector<1x17x128xf32>
    %4 = vector.shape_cast %3 : vector<1x17x128xf32> to vector<17x128xf32>
    %c0_3 = arith.constant 0 : index
    %c0_4 = arith.constant 0 : index
    %c0_5 = arith.constant 0 : index
    %5 = vector.load %arg3[%c0_3, %c0_4, %c0_5] : memref<1x1x128xf32, #tpu.memory_space<vmem>>, vector<1x1x128xf32>
    %6 = vector.shape_cast %5 : vector<1x1x128xf32> to vector<1x128xf32>
    %c0_6 = arith.constant 0 : index
    %c0_7 = arith.constant 0 : index
    %c0_8 = arith.constant 0 : index
    %7 = vector.load %arg4[%c0_6, %c0_7, %c0_8] : memref<1x1x128xf32, #tpu.memory_space<vmem>>, vector<1x1x128xf32>
    %8 = vector.shape_cast %7 : vector<1x1x128xf32> to vector<1x128xf32>
    %cst = arith.constant dense<0.000000e+00> : vector<17xf32>
    %9 = vector.multi_reduction <add>, %4, %cst [1] : vector<17x128xf32> to vector<17xf32>
    %10 = vector.shape_cast %9 : vector<17xf32> to vector<17x1xf32>
    %cst_9 = arith.constant 1.280000e+02 : f32
    %11 = vector.broadcast %cst_9 : f32 to vector<17x1xf32>
    %12 = arith.divf %10, %11 : vector<17x1xf32>
    %13 = vector.broadcast %12 : vector<17x1xf32> to vector<17x128xf32>
    %14 = arith.subf %4, %13 : vector<17x128xf32>
    %15 = arith.mulf %14, %14 : vector<17x128xf32>
    %cst_10 = arith.constant dense<0.000000e+00> : vector<17xf32>
    %16 = vector.multi_reduction <add>, %15, %cst_10 [1] : vector<17x128xf32> to vector<17xf32>
    %17 = vector.shape_cast %16 : vector<17xf32> to vector<17x1xf32>
    %cst_11 = arith.constant 1.280000e+02 : f32
    %18 = vector.broadcast %cst_11 : f32 to vector<17x1xf32>
    %19 = arith.divf %17, %18 : vector<17x1xf32>
    %20 = vector.broadcast %12 : vector<17x1xf32> to vector<17x128xf32>
    %21 = arith.subf %4, %20 : vector<17x128xf32>
    %cst_12 = arith.constant 9.99999997E-7 : f32
    %22 = vector.broadcast %cst_12 : f32 to vector<17x1xf32>
    %23 = arith.addf %19, %22 : vector<17x1xf32>
    %24 = math.rsqrt %23 : vector<17x1xf32>
    %25 = vector.broadcast %24 : vector<17x1xf32> to vector<17x128xf32>
    %26 = arith.mulf %21, %25 : vector<17x128xf32>
    %27 = vector.broadcast %6 : vector<1x128xf32> to vector<17x128xf32>
    %28 = arith.mulf %26, %27 : vector<17x128xf32>
    %29 = vector.broadcast %8 : vector<1x128xf32> to vector<17x128xf32>
    %30 = arith.addf %28, %29 : vector<17x128xf32>
    %c0_13 = arith.constant 0 : index
    %c0_14 = arith.constant 0 : index
    %c0_15 = arith.constant 0 : index
    %31 = vector.load %arg5[%c0_13, %c0_14, %c0_15] : memref<1x128x128xf32, #tpu.memory_space<vmem>>, vector<1x128x128xf32>
    %32 = vector.shape_cast %31 : vector<1x128x128xf32> to vector<128x128xf32>
    %cst_16 = arith.constant dense<0.000000e+00> : vector<17x128xf32>
    %33 = tpu.matmul %30, %32, %cst_16 {dimension_numbers = #tpu.dot_dimension_numbers<[1], [0], [0], [1], [0, 0, 1, 1], [], []>} : vector<17x128xf32>, vector<128x128xf32>, vector<17x128xf32> -> vector<17x128xf32>
    %c0_17 = arith.constant 0 : index
    %c0_18 = arith.constant 0 : index
    %c0_19 = arith.constant 0 : index
    %34 = vector.load %arg6[%c0_17, %c0_18, %c0_19] : memref<1x1x128xf32, #tpu.memory_space<vmem>>, vector<1x1x128xf32>
    %35 = vector.shape_cast %34 : vector<1x1x128xf32> to vector<1x128xf32>
    %36 = vector.broadcast %35 : vector<1x128xf32> to vector<17x128xf32>
    %37 = arith.addf %33, %36 : vector<17x128xf32>
    %c0_20 = arith.constant 0 : index
    %c0_21 = arith.constant 0 : index
    %c0_22 = arith.constant 0 : index
    %38 = vector.load %arg7[%c0_20, %c0_21, %c0_22] : memref<1x128x128xf32, #tpu.memory_space<vmem>>, vector<1x128x128xf32>
    %39 = vector.shape_cast %38 : vector<1x128x128xf32> to vector<128x128xf32>
    %cst_23 = arith.constant dense<0.000000e+00> : vector<17x128xf32>
    %40 = tpu.matmul %30, %39, %cst_23 {dimension_numbers = #tpu.dot_dimension_numbers<[1], [0], [0], [1], [0, 0, 1, 1], [], []>} : vector<17x128xf32>, vector<128x128xf32>, vector<17x128xf32> -> vector<17x128xf32>
    %c0_24 = arith.constant 0 : index
    %c0_25 = arith.constant 0 : index
    %c0_26 = arith.constant 0 : index
    %41 = vector.load %arg8[%c0_24, %c0_25, %c0_26] : memref<1x1x128xf32, #tpu.memory_space<vmem>>, vector<1x1x128xf32>
    %42 = vector.shape_cast %41 : vector<1x1x128xf32> to vector<1x128xf32>
    %43 = vector.broadcast %42 : vector<1x128xf32> to vector<17x128xf32>
    %44 = arith.addf %40, %43 : vector<17x128xf32>
    %c0_27 = arith.constant 0 : index
    %c0_28 = arith.constant 0 : index
    %c0_29 = arith.constant 0 : index
    %45 = vector.load %arg9[%c0_27, %c0_28, %c0_29] : memref<1x128x128xf32, #tpu.memory_space<vmem>>, vector<1x128x128xf32>
    %46 = vector.shape_cast %45 : vector<1x128x128xf32> to vector<128x128xf32>
    %cst_30 = arith.constant dense<0.000000e+00> : vector<17x128xf32>
    %47 = tpu.matmul %30, %46, %cst_30 {dimension_numbers = #tpu.dot_dimension_numbers<[1], [0], [0], [1], [0, 0, 1, 1], [], []>} : vector<17x128xf32>, vector<128x128xf32>, vector<17x128xf32> -> vector<17x128xf32>
    %c0_31 = arith.constant 0 : index
    %c0_32 = arith.constant 0 : index
    %c0_33 = arith.constant 0 : index
    %48 = vector.load %arg10[%c0_31, %c0_32, %c0_33] : memref<1x1x128xf32, #tpu.memory_space<vmem>>, vector<1x1x128xf32>
    %49 = vector.shape_cast %48 : vector<1x1x128xf32> to vector<1x128xf32>
    %50 = vector.broadcast %49 : vector<1x128xf32> to vector<17x128xf32>
    %51 = arith.addf %47, %50 : vector<17x128xf32>
    %cst_34 = arith.constant 1.250000e-01 : f32
    %52 = vector.broadcast %cst_34 : f32 to vector<17x128xf32>
    %53 = arith.mulf %37, %52 : vector<17x128xf32>
    %54 = vector.shape_cast %53 : vector<17x128xf32> to vector<17x2x64xf32>
    %55 = tpu.transpose %54, [1, 0, 2] : vector<17x2x64xf32> -> vector<2x17x64xf32>
    %56 = vector.shape_cast %44 : vector<17x128xf32> to vector<17x2x64xf32>
    %57 = tpu.transpose %56, [1, 0, 2] : vector<17x2x64xf32> -> vector<2x17x64xf32>
    %58 = vector.shape_cast %51 : vector<17x128xf32> to vector<17x2x64xf32>
    %59 = tpu.transpose %58, [1, 0, 2] : vector<17x2x64xf32> -> vector<2x17x64xf32>
    "tpu.trace_start"() <{level = 10 : i32, message = "hqd,hkd->hqk"}> : () -> ()
    %cst_35 = arith.constant dense<0.000000e+00> : vector<2x17x17xf32>
    %60 = tpu.matmul %55, %57, %cst_35 {dimension_numbers = #tpu.dot_dimension_numbers<[2], [2], [1], [1], [0, 0, 0, 1, 1, 1], [0], [0]>} : vector<2x17x64xf32>, vector<2x17x64xf32>, vector<2x17x17xf32> -> vector<2x17x17xf32>
    "tpu.trace_stop"() : () -> ()
    %cst_36 = arith.constant dense<0xFF800000> : vector<2x17xf32>
    %61 = vector.multi_reduction <maximumf>, %60, %cst_36 [2] : vector<2x17x17xf32> to vector<2x17xf32>
    %62 = vector.shape_cast %61 : vector<2x17xf32> to vector<2x17x1xf32>
    %63 = vector.broadcast %62 : vector<2x17x1xf32> to vector<2x17x17xf32>
    %64 = arith.subf %60, %63 : vector<2x17x17xf32>
    %65 = math.exp %64 : vector<2x17x17xf32>
    %cst_37 = arith.constant dense<0.000000e+00> : vector<2x17xf32>
    %66 = vector.multi_reduction <add>, %65, %cst_37 [2] : vector<2x17x17xf32> to vector<2x17xf32>
    %67 = vector.shape_cast %66 : vector<2x17xf32> to vector<2x17x1xf32>
    %68 = tpu.reciprocal %67 {approx = true} : vector<2x17x1xf32> -> vector<2x17x1xf32>
    %69 = vector.broadcast %68 : vector<2x17x1xf32> to vector<2x17x17xf32>
    %70 = arith.mulf %65, %69 : vector<2x17x17xf32>
    "tpu.trace_start"() <{level = 10 : i32, message = "hqk,hkd->hqd"}> : () -> ()
    %cst_38 = arith.constant dense<0.000000e+00> : vector<2x17x64xf32>
    %71 = tpu.matmul %70, %59, %cst_38 {dimension_numbers = #tpu.dot_dimension_numbers<[2], [1], [1], [2], [0, 0, 0, 1, 1, 2], [0], [0]>} : vector<2x17x17xf32>, vector<2x17x64xf32>, vector<2x17x64xf32> -> vector<2x17x64xf32>
    "tpu.trace_stop"() : () -> ()
    %72 = tpu.transpose %71, [1, 0, 2] : vector<2x17x64xf32> -> vector<17x2x64xf32>
    %73 = vector.shape_cast %72 : vector<17x2x64xf32> to vector<17x128xf32>
    %c0_39 = arith.constant 0 : index
    %c0_40 = arith.constant 0 : index
    %c0_41 = arith.constant 0 : index
    %74 = vector.load %arg11[%c0_39, %c0_40, %c0_41] : memref<1x128x128xf32, #tpu.memory_space<vmem>>, vector<1x128x128xf32>
    %75 = vector.shape_cast %74 : vector<1x128x128xf32> to vector<128x128xf32>
    %cst_42 = arith.constant dense<0.000000e+00> : vector<17x128xf32>
    %76 = tpu.matmul %73, %75, %cst_42 {dimension_numbers = #tpu.dot_dimension_numbers<[1], [0], [0], [1], [0, 0, 1, 1], [], []>} : vector<17x128xf32>, vector<128x128xf32>, vector<17x128xf32> -> vector<17x128xf32>
    %c0_43 = arith.constant 0 : index
    %c0_44 = arith.constant 0 : index
    %c0_45 = arith.constant 0 : index
    %77 = vector.load %arg12[%c0_43, %c0_44, %c0_45] : memref<1x1x128xf32, #tpu.memory_space<vmem>>, vector<1x1x128xf32>
    %78 = vector.shape_cast %77 : vector<1x1x128xf32> to vector<1x128xf32>
    %79 = vector.broadcast %78 : vector<1x128xf32> to vector<17x128xf32>
    %80 = arith.addf %76, %79 : vector<17x128xf32>
    %c0_46 = arith.constant 0 : index
    %c0_47 = arith.constant 0 : index
    %c0_48 = arith.constant 0 : index
    %81 = vector.load %arg13[%c0_46, %c0_47, %c0_48] : memref<1x1x128xf32, #tpu.memory_space<vmem>>, vector<1x1x128xf32>
    %82 = vector.shape_cast %81 : vector<1x1x128xf32> to vector<1x128xf32>
    %83 = vector.broadcast %82 : vector<1x128xf32> to vector<17x128xf32>
    %84 = arith.mulf %80, %83 : vector<17x128xf32>
    %85 = arith.addf %4, %84 : vector<17x128xf32>
    %c0_49 = arith.constant 0 : index
    %c0_50 = arith.constant 0 : index
    %c0_51 = arith.constant 0 : index
    %86 = vector.load %arg14[%c0_49, %c0_50, %c0_51] : memref<1x1x128xf32, #tpu.memory_space<vmem>>, vector<1x1x128xf32>
    %87 = vector.shape_cast %86 : vector<1x1x128xf32> to vector<1x128xf32>
    %c0_52 = arith.constant 0 : index
    %c0_53 = arith.constant 0 : index
    %c0_54 = arith.constant 0 : index
    %88 = vector.load %arg15[%c0_52, %c0_53, %c0_54] : memref<1x1x128xf32, #tpu.memory_space<vmem>>, vector<1x1x128xf32>
    %89 = vector.shape_cast %88 : vector<1x1x128xf32> to vector<1x128xf32>
    %cst_55 = arith.constant dense<0.000000e+00> : vector<17xf32>
    %90 = vector.multi_reduction <add>, %85, %cst_55 [1] : vector<17x128xf32> to vector<17xf32>
    %91 = vector.shape_cast %90 : vector<17xf32> to vector<17x1xf32>
    %cst_56 = arith.constant 1.280000e+02 : f32
    %92 = vector.broadcast %cst_56 : f32 to vector<17x1xf32>
    %93 = arith.divf %91, %92 : vector<17x1xf32>
    %94 = vector.broadcast %93 : vector<17x1xf32> to vector<17x128xf32>
    %95 = arith.subf %85, %94 : vector<17x128xf32>
    %96 = arith.mulf %95, %95 : vector<17x128xf32>
    %cst_57 = arith.constant dense<0.000000e+00> : vector<17xf32>
    %97 = vector.multi_reduction <add>, %96, %cst_57 [1] : vector<17x128xf32> to vector<17xf32>
    %98 = vector.shape_cast %97 : vector<17xf32> to vector<17x1xf32>
    %cst_58 = arith.constant 1.280000e+02 : f32
    %99 = vector.broadcast %cst_58 : f32 to vector<17x1xf32>
    %100 = arith.divf %98, %99 : vector<17x1xf32>
    %101 = vector.broadcast %93 : vector<17x1xf32> to vector<17x128xf32>
    %102 = arith.subf %85, %101 : vector<17x128xf32>
    %cst_59 = arith.constant 9.99999997E-7 : f32
    %103 = vector.broadcast %cst_59 : f32 to vector<17x1xf32>
    %104 = arith.addf %100, %103 : vector<17x1xf32>
    %105 = math.rsqrt %104 : vector<17x1xf32>
    %106 = vector.broadcast %105 : vector<17x1xf32> to vector<17x128xf32>
    %107 = arith.mulf %102, %106 : vector<17x128xf32>
    %108 = vector.broadcast %87 : vector<1x128xf32> to vector<17x128xf32>
    %109 = arith.mulf %107, %108 : vector<17x128xf32>
    %110 = vector.broadcast %89 : vector<1x128xf32> to vector<17x128xf32>
    %111 = arith.addf %109, %110 : vector<17x128xf32>
    %c0_60 = arith.constant 0 : index
    %c0_61 = arith.constant 0 : index
    %c0_62 = arith.constant 0 : index
    %112 = vector.load %arg16[%c0_60, %c0_61, %c0_62] : memref<1x128x384xf32, #tpu.memory_space<vmem>>, vector<1x128x384xf32>
    %113 = vector.shape_cast %112 : vector<1x128x384xf32> to vector<128x384xf32>
    %cst_63 = arith.constant dense<0.000000e+00> : vector<17x384xf32>
    %114 = tpu.matmul %111, %113, %cst_63 {dimension_numbers = #tpu.dot_dimension_numbers<[1], [0], [0], [1], [0, 0, 1, 1], [], []>} : vector<17x128xf32>, vector<128x384xf32>, vector<17x384xf32> -> vector<17x384xf32>
    %c0_64 = arith.constant 0 : index
    %c0_65 = arith.constant 0 : index
    %c0_66 = arith.constant 0 : index
    %115 = vector.load %arg17[%c0_64, %c0_65, %c0_66] : memref<1x1x384xf32, #tpu.memory_space<vmem>>, vector<1x1x384xf32>
    %116 = vector.shape_cast %115 : vector<1x1x384xf32> to vector<1x384xf32>
    %117 = vector.broadcast %116 : vector<1x384xf32> to vector<17x384xf32>
    %118 = arith.addf %114, %117 : vector<17x384xf32>
    %c0_67 = arith.constant 0 : index
    %c0_68 = arith.constant 0 : index
    %c0_69 = arith.constant 0 : index
    %119 = vector.load %arg18[%c0_67, %c0_68, %c0_69] : memref<1x128x384xf32, #tpu.memory_space<vmem>>, vector<1x128x384xf32>
    %120 = vector.shape_cast %119 : vector<1x128x384xf32> to vector<128x384xf32>
    %cst_70 = arith.constant dense<0.000000e+00> : vector<17x384xf32>
    %121 = tpu.matmul %111, %120, %cst_70 {dimension_numbers = #tpu.dot_dimension_numbers<[1], [0], [0], [1], [0, 0, 1, 1], [], []>} : vector<17x128xf32>, vector<128x384xf32>, vector<17x384xf32> -> vector<17x384xf32>
    %c0_71 = arith.constant 0 : index
    %c0_72 = arith.constant 0 : index
    %c0_73 = arith.constant 0 : index
    %122 = vector.load %arg19[%c0_71, %c0_72, %c0_73] : memref<1x1x384xf32, #tpu.memory_space<vmem>>, vector<1x1x384xf32>
    %123 = vector.shape_cast %122 : vector<1x1x384xf32> to vector<1x384xf32>
    %124 = vector.broadcast %123 : vector<1x384xf32> to vector<17x384xf32>
    %125 = arith.addf %121, %124 : vector<17x384xf32>
    %cst_74 = arith.constant 0.000000e+00 : f32
    %126 = vector.broadcast %cst_74 : f32 to vector<17x384xf32>
    %127 = arith.subf %126, %118 : vector<17x384xf32>
    %128 = math.exp %127 : vector<17x384xf32>
    %cst_75 = arith.constant 1.000000e+00 : f32
    %129 = vector.broadcast %cst_75 : f32 to vector<17x384xf32>
    %130 = arith.addf %129, %128 : vector<17x384xf32>
    %131 = tpu.reciprocal %130 {approx = true} : vector<17x384xf32> -> vector<17x384xf32>
    %132 = arith.mulf %118, %131 : vector<17x384xf32>
    %133 = arith.mulf %132, %125 : vector<17x384xf32>
    %c0_76 = arith.constant 0 : index
    %c0_77 = arith.constant 0 : index
    %c0_78 = arith.constant 0 : index
    %134 = vector.load %arg20[%c0_76, %c0_77, %c0_78] : memref<1x384x128xf32, #tpu.memory_space<vmem>>, vector<1x384x128xf32>
    %135 = vector.shape_cast %134 : vector<1x384x128xf32> to vector<384x128xf32>
    %cst_79 = arith.constant dense<0.000000e+00> : vector<17x128xf32>
    %136 = tpu.matmul %133, %135, %cst_79 {dimension_numbers = #tpu.dot_dimension_numbers<[1], [0], [0], [1], [0, 0, 1, 1], [], []>} : vector<17x384xf32>, vector<384x128xf32>, vector<17x128xf32> -> vector<17x128xf32>
    %c0_80 = arith.constant 0 : index
    %c0_81 = arith.constant 0 : index
    %c0_82 = arith.constant 0 : index
    %137 = vector.load %arg21[%c0_80, %c0_81, %c0_82] : memref<1x1x128xf32, #tpu.memory_space<vmem>>, vector<1x1x128xf32>
    %138 = vector.shape_cast %137 : vector<1x1x128xf32> to vector<1x128xf32>
    %139 = vector.broadcast %138 : vector<1x128xf32> to vector<17x128xf32>
    %140 = arith.addf %136, %139 : vector<17x128xf32>
    %c0_83 = arith.constant 0 : index
    %c0_84 = arith.constant 0 : index
    %c0_85 = arith.constant 0 : index
    %141 = vector.load %arg22[%c0_83, %c0_84, %c0_85] : memref<1x1x128xf32, #tpu.memory_space<vmem>>, vector<1x1x128xf32>
    %142 = vector.shape_cast %141 : vector<1x1x128xf32> to vector<1x128xf32>
    %143 = vector.broadcast %142 : vector<1x128xf32> to vector<17x128xf32>
    %144 = arith.mulf %140, %143 : vector<17x128xf32>
    %145 = arith.addf %85, %144 : vector<17x128xf32>
    %c0_86 = arith.constant 0 : index
    %c0_87 = arith.constant 0 : index
    %c0_88 = arith.constant 0 : index
    %146 = vector.load %arg23[%c0_86, %c0_87, %c0_88] : memref<1x17x128xf32, #tpu.memory_space<vmem>>, vector<1x17x128xf32>
    %147 = vector.shape_cast %146 : vector<1x17x128xf32> to vector<17x128xf32>
    %148 = vector.shape_cast %145 : vector<17x128xf32> to vector<1x17x128xf32>
    tpu.vector_store %arg23[%c0_86, %c0_87, %c0_88], %148 {strides = array<i32>} : memref<1x17x128xf32, #tpu.memory_space<vmem>>, vector<1x17x128xf32>,
    return
  }
  func.func @transform_0(%arg0: i32, %arg1: i32) -> (i32, i32, i32) {
    %c0_i32 = arith.constant 0 : i32
    %c0_i32_0 = arith.constant 0 : i32
    %c0_i32_1 = arith.constant 0 : i32
    return %arg0, %c0_i32, %c0_i32_0 : i32, i32, i32
  }
  func.func @transform_1(%arg0: i32, %arg1: i32) -> (i32, i32, i32) {
    %c0_i32 = arith.constant 0 : i32
    %c0_i32_0 = arith.constant 0 : i32
    %c0_i32_1 = arith.constant 0 : i32
    return %arg1, %c0_i32, %c0_i32_0 : i32, i32, i32
  }
  func.func @transform_2(%arg0: i32, %arg1: i32) -> (i32, i32, i32) {
    %c0_i32 = arith.constant 0 : i32
    %c0_i32_0 = arith.constant 0 : i32
    %c0_i32_1 = arith.constant 0 : i32
    return %arg1, %c0_i32, %c0_i32_0 : i32, i32, i32
  }
  func.func @transform_3(%arg0: i32, %arg1: i32) -> (i32, i32, i32) {
    %c0_i32 = arith.constant 0 : i32
    %c0_i32_0 = arith.constant 0 : i32
    %c0_i32_1 = arith.constant 0 : i32
    return %arg1, %c0_i32, %c0_i32_0 : i32, i32, i32
  }
  func.func @transform_4(%arg0: i32, %arg1: i32) -> (i32, i32, i32) {
    %c0_i32 = arith.constant 0 : i32
    %c0_i32_0 = arith.constant 0 : i32
    %c0_i32_1 = arith.constant 0 : i32
    return %arg1, %c0_i32, %c0_i32_0 : i32, i32, i32
  }
  func.func @transform_5(%arg0: i32, %arg1: i32) -> (i32, i32, i32) {
    %c0_i32 = arith.constant 0 : i32
    %c0_i32_0 = arith.constant 0 : i32
    %c0_i32_1 = arith.constant 0 : i32
    return %arg1, %c0_i32, %c0_i32_0 : i32, i32, i32
  }
  func.func @transform_6(%arg0: i32, %arg1: i32) -> (i32, i32, i32) {
    %c0_i32 = arith.constant 0 : i32
    %c0_i32_0 = arith.constant 0 : i32
    %c0_i32_1 = arith.constant 0 : i32
    return %arg1, %c0_i32, %c0_i32_0 : i32, i32, i32
  }
  func.func @transform_7(%arg0: i32, %arg1: i32) -> (i32, i32, i32) {
    %c0_i32 = arith.constant 0 : i32
    %c0_i32_0 = arith.constant 0 : i32
    %c0_i32_1 = arith.constant 0 : i32
    return %arg1, %c0_i32, %c0_i32_0 : i32, i32, i32
  }
  func.func @transform_8(%arg0: i32, %arg1: i32) -> (i32, i32, i32) {
    %c0_i32 = arith.constant 0 : i32
    %c0_i32_0 = arith.constant 0 : i32
    %c0_i32_1 = arith.constant 0 : i32
    return %arg1, %c0_i32, %c0_i32_0 : i32, i32, i32
  }
  func.func @transform_9(%arg0: i32, %arg1: i32) -> (i32, i32, i32) {
    %c0_i32 = arith.constant 0 : i32
    %c0_i32_0 = arith.constant 0 : i32
    %c0_i32_1 = arith.constant 0 : i32
    return %arg1, %c0_i32, %c0_i32_0 : i32, i32, i32
  }
  func.func @transform_10(%arg0: i32, %arg1: i32) -> (i32, i32, i32) {
    %c0_i32 = arith.constant 0 : i32
    %c0_i32_0 = arith.constant 0 : i32
    %c0_i32_1 = arith.constant 0 : i32
    return %arg1, %c0_i32, %c0_i32_0 : i32, i32, i32
  }
  func.func @transform_11(%arg0: i32, %arg1: i32) -> (i32, i32, i32) {
    %c0_i32 = arith.constant 0 : i32
    %c0_i32_0 = arith.constant 0 : i32
    %c0_i32_1 = arith.constant 0 : i32
    return %arg1, %c0_i32, %c0_i32_0 : i32, i32, i32
  }
  func.func @transform_12(%arg0: i32, %arg1: i32) -> (i32, i32, i32) {
    %c0_i32 = arith.constant 0 : i32
    %c0_i32_0 = arith.constant 0 : i32
    %c0_i32_1 = arith.constant 0 : i32
    return %arg1, %c0_i32, %c0_i32_0 : i32, i32, i32
  }
  func.func @transform_13(%arg0: i32, %arg1: i32) -> (i32, i32, i32) {
    %c0_i32 = arith.constant 0 : i32
    %c0_i32_0 = arith.constant 0 : i32
    %c0_i32_1 = arith.constant 0 : i32
    return %arg1, %c0_i32, %c0_i32_0 : i32, i32, i32
  }
  func.func @transform_14(%arg0: i32, %arg1: i32) -> (i32, i32, i32) {
    %c0_i32 = arith.constant 0 : i32
    %c0_i32_0 = arith.constant 0 : i32
    %c0_i32_1 = arith.constant 0 : i32
    return %arg1, %c0_i32, %c0_i32_0 : i32, i32, i32
  }
  func.func @transform_15(%arg0: i32, %arg1: i32) -> (i32, i32, i32) {
    %c0_i32 = arith.constant 0 : i32
    %c0_i32_0 = arith.constant 0 : i32
    %c0_i32_1 = arith.constant 0 : i32
    return %arg1, %c0_i32, %c0_i32_0 : i32, i32, i32
  }
  func.func @transform_16(%arg0: i32, %arg1: i32) -> (i32, i32, i32) {
    %c0_i32 = arith.constant 0 : i32
    %c0_i32_0 = arith.constant 0 : i32
    %c0_i32_1 = arith.constant 0 : i32
    return %arg1, %c0_i32, %c0_i32_0 : i32, i32, i32
  }
  func.func @transform_17(%arg0: i32, %arg1: i32) -> (i32, i32, i32) {
    %c0_i32 = arith.constant 0 : i32
    %c0_i32_0 = arith.constant 0 : i32
    %c0_i32_1 = arith.constant 0 : i32
    return %arg1, %c0_i32, %c0_i32_0 : i32, i32, i32
  }
  func.func @transform_18(%arg0: i32, %arg1: i32) -> (i32, i32, i32) {
    %c0_i32 = arith.constant 0 : i32
    %c0_i32_0 = arith.constant 0 : i32
    %c0_i32_1 = arith.constant 0 : i32
    return %arg1, %c0_i32, %c0_i32_0 : i32, i32, i32
  }
  func.func @transform_19(%arg0: i32, %arg1: i32) -> (i32, i32, i32) {
    %c0_i32 = arith.constant 0 : i32
    %c0_i32_0 = arith.constant 0 : i32
    %c0_i32_1 = arith.constant 0 : i32
    return %arg1, %c0_i32, %c0_i32_0 : i32, i32, i32
  }
  func.func @transform_20(%arg0: i32, %arg1: i32) -> (i32, i32, i32) {
    %c0_i32 = arith.constant 0 : i32
    %c0_i32_0 = arith.constant 0 : i32
    %c0_i32_1 = arith.constant 0 : i32
    return %arg1, %c0_i32, %c0_i32_0 : i32, i32, i32
  }
  func.func @transform_21(%arg0: i32, %arg1: i32) -> (i32, i32, i32) {
    %c0_i32 = arith.constant 0 : i32
    %c0_i32_0 = arith.constant 0 : i32
    %c0_i32_1 = arith.constant 0 : i32
    return %arg0, %c0_i32, %c0_i32_0 : i32, i32, i32
  }
}

module attributes {stable_mosaic.version = 11 : i64} {
  func.func @_head_kernel(%arg0: i32, %arg1: memref<1x17x128xf32, #tpu.memory_space<vmem>>, %arg2: memref<1x128xf32, #tpu.memory_space<vmem>>, %arg3: memref<1x128xf32, #tpu.memory_space<vmem>>, %arg4: memref<1x2x128xf32, #tpu.memory_space<vmem>>) attributes {dimension_semantics = [#tpu.dimension_semantics<parallel>], iteration_bounds = array<i64: 2>, scalar_prefetch = 0 : i64, scratch_operands = 0 : i64, tpu.core_type = #tpu.core_type<tc>, window_params = [{transform_indices = @transform_0, window_bounds = array<i64: 1, 17, 128>}, {pipeline_mode = #tpu.pipeline_mode<synchronous>, transform_indices = @transform_1, window_bounds = array<i64: 1, 128>}, {pipeline_mode = #tpu.pipeline_mode<synchronous>, transform_indices = @transform_2, window_bounds = array<i64: 1, 128>}, {transform_indices = @transform_3, window_bounds = array<i64: 1, 2, 128>}]} {
    %c0 = arith.constant 0 : index
    %c0_0 = arith.constant 0 : index
    %c0_1 = arith.constant 0 : index
    %0 = vector.load %arg1[%c0, %c0_0, %c0_1] : memref<1x17x128xf32, #tpu.memory_space<vmem>>, vector<1x17x128xf32>
    %1 = vector.shape_cast %0 : vector<1x17x128xf32> to vector<17x128xf32>
    %cst = arith.constant dense<0.000000e+00> : vector<17xf32>
    %2 = vector.multi_reduction <add>, %1, %cst [1] : vector<17x128xf32> to vector<17xf32>
    %3 = vector.shape_cast %2 : vector<17xf32> to vector<17x1xf32>
    %cst_2 = arith.constant 1.280000e+02 : f32
    %4 = vector.broadcast %cst_2 : f32 to vector<17x1xf32>
    %5 = arith.divf %3, %4 : vector<17x1xf32>
    %6 = vector.broadcast %5 : vector<17x1xf32> to vector<17x128xf32>
    %7 = arith.subf %1, %6 : vector<17x128xf32>
    %8 = arith.mulf %7, %7 : vector<17x128xf32>
    %cst_3 = arith.constant dense<0.000000e+00> : vector<17xf32>
    %9 = vector.multi_reduction <add>, %8, %cst_3 [1] : vector<17x128xf32> to vector<17xf32>
    %10 = vector.shape_cast %9 : vector<17xf32> to vector<17x1xf32>
    %cst_4 = arith.constant 1.280000e+02 : f32
    %11 = vector.broadcast %cst_4 : f32 to vector<17x1xf32>
    %12 = arith.divf %10, %11 : vector<17x1xf32>
    %13 = vector.broadcast %5 : vector<17x1xf32> to vector<17x128xf32>
    %14 = arith.subf %1, %13 : vector<17x128xf32>
    %cst_5 = arith.constant 9.99999997E-7 : f32
    %15 = vector.broadcast %cst_5 : f32 to vector<17x1xf32>
    %16 = arith.addf %12, %15 : vector<17x1xf32>
    %17 = math.rsqrt %16 : vector<17x1xf32>
    %18 = vector.broadcast %17 : vector<17x1xf32> to vector<17x128xf32>
    %19 = arith.mulf %14, %18 : vector<17x128xf32>
    %c0_6 = arith.constant 0 : index
    %c0_7 = arith.constant 0 : index
    %20 = vector.load %arg2[%c0_6, %c0_7] : memref<1x128xf32, #tpu.memory_space<vmem>>, vector<1x128xf32>
    %21 = vector.broadcast %20 : vector<1x128xf32> to vector<17x128xf32>
    %22 = arith.mulf %19, %21 : vector<17x128xf32>
    %c0_8 = arith.constant 0 : index
    %c0_9 = arith.constant 0 : index
    %23 = vector.load %arg3[%c0_8, %c0_9] : memref<1x128xf32, #tpu.memory_space<vmem>>, vector<1x128xf32>
    %24 = vector.broadcast %23 : vector<1x128xf32> to vector<17x128xf32>
    %25 = arith.addf %22, %24 : vector<17x128xf32>
    %26 = vector.extract_strided_slice %25 {offsets = [0, 0], sizes = [1, 128], strides = [1, 1]} : vector<17x128xf32> to vector<1x128xf32>
    %27 = vector.extract_strided_slice %25 {offsets = [1, 0], sizes = [16, 128], strides = [1, 1]} : vector<17x128xf32> to vector<16x128xf32>
    %cst_10 = arith.constant dense<0.000000e+00> : vector<128xf32>
    %28 = vector.multi_reduction <add>, %27, %cst_10 [0] : vector<16x128xf32> to vector<128xf32>
    %29 = vector.shape_cast %28 : vector<128xf32> to vector<1x128xf32>
    %cst_11 = arith.constant 1.600000e+01 : f32
    %30 = vector.broadcast %cst_11 : f32 to vector<1x128xf32>
    %31 = arith.divf %29, %30 : vector<1x128xf32>
    %32 = tpu.concatenate %26, %31 in 0 : vector<1x128xf32>, vector<1x128xf32> -> vector<2x128xf32>
    %c0_12 = arith.constant 0 : index
    %c0_13 = arith.constant 0 : index
    %c0_14 = arith.constant 0 : index
    %33 = vector.load %arg4[%c0_12, %c0_13, %c0_14] : memref<1x2x128xf32, #tpu.memory_space<vmem>>, vector<1x2x128xf32>
    %34 = vector.shape_cast %33 : vector<1x2x128xf32> to vector<2x128xf32>
    %35 = vector.shape_cast %32 : vector<2x128xf32> to vector<1x2x128xf32>
    tpu.vector_store %arg4[%c0_12, %c0_13, %c0_14], %35 {strides = array<i32>} : memref<1x2x128xf32, #tpu.memory_space<vmem>>, vector<1x2x128xf32>,
    return
  }
  func.func @transform_0(%arg0: i32) -> (i32, i32, i32) {
    %c0_i32 = arith.constant 0 : i32
    %c0_i32_0 = arith.constant 0 : i32
    %c0_i32_1 = arith.constant 0 : i32
    return %arg0, %c0_i32, %c0_i32_0 : i32, i32, i32
  }
  func.func @transform_1(%arg0: i32) -> (i32, i32) {
    %c0_i32 = arith.constant 0 : i32
    %c0_i32_0 = arith.constant 0 : i32
    %c0_i32_1 = arith.constant 0 : i32
    return %c0_i32, %c0_i32_0 : i32, i32
  }
  func.func @transform_2(%arg0: i32) -> (i32, i32) {
    %c0_i32 = arith.constant 0 : i32
    %c0_i32_0 = arith.constant 0 : i32
    %c0_i32_1 = arith.constant 0 : i32
    return %c0_i32, %c0_i32_0 : i32, i32
  }
  func.func @transform_3(%arg0: i32) -> (i32, i32, i32) {
    %c0_i32 = arith.constant 0 : i32
    %c0_i32_0 = arith.constant 0 : i32
    %c0_i32_1 = arith.constant 0 : i32
    return %arg0, %c0_i32, %c0_i32_0 : i32, i32, i32
  }
}

</mosaic_0001>

<bundles_post_ra>
// kernel: tum_vitg_forward.5
= control target key start
LH: loop header
LB: loop body
LE: loop exit
PB: predicated region body
PF: predicated region fallthrough
CT: control target
= control target key end

     0   :  { %s358_s12 = smov 0   ;;  %s388_s0 = inlined_call_operand.vmem [shape: f32[2,17,128], index: 0, kind: input, shape index: {}]   ;;  %s389_s1 = inlined_call_operand.vmem [shape: f32[1,128], index: 1, kind: input, shape index: {}]   ;;  %s390_s2 = inlined_call_operand.vmem [shape: f32[1,128], index: 2, kind: input, shape index: {}]   ;;  %s391_s3 = inlined_call_operand.vmem [shape: f32[2,2,128], index: 3, kind: output, shape index: {}]  }
   0x1 LB: > { %s304_s13 = sadd.s32 4294967295, %s336_s12   ;;  %p308_p0 = scmp.ge.s32.totalorder %s336_s12, 1  ;;  %s336_s12 = sphi %s358_s12, %s13_s12  }
   0x2   : > { %p137_p1 = scmp.lt.s32.totalorder %s336_s12, 3 }
   0x4   : > { %p138_p2 = pnand %p308_p0, %p137_p1 }
   0x5   : > { %p160_p3 = scmp.lt.s32.totalorder (!%p138_p2), %s304_s13, 1 }
   0x6   : > { %141 = sbr.rel (%p138_p2) target bundleno = 352 (0x160), region = 32 }
   0xb   : > { %s393_s13 = smov (!%p160_p3, %s304_s13), 1  ;;  %vm176_vm0 = vcmask 1040384   ;;  %v311_v29 = vld [vmem:[%s389_s1] ss:$0 sm:$0xff]  ;;  %vm232_vm1 = vcmask 1046528  }
   0xc   : > { %s315_s14 = smul.u32 24, %s393_s13  ;;  %v312_v34 = vld [vmem:[%s390_s2] ss:$0 sm:$0xff]  ;;  %s310_s22 = sshll.u32 %s393_s13, 1 }
   0xd   : > { %s168_s25 = scalar_lea.vmem %s391_s3, %s310_s22 }
   0xe   : > { %s164_s17 = scalar_lea.vmem %s388_s0, %s315_s14 }
   0xf   : > { %v170_v0 = vld [vmem:[%s164_s17 + $0x8] sm:$0xff]  ;;  %v171_v1 = vld [vmem:[%s164_s17 + $0x10] sm:$0x1]  ;;  %v169_v3 = vld [vmem:[%s164_s17] sm:$0xff] }
  0x10   : > { %174 = vadd.xlane.f32.xlu1 %v170_v0  ;;  %v177_v2 = vsel %vm176_vm0, %v171_v1, 0.0 }
  0x11   : > { %178 = vadd.xlane.f32.xlu0 %v177_v2 }
  0x15   : > { %172 = vadd.xlane.f32.xlu0 %v169_v3 }
  0x99   : > { %v175_v4 = vpop.xlane.xlu1 %174 }
  0x9a   : > { %v182_v5 = vmul.f32 0.0078125, %v175_v4  ;;  %v179_v6 = vpop.xlane.xlu0 %178 }
  0x9b   : > { %v183_v8 = vmul.f32 0.0078125, %v179_v6 }
  0x9c   : > { %v185_v7 = vsub.f32 %v170_v0, %v182_v5 }
  0x9d   : > { %v186_v12 = vsub.f32 %v171_v1, %v183_v8 }
  0x9e   : > { %v173_v9 = vpop.xlane.xlu0 %172  ;;  %v188_v10 = vmul.f32 %v185_v7, %v185_v7 }
  0x9f   : > { %v181_v11 = vmul.f32 0.0078125, %v173_v9  ;;  %v189_v15 = vmul.f32 %v186_v12, %v186_v12 }
  0xa0   : > { %192 = vadd.xlane.f32.xlu0 %v188_v10 }
  0xa1   : > { %v184_v13 = vsub.f32 %v169_v3, %v181_v11  ;;  %v194_v16 = vsel %vm176_vm0, %v189_v15, 0.0 }
  0xa3   : > { %v187_v14 = vmul.f32 %v184_v13, %v184_v13 }
  0xa5   : > { %190 = vadd.xlane.f32.xlu1 %v187_v14 }
  0xa9   : > { %195 = vadd.xlane.f32.xlu1 %v194_v16 }
 0x129   : > { %v193_v17 = vpop.xlane.xlu0 %192 }
 0x12a   : > { %v198_v18 = vmul.f32 0.0078125, %v193_v17 }
 0x12c   : > { %v201_v19 = vadd.f32 1e-06, %v198_v18 }
 0x12e   : > { %v191_v20 = vpop.xlane.xlu1 %190  ;;  %324 = vrsqrt.f32 %v201_v19 }
 0x12f   : > { %v197_v21 = vmul.f32 0.0078125, %v191_v20 }
 0x131   : > { %v200_v22 = vadd.f32 1e-06, %v197_v21 }
 0x132   : > { %v196_v23 = vpop.xlane.xlu1 %195 }
 0x133   : > { %326 = vrsqrt.f32 %v200_v22  ;;  %v199_v24 = vmul.f32 0.0078125, %v196_v23 }
 0x135   : > { %v202_v25 = vadd.f32 1e-06, %v199_v24 }
 0x137   : > { %328 = vrsqrt.f32 %v202_v25 }
 0x13b   : > { %v325_v26 = vpop.eup %324 }
 0x13c   : > { %v207_v27 = vmul.f32 %v325_v26, %v185_v7 }
 0x13e   : > { %v217_v31 = vmul.f32 %v311_v29, %v207_v27 }
 0x140   : > { %v327_v28 = vpop.eup %326  ;;  %v227_v37 = vadd.f32 %v312_v34, %v217_v31 }
 0x141   : > { %v206_v30 = vmul.f32 %v327_v28, %v184_v13 }
 0x142   : > { %v234_v41 = vrot.slane %v227_v37, 1 }
 0x143   : > { %v216_v32 = vmul.f32 %v311_v29, %v206_v30 }
 0x144   : > { %v329_v33 = vpop.eup %328 }
 0x145   : > { %v226_v35 = vadd.f32 %v312_v34, %v216_v32  ;;  %v208_v36 = vmul.f32 %v329_v33, %v186_v12 }
 0x147   : > { %v218_v38 = vmul.f32 %v311_v29, %v208_v36  ;;  %v233_v39 = vrot.slane %v226_v35, 1 }
 0x149   : > { %v228_v40 = vadd.f32 %v312_v34, %v218_v38  ;;  %v235_v43 = vsel %vm232_vm1, %v233_v39, %v234_v41 }
 0x14b   : > { %v236_v42 = vrot.slane %v228_v40, 1 }
 0x14d   : > { %v237_v44 = vsel %vm232_vm1, %v234_v41, %v236_v42 }
 0x14e   : > { %v240_v45 = vadd.f32 %v237_v44, %v235_v43 }
 0x150   : > { %v241_v46 = vrot.slane %v240_v45, 4 }
 0x152   : > { %v242_v47 = vadd.f32 %v241_v46, %v240_v45 }
 0x154   : > { %v243_v48 = vrot.slane %v242_v47, 2 }
 0x156   : > { %v244_v49 = vadd.f32 %v243_v48, %v242_v47 }
 0x158   : > { %v245_v50 = vrot.slane %v244_v49, 1 }
 0x15a   : > { %v246_v51 = vadd.f32 %v245_v50, %v244_v49 }
 0x15c   : > { %v248_v52 = vmul.f32 0.0625, %v246_v51 }
 0x15e   : > { %v249_v53 = vsel %vm176_vm0, %v226_v35, %v248_v52 }
 0x15f   : > { %250 = vst [vmem:[%s168_s25] sm:$0x3] %v249_v53 }
 0x160 PF: > { %s13_s12 = sadd.s32 1, %s336_s12  }
 0x161   : > { %p10_p4 = scmp.ge.s32.totalorder %s13_s12, 4  }
 0x163   :  { %12 = sbr.rel (!%p10_p4) target bundleno = 1 (0x1), region = 62 }

// kernel: tum_vitg_forward.3
= control target key start
LH: loop header
LB: loop body
LE: loop exit
PB: predicated region body
PF: predicated region fallthrough
CT: control target
= control target key end

     0   :  { %s735_s12 = smov 0   ;;  %s1019_s0 = inlined_call_operand.vmem [shape: f32[32,640], index: 0, kind: input, shape index: {}]   ;;  %s1020_s1 = inlined_call_operand.vmem [shape: f32[640,128], index: 1, kind: input, shape index: {}]   ;;  %s1021_s2 = inlined_call_operand.vmem [shape: f32[1,128], index: 2, kind: input, shape index: {}]   ;;  %s1022_s3 = inlined_call_operand.vmem [shape: f32[32,128], index: 3, kind: output, shape index: {}]  }
   0x1 LB: > { %s557_s13 = sadd.s32 4294967295, %s713_s12   ;;  %p561_p0 = scmp.ge.s32.totalorder %s713_s12, 1  ;;  %s713_s12 = sphi %s735_s12, %s13_s12  }
   0x2   : > { %p139_p1 = scmp.lt.s32.totalorder %s713_s12, 3 }
   0x4   : > { %p140_p2 = pnand %p561_p0, %p139_p1 }
   0x5   : > { %s820_s14 = sshll.u32 (!%p140_p2), %s557_s13, 1 }
   0x6   : > { %143 = sbr.rel (%p140_p2) target bundleno = 276 (0x114), region = 32  ;;  %p165_p3 = scmp.lt.s32.totalorder (!%p140_p2), %s820_s14, 3 }
   0xb   : > { %v218_v0 = vld [vmem:[%s1020_s1 + $0xf8] sm:$0xff]  ;;  %v217_v2 = vld [vmem:[%s1020_s1 + $0xf0] sm:$0xff]  ;;  %v216_v6 = vld [vmem:[%s1020_s1 + $0xe8] sm:$0xff]  ;;  %s1024_s14 = smov (!%p165_p3, %s820_s14), 3 }
   0xc   : > { %v202_v1 = vld [vmem:[%s1020_s1 + $0x78] sm:$0xff]  ;;  %569 = vmatprep.subr.mxu0 %v218_v0  ;;  %v201_v4 = vld [vmem:[%s1020_s1 + $0x70] sm:$0xff]  ;;  %v200_v8 = vld [vmem:[%s1020_s1 + $0x68] sm:$0xff]  ;;  %s698_s6 = smul.u32 40, %s1024_s14 }
   0xd   : > { %v250_v3 = vld [vmem:[%s1020_s1 + $0x1f8] sm:$0xff]  ;;  %570 = vmatpush3.msra.mxu0 %v202_v1  ;;  %v249_v7 = vld [vmem:[%s1020_s1 + $0x1f0] sm:$0xff]  ;;  %v248_v10 = vld [vmem:[%s1020_s1 + $0x1e8] sm:$0xff] }
   0xe   : > { %v234_v5 = vld [vmem:[%s1020_s1 + $0x178] sm:$0xff]  ;;  %607 = vmatprep.subr.mxu1 %v250_v3  ;;  %571 = vmatprep.subr.mxu0 %v217_v2  ;;  %v233_v9 = vld [vmem:[%s1020_s1 + $0x170] sm:$0xff]  ;;  %v215_v11 = vld [vmem:[%s1020_s1 + $0xe0] sm:$0xff]  ;;  %s922_s27 = scalar_lea.vmem %s1019_s0, %s698_s6 }
   0xf   : > { %608 = vmatpush3.msra.mxu1 %v234_v5  ;;  %572 = vmatpush3.msra.mxu0 %v201_v4  ;;  %v232_v12 = vld [vmem:[%s1020_s1 + $0x168] sm:$0xff]  ;;  %v199_v13 = vld [vmem:[%s1020_s1 + $0x60] sm:$0xff]  ;;  %v214_v15 = vld [vmem:[%s1020_s1 + $0xd8] sm:$0xff] }
  0x10   : > { %609 = vmatprep.subr.mxu1 %v249_v7  ;;  %573 = vmatprep.subr.mxu0 %v216_v6  ;;  %v247_v14 = vld [vmem:[%s1020_s1 + $0x1e0] sm:$0xff]  ;;  %v198_v17 = vld [vmem:[%s1020_s1 + $0x58] sm:$0xff]  ;;  %v213_v19 = vld [vmem:[%s1020_s1 + $0xd0] sm:$0xff] }
  0x11   : > { %610 = vmatpush3.msra.mxu1 %v233_v9  ;;  %574 = vmatpush3.msra.mxu0 %v200_v8  ;;  %v231_v16 = vld [vmem:[%s1020_s1 + $0x160] sm:$0xff]  ;;  %v246_v18 = vld [vmem:[%s1020_s1 + $0x1d8] sm:$0xff]  ;;  %v197_v21 = vld [vmem:[%s1020_s1 + $0x50] sm:$0xff] }
  0x12   : > { %611 = vmatprep.subr.mxu1 %v248_v10  ;;  %575 = vmatprep.subr.mxu0 %v215_v11  ;;  %v230_v20 = vld [vmem:[%s1020_s1 + $0x158] sm:$0xff]  ;;  %v245_v22 = vld [vmem:[%s1020_s1 + $0x1d0] sm:$0xff]  ;;  %v212_v23 = vld [vmem:[%s1020_s1 + $0xc8] sm:$0xff] }
  0x13   : > { %612 = vmatpush3.msra.mxu1 %v232_v12  ;;  %576 = vmatpush3.msra.mxu0 %v199_v13  ;;  %v229_v24 = vld [vmem:[%s1020_s1 + $0x150] sm:$0xff]  ;;  %v196_v25 = vld [vmem:[%s1020_s1 + $0x48] sm:$0xff]  ;;  %v211_v27 = vld [vmem:[%s1020_s1 + $0xc0] sm:$0xff] }
  0x14   : > { %613 = vmatprep.subr.mxu1 %v247_v14  ;;  %577 = vmatprep.subr.mxu0 %v214_v15  ;;  %v244_v26 = vld [vmem:[%s1020_s1 + $0x1c8] sm:$0xff]  ;;  %v195_v29 = vld [vmem:[%s1020_s1 + $0x40] sm:$0xff]  ;;  %v210_v31 = vld [vmem:[%s1020_s1 + $0xb8] sm:$0xff] }
  0x15   : > { %614 = vmatpush3.msra.mxu1 %v231_v16  ;;  %578 = vmatpush3.msra.mxu0 %v198_v17  ;;  %v228_v28 = vld [vmem:[%s1020_s1 + $0x148] sm:$0xff]  ;;  %v243_v30 = vld [vmem:[%s1020_s1 + $0x1c0] sm:$0xff]  ;;  %v194_v33 = vld [vmem:[%s1020_s1 + $0x38] sm:$0xff] }
  0x16   : > { %615 = vmatprep.subr.mxu1 %v246_v18  ;;  %579 = vmatprep.subr.mxu0 %v213_v19  ;;  %v227_v32 = vld [vmem:[%s1020_s1 + $0x140] sm:$0xff]  ;;  %v242_v34 = vld [vmem:[%s1020_s1 + $0x1b8] sm:$0xff]  ;;  %v209_v35 = vld [vmem:[%s1020_s1 + $0xb0] sm:$0xff] }
  0x17   : > { %616 = vmatpush3.msra.mxu1 %v230_v20  ;;  %580 = vmatpush3.msra.mxu0 %v197_v21  ;;  %v226_v36 = vld [vmem:[%s1020_s1 + $0x138] sm:$0xff]  ;;  %v193_v37 = vld [vmem:[%s1020_s1 + $0x30] sm:$0xff]  ;;  %v208_v39 = vld [vmem:[%s1020_s1 + $0xa8] sm:$0xff] }
  0x18   : > { %617 = vmatprep.subr.mxu1 %v245_v22  ;;  %581 = vmatprep.subr.mxu0 %v212_v23  ;;  %v241_v38 = vld [vmem:[%s1020_s1 + $0x1b0] sm:$0xff]  ;;  %v192_v41 = vld [vmem:[%s1020_s1 + $0x28] sm:$0xff]  ;;  %v207_v43 = vld [vmem:[%s1020_s1 + $0xa0] sm:$0xff] }
  0x19   : > { %618 = vmatpush3.msra.mxu1 %v229_v24  ;;  %582 = vmatpush3.msra.mxu0 %v196_v25  ;;  %v225_v40 = vld [vmem:[%s1020_s1 + $0x130] sm:$0xff]  ;;  %v240_v42 = vld [vmem:[%s1020_s1 + $0x1a8] sm:$0xff]  ;;  %v191_v45 = vld [vmem:[%s1020_s1 + $0x20] sm:$0xff] }
  0x1a   : > { %619 = vmatprep.subr.mxu1 %v244_v26  ;;  %583 = vmatprep.subr.mxu0 %v211_v27  ;;  %v224_v44 = vld [vmem:[%s1020_s1 + $0x128] sm:$0xff]  ;;  %v239_v46 = vld [vmem:[%s1020_s1 + $0x1a0] sm:$0xff]  ;;  %v206_v47 = vld [vmem:[%s1020_s1 + $0x98] sm:$0xff] }
  0x1b   : > { %620 = vmatpush3.msra.mxu1 %v228_v28  ;;  %584 = vmatpush3.msra.mxu0 %v195_v29  ;;  %v223_v48 = vld [vmem:[%s1020_s1 + $0x120] sm:$0xff]  ;;  %v190_v49 = vld [vmem:[%s1020_s1 + $0x18] sm:$0xff]  ;;  %v205_v51 = vld [vmem:[%s1020_s1 + $0x90] sm:$0xff] }
  0x1c   : > { %621 = vmatprep.subr.mxu1 %v243_v30  ;;  %585 = vmatprep.subr.mxu0 %v210_v31  ;;  %v238_v50 = vld [vmem:[%s1020_s1 + $0x198] sm:$0xff]  ;;  %v189_v53 = vld [vmem:[%s1020_s1 + $0x10] sm:$0xff]  ;;  %v204_v55 = vld [vmem:[%s1020_s1 + $0x88] sm:$0xff] }
  0x1d   : > { %622 = vmatpush3.msra.mxu1 %v227_v32  ;;  %586 = vmatpush3.msra.mxu0 %v194_v33  ;;  %v222_v52 = vld [vmem:[%s1020_s1 + $0x118] sm:$0xff]  ;;  %v237_v54 = vld [vmem:[%s1020_s1 + $0x190] sm:$0xff]  ;;  %v188_v57 = vld [vmem:[%s1020_s1 + $0x8] sm:$0xff] }
  0x1e   : > { %623 = vmatprep.subr.mxu1 %v242_v34  ;;  %587 = vmatprep.subr.mxu0 %v209_v35  ;;  %v221_v56 = vld [vmem:[%s1020_s1 + $0x110] sm:$0xff]  ;;  %v236_v58 = vld [vmem:[%s1020_s1 + $0x188] sm:$0xff]  ;;  %v203_v59 = vld [vmem:[%s1020_s1 + $0x80] sm:$0xff] }
  0x1f   : > { %624 = vmatpush3.msra.mxu1 %v226_v36  ;;  %588 = vmatpush3.msra.mxu0 %v193_v37  ;;  %v178_v60 = vld [vmem:[%s922_s27 + $0x8] sm:$0xff]  ;;  %v187_v61 = vld [vmem:[%s1020_s1] sm:$0xff]  ;;  %v266_v1 = vld [vmem:[%s1020_s1 + $0x278] sm:$0xff] }
  0x20   : > { %625 = vmatprep.subr.mxu1 %v241_v38  ;;  %589 = vmatprep.subr.mxu0 %v208_v39  ;;  %v220_v62 = vld [vmem:[%s1020_s1 + $0x108] sm:$0xff]  ;;  %v177_v63 = vld [vmem:[%s922_s27] sm:$0xff]  ;;  %v180_v3 = vld [vmem:[%s922_s27 + $0x18] sm:$0xff] }
  0x21   : > { %626 = vmatpush3.msra.mxu1 %v225_v40  ;;  %590 = vmatpush3.msra.mxu0 %v192_v41  ;;  %v235_v0 = vld [vmem:[%s1020_s1 + $0x180] sm:$0xff]  ;;  %v179_v4 = vld [vmem:[%s922_s27 + $0x10] sm:$0xff]  ;;  %v264_v7 = vld [vmem:[%s1020_s1 + $0x268] sm:$0xff] }
  0x22   : > { %627 = vmatprep.subr.mxu1 %v240_v42  ;;  %591 = vmatprep.subr.mxu0 %v207_v43  ;;  %v219_v2 = vld [vmem:[%s1020_s1 + $0x100] sm:$0xff]  ;;  %v265_v5 = vld [vmem:[%s1020_s1 + $0x270] sm:$0xff]  ;;  %v182_v8 = vld [vmem:[%s922_s27 + $0x28] sm:$0xff] }
  0x23   : > { %628 = vmatpush3.msra.mxu1 %v224_v44  ;;  %592 = vmatpush3.msra.mxu0 %v191_v45  ;;  %v183_v6 = vld [vmem:[%s922_s27 + $0x30] sm:$0xff]  ;;  %v185_v9 = vld [vmem:[%s922_s27 + $0x40] sm:$0xff]  ;;  %v184_v11 = vld [vmem:[%s922_s27 + $0x38] sm:$0xff] }
  0x24   : > { %629 = vmatprep.subr.mxu1 %v239_v46  ;;  %593 = vmatprep.subr.mxu0 %v206_v47  ;;  %v263_v10 = vld [vmem:[%s1020_s1 + $0x260] sm:$0xff]  ;;  %v262_v13 = vld [vmem:[%s1020_s1 + $0x258] sm:$0xff]  ;;  %v261_v14 = vld [vmem:[%s1020_s1 + $0x250] sm:$0xff] }
  0x25   : > { %630 = vmatpush3.msra.mxu1 %v223_v48  ;;  %594 = vmatpush3.msra.mxu0 %v190_v49  ;;  %v181_v12 = vld [vmem:[%s922_s27 + $0x20] sm:$0xff]  ;;  %v260_v15 = vld [vmem:[%s1020_s1 + $0x248] sm:$0xff]  ;;  %v258_v17 = vld [vmem:[%s1020_s1 + $0x238] sm:$0xff] }
  0x26   : > { %631 = vmatprep.subr.mxu1 %v238_v50  ;;  %595 = vmatprep.subr.mxu0 %v205_v51  ;;  %v259_v16 = vld [vmem:[%s1020_s1 + $0x240] sm:$0xff]  ;;  %v257_v18 = vld [vmem:[%s1020_s1 + $0x230] sm:$0xff]  ;;  %v256_v19 = vld [vmem:[%s1020_s1 + $0x228] sm:$0xff] }
  0x27   : > { %632 = vmatpush3.msra.mxu1 %v222_v52  ;;  %596 = vmatpush3.msra.mxu0 %v189_v53  ;;  %v255_v20 = vld [vmem:[%s1020_s1 + $0x220] sm:$0xff]  ;;  %v254_v21 = vld [vmem:[%s1020_s1 + $0x218] sm:$0xff]  ;;  %v253_v22 = vld [vmem:[%s1020_s1 + $0x210] sm:$0xff] }
  0x28   : > { %633 = vmatprep.subr.mxu1 %v237_v54  ;;  %597 = vmatprep.subr.mxu0 %v204_v55  ;;  %v252_v23 = vld [vmem:[%s1020_s1 + $0x208] sm:$0xff]  ;;  %v251_v24 = vld [vmem:[%s1020_s1 + $0x200] sm:$0xff] }
  0x29   : > { %634 = vmatpush3.msra.mxu1 %v221_v56  ;;  %598 = vmatpush3.msra.mxu0 %v188_v57  ;;  %v186_v25 = vld [vmem:[%s922_s27 + $0x48] sm:$0xff]  ;;  %v566_v36 = vld [vmem:[%s1021_s2] ss:$0 sm:$0xff]  ;;  %s565_s27 = sshll.u32 %s1024_s14, 3 }
  0x2a   : > { %635 = vmatprep.subr.mxu1 %v236_v58  ;;  %599 = vmatprep.subr.mxu0 %v203_v59  ;;  %s175_s6 = scalar_lea.vmem %s1022_s3, %s565_s27 }
  0x2b   : > { %338 = vmatprep.mubr.f32.mxu0 %v178_v60  ;;  %600 = vmatpush3.msra.mxu0 %v187_v61 }
  0x2c   : > { %636 = vmatpush3.msra.mxu1 %v220_v62  ;;  %339 = vmatmul.mubr.f32.vlgmr.msra.gmra.mxu0 %v177_v63 }
  0x2d   : > { %637 = vmatprep.subr.mxu1 %v235_v0  ;;  %663 = vmatprep.subr.mxu0 %v266_v1 }
  0x2e   : > { %638 = vmatpush3.msra.mxu1 %v219_v2  ;;  %413 = vmatprep.mubr.f32.mxu1 %v180_v3 }
  0x2f   : > { %664 = vmatpush3.msra.mxu0 %v266_v1  ;;  %414 = vmatmul.mubr.f32.vlgmr.msra.gmra.mxu1 %v179_v4 }
  0x30   : > { %665 = vmatprep.subr.mxu0 %v265_v5  ;;  %343 = vmatprep.mubr.f32.mxu0 %v183_v6 }
  0x31   : > { %666 = vmatpush3.msra.mxu0 %v265_v5  ;;  %418 = vmatprep.mubr.f32.mxu1 %v185_v9 }
  0x32   : > { %667 = vmatprep.subr.mxu0 %v264_v7  ;;  %344 = vmatmul.mubr.f32.gmra.mxu0 %v182_v8 }
  0x33   : > { %668 = vmatpush3.msra.mxu0 %v264_v7  ;;  %419 = vmatmul.mubr.f32.gmra.mxu1 %v184_v11 }
  0x34   : > { %669 = vmatprep.subr.mxu0 %v263_v10  ;;  %695 = vmatprep.mubr.f32.mxu0 %v181_v12 }
  0x35   : > { %670 = vmatpush3.msra.mxu0 %v263_v10 }
  0x36   : > { %671 = vmatprep.subr.mxu0 %v262_v13 }
  0x37   : > { %672 = vmatpush3.msra.mxu0 %v262_v13 }
  0x38   : > { %673 = vmatprep.subr.mxu0 %v261_v14 }
  0x39   : > { %674 = vmatpush3.msra.mxu0 %v261_v14 }
  0x3a   : > { %675 = vmatprep.subr.mxu0 %v260_v15 }
  0x3b   : > { %676 = vmatpush3.msra.mxu0 %v260_v15 }
  0x3c   : > { %677 = vmatprep.subr.mxu0 %v259_v16 }
  0x3d   : > { %678 = vmatpush3.msra.mxu0 %v259_v16 }
  0x3e   : > { %679 = vmatprep.subr.mxu0 %v258_v17 }
  0x3f   : > { %680 = vmatpush3.msra.mxu0 %v258_v17 }
  0x40   : > { %681 = vmatprep.subr.mxu0 %v257_v18 }
  0x41   : > { %682 = vmatpush3.msra.mxu0 %v257_v18 }
  0x42   : > { %683 = vmatprep.subr.mxu0 %v256_v19 }
  0x43   : > { %684 = vmatpush3.msra.mxu0 %v256_v19 }
  0x44   : > { %685 = vmatprep.subr.mxu0 %v255_v20 }
  0x45   : > { %686 = vmatpush3.msra.mxu0 %v255_v20 }
  0x46   : > { %687 = vmatprep.subr.mxu0 %v254_v21 }
  0x47   : > { %688 = vmatpush3.msra.mxu0 %v254_v21 }
  0x48   : > { %689 = vmatprep.subr.mxu0 %v253_v22 }
  0x49   : > { %690 = vmatpush3.msra.mxu0 %v253_v22 }
  0x4a   : > { %691 = vmatprep.subr.mxu0 %v252_v23 }
  0x4b   : > { %692 = vmatpush3.msra.mxu0 %v252_v23 }
  0x4c   : > { %693 = vmatprep.subr.mxu0 %v251_v24 }
  0x4d   : > { %694 = vmatpush3.msra.mxu0 %v251_v24 }
  0x4e   : > { %696 = vmatmul.mubr.f32.vlgmr.msra.gmra.mxu0 %v186_v25 }
  0xec   : > { %v601_v26 = vpop.f32.mrf.mxu0 }
  0xee   : > { %v602_v27 = vpop.f32.mrf.mxu0 }
  0xef   : > { %v639_v28 = vpop.f32.mrf.mxu1  ;;  %v603_v34 = vadd.f32 %v602_v27, %v601_v26 }
  0xf1   : > { %v640_v30 = vpop.f32.mrf.mxu1  ;;  %v341_v39 = vadd.f32 %v603_v34, %v566_v36 }
  0xf2   : > { %v604_v29 = vpop.f32.mrf.mxu0  ;;  %v641_v40 = vadd.f32 %v640_v30, %v639_v28 }
  0xf3   : > { %v642_v32 = vpop.f32.mrf.mxu1 }
  0xf4   : > { %v605_v31 = vpop.f32.mrf.mxu0  ;;  %v416_v43 = vadd.f32 %v641_v40, %v341_v39 }
  0xf5   : > { %v606_v33 = vadd.f32 %v605_v31, %v604_v29  ;;  %v643_v35 = vpop.f32.mrf.mxu1 }
  0xf6   : > { %v644_v38 = vadd.f32 %v643_v35, %v642_v32 }
  0xf7   : > { %v346_v37 = vadd.f32 %v606_v33, %v566_v36 }
  0xf9   : > { %v421_v41 = vadd.f32 %v644_v38, %v346_v37 }
 0x10e   : > { %v697_v42 = vpop.f32.mrf.mxu0 }
 0x10f   : > { %v496_v46 = vadd.f32 %v697_v42, %v421_v41 }
 0x110   : > { %v490_v44 = vpop.f32.mrf.mxu0 }
 0x111   : > { %v491_v45 = vadd.f32 %v490_v44, %v416_v43  ;;  %500 = vst [vmem:[%s175_s6 + $0x8] sm:$0xff] %v496_v46 }
 0x113   : > { %499 = vst [vmem:[%s175_s6] sm:$0xff] %v491_v45 }
 0x114 PF: > { %s13_s12 = sadd.s32 1, %s713_s12  }
 0x115   : > { %p10_p4 = scmp.ge.s32.totalorder %s13_s12, 4  }
 0x117   :  { %12 = sbr.rel (!%p10_p4) target bundleno = 1 (0x1), region = 62 }

// kernel: tum_vitg_forward.4
= control target key start
LH: loop header
LB: loop body
LE: loop exit
PB: predicated region body
PF: predicated region fallthrough
CT: control target
= control target key end

     0   :  { %s4962_s25 = smov 0   ;;  %s4964_s26 = smov 0   ;;  %s5987_s0 = inlined_call_operand.vmem [shape: f32[2,17,128], index: 0, kind: input, shape index: {}]   ;;  %s5988_s1 = inlined_call_operand.vmem [shape: f32[2,1,128], index: 1, kind: input, shape index: {}]   ;;  %s5989_s2 = inlined_call_operand.vmem [shape: f32[2,1,128], index: 2, kind: input, shape index: {}]   ;;  %s5990_s3 = inlined_call_operand.vmem [shape: f32[2,128,128], index: 3, kind: input, shape index: {}]   ;;  %s5991_s4 = inlined_call_operand.vmem [shape: f32[2,1,128], index: 4, kind: input, shape index: {}]   ;;  %s5992_s5 = inlined_call_operand.vmem [shape: f32[2,128,128], index: 5, kind: input, shape index: {}]   ;;  %s5993_s6 = inlined_call_operand.vmem [shape: f32[2,1,128], index: 6, kind: input, shape index: {}]   ;;  %s5994_s7 = inlined_call_operand.vmem [shape: f32[2,128,128], index: 7, kind: input, shape index: {}]   ;;  %s5995_s8 = inlined_call_operand.vmem [shape: f32[2,1,128], index: 8, kind: input, shape index: {}]   ;;  %s5996_s9 = inlined_call_operand.vmem [shape: f32[2,128,128], index: 9, kind: input, shape index: {}]   ;;  %s5997_s10 = inlined_call_operand.vmem [shape: f32[2,1,128], index: 10, kind: input, shape index: {}]   ;;  %s5998_s11 = inlined_call_operand.vmem [shape: f32[2,1,128], index: 11, kind: input, shape index: {}]   ;;  %s5999_s12 = inlined_call_operand.vmem [shape: f32[2,1,128], index: 12, kind: input, shape index: {}]   ;;  %s6000_s13 = inlined_call_operand.vmem [shape: f32[2,1,128], index: 13, kind: input, shape index: {}]   ;;  %s6001_s14 = inlined_call_operand.vmem [shape: f32[2,128,384], index: 14, kind: input, shape index: {}]   ;;  %s6002_s15 = inlined_call_operand.vmem [shape: f32[2,1,384], index: 15, kind: input, shape index: {}]   ;;  %s6003_s16 = inlined_call_operand.vmem [shape: f32[2,128,384], index: 16, kind: input, shape index: {}]   ;;  %s6004_s17 = inlined_call_operand.vmem [shape: f32[2,1,384], index: 17, kind: input, shape index: {}]   ;;  %s6005_s18 = inlined_call_operand.vmem [shape: f32[2,384,128], index: 18, kind: input, shape index: {}]   ;;  %s6006_s19 = inlined_call_operand.vmem [shape: f32[2,1,128], index: 19, kind: input, shape index: {}]   ;;  %s6007_s20 = inlined_call_operand.vmem [shape: f32[2,1,128], index: 20, kind: input, shape index: {}]   ;;  %s6008_s21 = inlined_call_operand.vmem [shape: f32[2,17,128], index: 21, kind: output, shape index: {}]  }
   0x1   :  { %6015 = sst [smem:[#allocation10_spill]] %s5987_s0  ;;  %s4966_s27 = smov 0  }
   0x2   :  { %6016 = sst [smem:[#allocation11_spill]] %s5988_s1 }
   0x3   :  { %6017 = sst [smem:[#allocation12_spill]] %s5989_s2  ;;  %s4960_s2 = smov 0  }
   0x4   :  { %6018 = sst [smem:[#allocation13_spill]] %s5990_s3  ;;  %s4968_s3 = smov 0  }
   0x5   :  { %6019 = sst [smem:[#allocation14_spill]] %s5991_s4 }
   0x6   :  { %6020 = sst [smem:[#allocation15_spill]] %s5992_s5 }
   0x7   :  { %6021 = sst [smem:[#allocation16_spill]] %s5993_s6 }
   0x8   :  { %6022 = sst [smem:[#allocation17_spill]] %s5994_s7 }
   0x9   :  { %6023 = sst [smem:[#allocation18_spill]] %s5996_s9 }
   0xa   :  { %6024 = sst [smem:[#allocation19_spill]] %s5999_s12 }
   0xb   :  { %6025 = sst [smem:[#allocation20_spill]] %s6000_s13 }
   0xc   :  { %6026 = sst [smem:[#allocation21_spill]] %s6001_s14 }
   0xd   :  { %6027 = sst [smem:[#allocation22_spill]] %s6002_s15 }
   0xe   :  { %6028 = sst [smem:[#allocation23_spill]] %s6003_s16 }
   0xf   :  { %6029 = sst [smem:[#allocation24_spill]] %s6004_s17 }
  0x10   :  { %6030 = sst [smem:[#allocation25_spill]] %s6005_s18 }
  0x11   :  { %6031 = sst [smem:[#allocation26_spill]] %s6006_s19 }
  0x12   :  { %6032 = sst [smem:[#allocation27_spill]] %s6007_s20 }
  0x13   :  { %6033 = sst [smem:[#allocation28_spill]] %s6008_s21 }
  0x14 LB: > { %6034 = sst [smem:[#allocation2_spill]] %s4827_s2  ;;  %s40_s28 = sadd.s32 1, %s4835_s26  ;;  %s4843_s3 = sphi %s4968_s3, %s31_s3   ;;  %s4839_s27 = sphi %s4966_s27, %s6086_s27   ;;  %s4835_s26 = sphi %s4964_s26, %s6085_s26   ;;  %s4831_s25 = sphi %s4962_s25, %s6084_s25   ;;  %s4827_s2 = sphi %s4960_s2, %s6083_s2  }
  0x15   : > { %6035 = sst [smem:[#allocation3_spill]] %s4835_s26  ;;  %s43_s29 = sadd.s32 1, %s4839_s27 }
  0x16   : > { %6036 = sst [smem:[#allocation4_spill]] %s4839_s27  ;;  %p41_p0 = scmp.ge.s32.totalorder %s40_s28, 2 }
  0x17   : > { %6037 = sst [smem:[#allocation5_spill]] %s4843_s3  ;;  %p4069_p1 = scmp.ge.s32.totalorder %s4843_s3, 1 }
  0x18   : > { %p775_p2 = scmp.lt.s32.totalorder %s4843_s3, 5  ;;  %s6088_s28 = smov (%p41_p0, %s40_s28), 0 }
  0x19   : > { %6038 = sst [smem:[#allocation6_spill]] %s6088_s28  ;;  %s6090_s29 = smov (!%p41_p0, %s43_s29), %s4839_s27 }
  0x1a   : > { %p776_p3 = pnand %p4069_p1, %p775_p2  ;;  %p45_p4 = scmp.ge.s32.totalorder %s6090_s29, 2 }
  0x1c   : > { %s6092_s29 = smov (%p45_p4, %s6090_s29), 0  ;;  %779 = sbr.rel (%p776_p3) target bundleno = 2596 (0xa24), region = 104 }
  0x1d   : > { %6039 = sst [smem:[#allocation7_spill]] %s6092_s29 }
  0x21   : > { %p911_p5 = scmp.lt.s32.totalorder %s4831_s25, 1  ;;  %p916_p6 = scmp.lt.s32.totalorder %s4827_s2, 1 }
  0x22   : > { %s6042_s3 = sld [smem:[#allocation10_spill]] }
  0x23   : > { %s6094_s25 = smov (!%p911_p5, %s4831_s25), 1  ;;  %s6043_s17 = sld [smem:[#allocation13_spill]] }
  0x24   : > { %s4994_s0 = scalar_select %p916_p6, %s4827_s2, 1 }
  0x25   : > { %s4682_s4 = smul.u32 24, %s6094_s25  ;;  %s6045_s1 = sld [smem:[#allocation15_spill]] }
  0x26   : > { %s4133_s21 = sshll.u32 %s4994_s0, 7  ;;  %s6047_s7 = sld [smem:[#allocation17_spill]] }
  0x27   : > { %s6048_s9 = sld [smem:[#allocation18_spill]]  ;;  %s4683_s15 = smul.u32 384, %s4994_s0 }
  0x28   : > { %s915_s2 = scalar_lea.vmem %s6042_s3, %s4682_s4  ;;  %s4684_s30 = smul.u32 3, %s4994_s0 }
  0x29   : > { %s5011_s25 = scalar_lea.vmem %s6043_s17, %s4133_s21  ;;  %s6052_s14 = sld [smem:[#allocation21_spill]] }
  0x2a   : > { %s6054_s27 = sld [smem:[#allocation23_spill]] }
  0x2b   : > { %s5020_s24 = scalar_lea.vmem %s6045_s1, %s4133_s21  ;;  %s6056_s6 = sld [smem:[#allocation22_spill]] }
  0x2c   : > { %s5029_s18 = scalar_lea.vmem %s6047_s7, %s4133_s21  ;;  %s6057_s12 = sld [smem:[#allocation24_spill]] }
  0x2d   : > { %s5038_s16 = scalar_lea.vmem %s6048_s9, %s4133_s21  ;;  %s6058_s23 = sld [smem:[#allocation25_spill]] }
  0x2e   : > { %s6059_s22 = sld [smem:[#allocation27_spill]] }
  0x2f   : > { %s5065_s28 = scalar_lea.vmem %s6052_s14, %s4683_s15  ;;  %s6061_s3 = sld [smem:[#allocation2_spill]] }
  0x30   : > { %6053 = sst [smem:[#allocation8_spill]] %s5065_s28  ;;  %s5070_s26 = scalar_lea.vmem %s6054_s27, %s4683_s15 }
  0x31   : > { %6055 = sst [smem:[#allocation9_spill]] %s5070_s26  ;;  %s5075_s17 = scalar_lea.vmem %s6056_s6, %s4684_s30 }
  0x32   : > { %s5080_s21 = scalar_lea.vmem %s6057_s12, %s4684_s30  ;;  %s6060_s28 = sld [smem:[#allocation28_spill]] }
  0x33   : > { %s5085_s1 = scalar_lea.vmem %s6058_s23, %s4683_s15 }
  0x34   : > { %s991_s27 = scalar_lea.vmem %s6059_s22, %s4994_s0 }
  0x35   : > { %p4083_p7 = scmp.ne.s32.totalorder %s6061_s3, 0 }
  0x37   : > { %1000 = sbr.rel (%p4083_p7) target bundleno = 63 (0x3f), region = 108 }
  0x38   : > { %s5094_s7 = scalar_lea.vmem %s6060_s28, %s4682_s4 }
  0x3c   : > { %v1001_v0 = vld [vmem:[%s915_s2] sm:$0xff]  ;;  %v1002_v1 = vld [vmem:[%s915_s2 + $0x8] sm:$0xff]  ;;  %v1003_v2 = vld [vmem:[%s915_s2 + $0x10] sm:$0x1] }
  0x3d   : > { %1004 = vst [vmem:[%s5094_s7] sm:$0xff] %v1001_v0  ;;  %1005 = vst [vmem:[%s5094_s7 + $0x8] sm:$0xff] %v1002_v1 }
  0x3e   : > { %1006 = vst [vmem:[%s5094_s7 + $0x10] sm:$0x1] %v1003_v2 }
  0x3f PF: > { %vm1016_vm0 = vcmask 1040384   ;;  %v1082_v7 = vld [vmem:[%s5011_s25 + $0x78] sm:$0xff]  ;;  %v4845_v9 = vmov 0.0   ;;  %v1081_v10 = vld [vmem:[%s5011_s25 + $0x70] sm:$0xff]  ;;  %v1080_v12 = vld [vmem:[%s5011_s25 + $0x68] sm:$0xff]  ;;  %vm4846_vm1 = vmmov 0   ;;  %s6070_s29 = scalar_lea.vmem %s5995_s8, %s4994_s0  ;;  %s6071_s9 = scalar_lea.vmem %s5997_s10, %s4994_s0 }
  0x40   : > { %v1185_v8 = vld [vmem:[%s5020_s24 + $0x78] sm:$0xff]  ;;  %4335 = vmatprep.subr.mxu0 %v4845_v9  ;;  %4376 = vmatprep.subr.mxu1 %v4845_v9  ;;  %v1184_v11 = vld [vmem:[%s5020_s24 + $0x70] sm:$0xff]  ;;  %v1183_v13 = vld [vmem:[%s5020_s24 + $0x68] sm:$0xff]  ;;  %s6062_s13 = sld [smem:[#allocation11_spill]]  ;;  %s4847_s20 = smov 64   ;;  %vm2159_vm2 = vcmask 523264  }
  0x41   : > { %4336 = vmatpush3.msra.mxu0 %v1082_v7  ;;  %4377 = vmatpush3.msra.mxu1 %v1185_v8  ;;  %v1079_v14 = vld [vmem:[%s5011_s25 + $0x60] sm:$0xff]  ;;  %v1078_v29 = vld [vmem:[%s5011_s25 + $0x58] sm:$0xff]  ;;  %v1077_v31 = vld [vmem:[%s5011_s25 + $0x50] sm:$0xff]  ;;  %s6064_s4 = sld [smem:[#allocation12_spill]]  ;;  %vm2356_vm3 = vcmask 138240   ;;  %vm2363_vm4 = vcmask 131072  }
  0x42   : > { %4337 = vmatprep.subr.mxu0 %v4845_v9  ;;  %4378 = vmatprep.subr.mxu1 %v4845_v9  ;;  %v1182_v15 = vld [vmem:[%s5020_s24 + $0x60] sm:$0xff]  ;;  %v1181_v30 = vld [vmem:[%s5020_s24 + $0x58] sm:$0xff]  ;;  %v1180_v32 = vld [vmem:[%s5020_s24 + $0x50] sm:$0xff]  ;;  %s6066_s15 = sld [smem:[#allocation16_spill]] }
  0x43   : > { %4338 = vmatpush3.msra.mxu0 %v1081_v10  ;;  %4379 = vmatpush3.msra.mxu1 %v1184_v11  ;;  %v1076_v33 = vld [vmem:[%s5011_s25 + $0x48] sm:$0xff]  ;;  %v1075_v35 = vld [vmem:[%s5011_s25 + $0x40] sm:$0xff]  ;;  %v1074_v37 = vld [vmem:[%s5011_s25 + $0x38] sm:$0xff]  ;;  %s6068_s6 = sld [smem:[#allocation14_spill]] }
  0x44   : > { %v1007_v3 = vld [vmem:[%s5094_s7] sm:$0xff]  ;;  %v1008_v6 = vld [vmem:[%s5094_s7 + $0x8] sm:$0xff]  ;;  %4339 = vmatprep.subr.mxu0 %v4845_v9  ;;  %4380 = vmatprep.subr.mxu1 %v4845_v9  ;;  %v1177_v38 = vld [vmem:[%s5020_s24 + $0x38] sm:$0xff]  ;;  %s6073_s19 = sld [smem:[#allocation8_spill]] }
  0x45   : > { %v1009_v4 = vld [vmem:[%s5094_s7 + $0x10] sm:$0x1]  ;;  %1012 = vadd.xlane.f32.xlu0 %v1007_v3  ;;  %4340 = vmatpush3.msra.mxu0 %v1080_v12  ;;  %v1179_v34 = vld [vmem:[%s5020_s24 + $0x48] sm:$0xff]  ;;  %v1178_v36 = vld [vmem:[%s5020_s24 + $0x40] sm:$0xff]  ;;  %s6074_s2 = sld [smem:[#allocation9_spill]] }
  0x46   : > { %v1017_v5 = vsel %vm1016_vm0, %v1009_v4, 0.0  ;;  %4381 = vmatpush3.msra.mxu1 %v1183_v13  ;;  %4341 = vmatprep.subr.mxu0 %v4845_v9  ;;  %v1073_v39 = vld [vmem:[%s5011_s25 + $0x30] sm:$0xff]  ;;  %v1072_v41 = vld [vmem:[%s5011_s25 + $0x28] sm:$0xff]  ;;  %v1071_v43 = vld [vmem:[%s5011_s25 + $0x20] sm:$0xff]  ;;  %s6063_s14 = scalar_lea.vmem %s6062_s13, %s4994_s0 }
  0x47   : > { %1018 = vadd.xlane.f32.xlu1 %v1017_v5  ;;  %4382 = vmatprep.subr.mxu1 %v4845_v9  ;;  %v1176_v40 = vld [vmem:[%s5020_s24 + $0x30] sm:$0xff]  ;;  %v1175_v42 = vld [vmem:[%s5020_s24 + $0x28] sm:$0xff]  ;;  %v1174_v44 = vld [vmem:[%s5020_s24 + $0x20] sm:$0xff] }
  0x48   : > { %4342 = vmatpush3.msra.mxu0 %v1079_v14  ;;  %4383 = vmatpush3.msra.mxu1 %v1182_v15  ;;  %v1070_v45 = vld [vmem:[%s5011_s25 + $0x18] sm:$0xff]  ;;  %v1069_v47 = vld [vmem:[%s5011_s25 + $0x10] sm:$0xff]  ;;  %v1068_v49 = vld [vmem:[%s5011_s25 + $0x8] sm:$0xff]  ;;  %s6067_s28 = scalar_lea.vmem %s6066_s15, %s4994_s0 }
  0x49   : > { %1014 = vadd.xlane.f32.xlu0 %v1008_v6  ;;  %4343 = vmatprep.subr.mxu0 %v4845_v9  ;;  %v1173_v46 = vld [vmem:[%s5020_s24 + $0x18] sm:$0xff]  ;;  %v1172_v48 = vld [vmem:[%s5020_s24 + $0x10] sm:$0xff]  ;;  %v1171_v50 = vld [vmem:[%s5020_s24 + $0x8] sm:$0xff]  ;;  %s6069_s5 = scalar_lea.vmem %s6068_s6, %s4994_s0 }
  0x4a   : > { %4384 = vmatprep.subr.mxu1 %v4845_v9  ;;  %4344 = vmatpush3.msra.mxu0 %v1078_v29  ;;  %v1067_v51 = vld [vmem:[%s5011_s25] sm:$0xff]  ;;  %s6065_s25 = scalar_lea.vmem %s6064_s4, %s4994_s0  ;;  %v1287_v10 = vld [vmem:[%s5029_s18 + $0x70] sm:$0xff]  ;;  %v1286_v13 = vld [vmem:[%s5029_s18 + $0x68] sm:$0xff] }
  0x4b   : > { %4345 = vmatprep.subr.mxu0 %v4845_v9  ;;  %4385 = vmatpush3.msra.mxu1 %v1181_v30  ;;  %v1170_v52 = vld [vmem:[%s5020_s24] sm:$0xff]  ;;  %s6075_s24 = sld [smem:[#allocation19_spill]] }
  0x4c   : > { %4346 = vmatpush3.msra.mxu0 %v1077_v31  ;;  %4386 = vmatprep.subr.mxu1 %v4845_v9  ;;  %v4084_v63 = vld [vmem:[%s6063_s14] ss:$0 sm:$0xff]  ;;  %s6072_s14 = scalar_lea.vmem %s5998_s11, %s4994_s0 }
  0x4d   : > { %4347 = vmatprep.subr.mxu0 %v4845_v9  ;;  %4387 = vmatpush3.msra.mxu1 %v1180_v32  ;;  %v4085_v1 = vld [vmem:[%s6065_s25] ss:$0 sm:$0xff] }
  0x4e   : > { %4388 = vmatprep.subr.mxu1 %v4845_v9  ;;  %4348 = vmatpush3.msra.mxu0 %v1076_v33  ;;  %v1285_v15 = vld [vmem:[%s5029_s18 + $0x60] sm:$0xff] }
  0x4f   : > { %4349 = vmatprep.subr.mxu0 %v4845_v9  ;;  %4389 = vmatpush3.msra.mxu1 %v1179_v34  ;;  %v4087_v29 = vld [vmem:[%s6067_s28] ss:$0 sm:$0xff] }
  0x50   : > { %4350 = vmatpush3.msra.mxu0 %v1075_v35  ;;  %4390 = vmatprep.subr.mxu1 %v4845_v9  ;;  %v4086_v35 = vld [vmem:[%s6069_s5] ss:$0 sm:$0xff] }
  0x51   : > { %4351 = vmatprep.subr.mxu0 %v4845_v9  ;;  %4391 = vmatpush3.msra.mxu1 %v1178_v36 }
  0x52   : > { %4352 = vmatpush3.msra.mxu0 %v1074_v37  ;;  %4392 = vmatprep.subr.mxu1 %v4845_v9 }
  0x53   : > { %4353 = vmatprep.subr.mxu0 %v4845_v9  ;;  %4393 = vmatpush3.msra.mxu1 %v1177_v38 }
  0x54   : > { %4354 = vmatpush3.msra.mxu0 %v1073_v39  ;;  %4394 = vmatprep.subr.mxu1 %v4845_v9 }
  0x55   : > { %4355 = vmatprep.subr.mxu0 %v4845_v9  ;;  %4395 = vmatpush3.msra.mxu1 %v1176_v40 }
  0x56   : > { %4356 = vmatpush3.msra.mxu0 %v1072_v41  ;;  %4396 = vmatprep.subr.mxu1 %v4845_v9 }
  0x57   : > { %4357 = vmatprep.subr.mxu0 %v4845_v9  ;;  %4397 = vmatpush3.msra.mxu1 %v1175_v42 }
  0x58   : > { %4358 = vmatpush3.msra.mxu0 %v1071_v43  ;;  %4398 = vmatprep.subr.mxu1 %v4845_v9 }
  0x59   : > { %4359 = vmatprep.subr.mxu0 %v4845_v9  ;;  %4399 = vmatpush3.msra.mxu1 %v1174_v44 }
  0x5a   : > { %4360 = vmatpush3.msra.mxu0 %v1070_v45  ;;  %4400 = vmatprep.subr.mxu1 %v4845_v9 }
  0x5b   : > { %4361 = vmatprep.subr.mxu0 %v4845_v9  ;;  %4401 = vmatpush3.msra.mxu1 %v1173_v46 }
  0x5c   : > { %4362 = vmatpush3.msra.mxu0 %v1069_v47  ;;  %4402 = vmatprep.subr.mxu1 %v4845_v9 }
  0x5d   : > { %4363 = vmatprep.subr.mxu0 %v4845_v9  ;;  %4403 = vmatpush3.msra.mxu1 %v1172_v48 }
  0x5e   : > { %4364 = vmatpush3.msra.mxu0 %v1068_v49  ;;  %4404 = vmatprep.subr.mxu1 %v4845_v9 }
  0x5f   : > { %4365 = vmatprep.subr.mxu0 %v4845_v9  ;;  %4405 = vmatpush3.msra.mxu1 %v1171_v50 }
  0x60   : > { %4366 = vmatpush3.msra.mxu0 %v1067_v51  ;;  %4406 = vmatprep.subr.mxu1 %v4845_v9 }
  0x61   : > { %4367 = vmatprep.mubr.msk.f32.mxu0 %vm4846_vm1, %v4845_v9  ;;  %4407 = vmatpush3.msra.mxu1 %v1170_v52 }
  0x62   : > { %4408 = vmatprep.mubr.msk.f32.mxu1 %vm4846_vm1, %v4845_v9  ;;  %4417 = vmatprep.subr.mxu0 %v4845_v9 }
  0x63   : > { %4473 = vmatprep.subr.mxu1 %v4845_v9 }
  0xce   : > { %v1013_v16 = vpop.xlane.xlu0 %1012 }
  0xcf   : > { %v1021_v17 = vmul.f32 0.0078125, %v1013_v16 }
  0xd0   : > { %v1019_v18 = vpop.xlane.xlu1 %1018 }
  0xd1   : > { %v1023_v19 = vmul.f32 0.0078125, %v1019_v18  ;;  %v5122_v20 = vsub.f32 %v1007_v3, %v1021_v17  ;;  %v1284_v17 = vld [vmem:[%s5029_s18 + $0x58] sm:$0xff]  ;;  %v1283_v18 = vld [vmem:[%s5029_s18 + $0x50] sm:$0xff] }
  0xd2   : > { %v1015_v22 = vpop.xlane.xlu0 %1014 }
  0xd3   : > { %v5124_v21 = vsub.f32 %v1009_v4, %v1023_v19  ;;  %v1022_v23 = vmul.f32 0.0078125, %v1015_v22  ;;  %v1027_v24 = vmul.f32 %v5122_v20, %v5122_v20  ;;  %v1282_v19 = vld [vmem:[%s5029_s18 + $0x48] sm:$0xff]  ;;  %v1279_v22 = vld [vmem:[%s5029_s18 + $0x30] sm:$0xff] }
  0xd5   : > { %v1029_v25 = vmul.f32 %v5124_v21, %v5124_v21  ;;  %v5130_v26 = vsub.f32 %v1008_v6, %v1022_v23  ;;  %1030 = vadd.xlane.f32.xlu1 %v1027_v24  ;;  %v1288_v6 = vld [vmem:[%s5029_s18 + $0x78] sm:$0xff]  ;;  %v1278_v23 = vld [vmem:[%s5029_s18 + $0x28] sm:$0xff]  ;;  %v1277_v24 = vld [vmem:[%s5029_s18 + $0x20] sm:$0xff] }
  0xd7   : > { %v1034_v27 = vsel %vm1016_vm0, %v1029_v25, 0.0  ;;  %v1028_v28 = vmul.f32 %v5130_v26, %v5130_v26  ;;  %v1276_v25 = vld [vmem:[%s5029_s18 + $0x18] sm:$0xff] }
  0xd9   : > { %1035 = vadd.xlane.f32.xlu1 %v1034_v27  ;;  %1032 = vadd.xlane.f32.xlu0 %v1028_v28  ;;  %v1274_v27 = vld [vmem:[%s5029_s18 + $0x8] sm:$0xff]  ;;  %v1273_v28 = vld [vmem:[%s5029_s18] sm:$0xff] }
 0x15e   : > { %v1031_v53 = vpop.xlane.xlu1 %1030 }
 0x15f   : > { %v1037_v54 = vmul.f32 0.0078125, %v1031_v53 }
 0x161   : > { %v1040_v55 = vadd.f32 1e-06, %v1037_v54 }
 0x162   : > { %v1036_v56 = vpop.xlane.xlu1 %1035  ;;  %v1033_v57 = vpop.xlane.xlu0 %1032 }
 0x163   : > { %4730 = vrsqrt.f32 %v1040_v55  ;;  %v1039_v58 = vmul.f32 0.0078125, %v1036_v56  ;;  %v1038_v59 = vmul.f32 0.0078125, %v1033_v57 }
 0x165   : > { %v1042_v60 = vadd.f32 1e-06, %v1039_v58  ;;  %v1041_v61 = vadd.f32 1e-06, %v1038_v59  ;;  %v4848_v58 = vmov 1983009808  }
 0x166   : > { %v1392_v59 = vunpack.c.l.s4 %v4848_v58 }
 0x167   : > { %4732 = vrsqrt.f32 %v1042_v60  ;;  %v1394_v60 = vlaneseq }
 0x168   : > { %4734 = vrsqrt.f32 %v1041_v61  ;;  %v1393_v61 = vunpack.c.0.s8 %v1392_v59 }
 0x170   : > { %v4731_v62 = vpop.eup %4730 }
 0x171   : > { %v1046_v0 = vmul.f32 %v4731_v62, %v5122_v20  ;;  %v1281_v20 = vld [vmem:[%s5029_s18 + $0x40] sm:$0xff]  ;;  %v5286_v62 = vshrl.u32 %v1394_v60, 7 }
 0x173   : > { %v1055_v2 = vmul.f32 %v4084_v63, %v1046_v0 }
 0x174   : > { %v4733_v3 = vpop.eup %4732 }
 0x175   : > { %v4735_v4 = vpop.eup %4734  ;;  %v5198_v5 = vadd.f32 %v4085_v1, %v1055_v2  ;;  %v1048_v8 = vmul.f32 %v4733_v3, %v5124_v21  ;;  %v1280_v21 = vld [vmem:[%s5029_s18 + $0x38] sm:$0xff] }
 0x176   : > { %v1047_v7 = vmul.f32 %v4735_v4, %v5130_v26  ;;  %v1275_v26 = vld [vmem:[%s5029_s18 + $0x10] sm:$0xff]  ;;  %s6076_s18 = scalar_lea.vmem %s6075_s24, %s4994_s0 }
 0x177   : > { %4368 = vmatmul.mubr.f32.vlgmr.msra.gmra.mxu0 %v5198_v5  ;;  %4409 = vmatmul.mubr.f32.vlgmr.msra.gmra.mxu1 %v5198_v5  ;;  %v1057_v14 = vmul.f32 %v4084_v63, %v1048_v8 }
 0x178   : > { %4418 = vmatpush3.msra.mxu0 %v1288_v6  ;;  %4370 = vmatprep.mubr.msk.f32.mxu0 %vm4846_vm1, %v4845_v9  ;;  %v1056_v11 = vmul.f32 %v4084_v63, %v1047_v7  ;;  %v4849_v63 = vmov 1934713408  }
 0x179   : > { %4419 = vmatprep.subr.mxu0 %v4845_v9  ;;  %4411 = vmatprep.mubr.msk.f32.mxu1 %vm4846_vm1, %v4845_v9  ;;  %v1066_v16 = vadd.f32 %v4085_v1, %v1057_v14  ;;  %v1423_v0 = vunpack.c.l.s4 %v4849_v63 }
 0x17a   : > { %4420 = vmatpush3.msra.mxu0 %v1287_v10  ;;  %v1065_v12 = vadd.f32 %v4085_v1, %v1056_v11  ;;  %v5289_v1 = vsub.s32 %v1393_v61, %v5286_v62 }
 0x17b   : > { %4421 = vmatprep.subr.mxu0 %v4845_v9  ;;  %v1424_v2 = vunpack.c.0.s8 %v1423_v0 }
 0x17c   : > { %4371 = vmatmul.mubr.f32.gmra.mxu0 %v1065_v12  ;;  %4412 = vmatmul.mubr.f32.gmra.mxu1 %v1065_v12 }
 0x17d   : > { %4422 = vmatpush3.msra.mxu0 %v1286_v13  ;;  %4373 = vmatprep.mubr.msk.f32.mxu0 %vm4846_vm1, %v4845_v9  ;;  %v5294_v6 = vsub.s32 %v1424_v2, %v5286_v62 }
 0x17e   : > { %4423 = vmatprep.subr.mxu0 %v4845_v9  ;;  %4414 = vmatprep.mubr.msk.f32.mxu1 %vm4846_vm1, %v4845_v9 }
 0x17f   : > { %4424 = vmatpush3.msra.mxu0 %v1285_v15 }
 0x180   : > { %4425 = vmatprep.subr.mxu0 %v4845_v9  ;;  %4374 = vmatmul.mubr.f32.gmra.mxu0 %v1066_v16 }
 0x181   : > { %4415 = vmatmul.mubr.f32.gmra.mxu1 %v1066_v16  ;;  %4426 = vmatpush3.msra.mxu0 %v1284_v17 }
 0x182   : > { %4427 = vmatprep.subr.mxu0 %v4845_v9  ;;  %4449 = vmatprep.mubr.msk.f32.mxu0 %vm4846_vm1, %v4845_v9 }
 0x183   : > { %4428 = vmatpush3.msra.mxu0 %v1283_v18  ;;  %4479 = vmatprep.mubr.msk.f32.mxu1 %vm4846_vm1, %v4845_v9 }
 0x184   : > { %4429 = vmatprep.subr.mxu0 %v4845_v9 }
 0x185   : > { %4430 = vmatpush3.msra.mxu0 %v1282_v19 }
 0x186   : > { %4431 = vmatprep.subr.mxu0 %v4845_v9 }
 0x187   : > { %4432 = vmatpush3.msra.mxu0 %v1281_v20 }
 0x188   : > { %4433 = vmatprep.subr.mxu0 %v4845_v9 }
 0x189   : > { %4434 = vmatpush3.msra.mxu0 %v1280_v21 }
 0x18a   : > { %4435 = vmatprep.subr.mxu0 %v4845_v9 }
 0x18b   : > { %4436 = vmatpush3.msra.mxu0 %v1279_v22 }
 0x18c   : > { %4437 = vmatprep.subr.mxu0 %v4845_v9 }
 0x18d   : > { %4438 = vmatpush3.msra.mxu0 %v1278_v23 }
 0x18e   : > { %4439 = vmatprep.subr.mxu0 %v4845_v9 }
 0x18f   : > { %4440 = vmatpush3.msra.mxu0 %v1277_v24 }
 0x190   : > { %4441 = vmatprep.subr.mxu0 %v4845_v9 }
 0x191   : > { %4442 = vmatpush3.msra.mxu0 %v1276_v25 }
 0x192   : > { %4443 = vmatprep.subr.mxu0 %v4845_v9 }
 0x193   : > { %4444 = vmatpush3.msra.mxu0 %v1275_v26 }
 0x194   : > { %4445 = vmatprep.subr.mxu0 %v4845_v9 }
 0x195   : > { %4446 = vmatpush3.msra.mxu0 %v1274_v27 }
 0x196   : > { %4447 = vmatprep.subr.mxu0 %v4845_v9 }
 0x197   : > { %4448 = vmatpush3.msra.mxu0 %v1273_v28 }
 0x198   : > { %4450 = vmatmul.mubr.f32.vlgmr.msra.gmra.mxu0 %v5198_v5  ;;  %4458 = vmatprep.subr.mxu0 %v4845_v9 }
 0x199   : > { %4452 = vmatprep.mubr.msk.f32.mxu0 %vm4846_vm1, %v4845_v9 }
 0x19c   : > { %4453 = vmatmul.mubr.f32.gmra.mxu0 %v1065_v12 }
 0x19d   : > { %4455 = vmatprep.mubr.msk.f32.mxu0 %vm4846_vm1, %v4845_v9 }
 0x1a0   : > { %4456 = vmatmul.mubr.f32.gmra.mxu0 %v1066_v16 }
 0x1a1   : > { %4464 = vmatprep.mubr.msk.f32.mxu0 %vm4846_vm1, %v4845_v9 }
 0x237   : > { %v1156_v30 = vpop.f32.mrf.mxu0  ;;  %v1259_v31 = vpop.f32.mrf.mxu1 }
 0x238   : > { %v1260_v32 = vadd.f32 %v4087_v29, %v1259_v31  ;;  %v1157_v45 = vadd.f32 %v4086_v35, %v1156_v30 }
 0x239   : > { %v4369_v33 = vpop.f32.mrf.mxu0  ;;  %v4410_v34 = vpop.f32.mrf.mxu1 }
 0x23a   : > { %1642 = vrot.lane.b32.xlu1 %v1260_v32, %s4847_s20  ;;  %v1376_v49 = vmul.f32 0.125, %v1157_v45  ;;  %v1650_v3 = vcombine.high %v1260_v32, %v4845_v9  ;;  %v1657_v5 = vrot.slane %v1260_v32, %v5289_v1 }
 0x23c   : > { %v1161_v36 = vpop.f32.mrf.mxu0  ;;  %v1264_v37 = vpop.f32.mrf.mxu1  ;;  %v1390_v10 = vcombine.high %v1376_v49, %v4845_v9  ;;  %v1664_v11 = vrot.slane %v1650_v3, %v5289_v1  ;;  %v5308_v24 = vrot.slane %v1376_v49, %v5289_v1 }
 0x23d   : > { %v1162_v38 = vadd.f32 %v4086_v35, %v1161_v36  ;;  %v1265_v39 = vadd.f32 %v4087_v29, %v1264_v37 }
 0x23e   : > { %v4372_v40 = vpop.f32.mrf.mxu0  ;;  %v4413_v41 = vpop.f32.mrf.mxu1  ;;  %v5311_v25 = vrot.slane %v1390_v10, %v5289_v1 }
 0x23f   : > { %1644 = vrot.lane.b32.xlu0 %v1265_v39, %s4847_s20  ;;  %v5267_v43 = vmul.f32 0.125, %v1162_v38  ;;  %v1716_v15 = vcombine.high %v1265_v39, %v4845_v9  ;;  %v1723_v21 = vrot.slane %v1265_v39, %v5289_v1 }
 0x240   : > { %v1166_v42 = vpop.f32.mrf.mxu0 }
 0x241   : > { %v1269_v44 = vpop.f32.mrf.mxu1  ;;  %v1167_v50 = vadd.f32 %v4086_v35, %v1166_v42  ;;  %v1456_v26 = vcombine.high %v5267_v43, %v4845_v9  ;;  %v1730_v28 = vrot.slane %v1716_v15, %v5289_v1  ;;  %v1463_v41 = vrot.slane %v5267_v43, %v5289_v1 }
 0x242   : > { %v5269_v46 = vadd.f32 %v4087_v29, %v1269_v44  ;;  %v4375_v47 = vpop.f32.mrf.mxu0 }
 0x243   : > { %v4416_v48 = vpop.f32.mrf.mxu1  ;;  %1384 = vrot.lane.b32.xlu0 %v5267_v43, %s4847_s20  ;;  %v5276_v51 = vmul.f32 0.125, %v1167_v50  ;;  %v1470_v42 = vrot.slane %v1456_v26, %v5289_v1 }
 0x244   : > { %1646 = vrot.lane.b32.xlu1 %v5269_v46, %s4847_s20 }
 0x248   : > { %1382 = vrot.lane.b32.xlu1 %v1376_v49, %s4847_s20 }
 0x24c   : > { %1386 = vrot.lane.b32.xlu1 %v5276_v51, %s4847_s20 }
 0x258   : > { %v5280_v52 = vpop.f32.mrf.mxu0 }
 0x25a   : > { %v4451_v53 = vpop.f32.mrf.mxu0 }
 0x25c   : > { %v5282_v54 = vpop.f32.mrf.mxu0 }
 0x25e   : > { %v4454_v55 = vpop.f32.mrf.mxu0 }
 0x260   : > { %v5284_v56 = vpop.f32.mrf.mxu0 }
 0x262   : > { %v4457_v57 = vpop.f32.mrf.mxu0 }
 0x2ac   : > { %v1643_v4 = vpop.permute.xlu1 %1642 }
 0x2ad   : > { %v1665_v7 = vcombine.high %v1643_v4, %v4845_v9  ;;  %v1672_v8 = vrot.slane %v1643_v4, %v5289_v1 }
 0x2af   : > { %v1679_v12 = vrot.slane %v1665_v7, %v5289_v1  ;;  %v1680_v13 = vcombine.low %v1657_v5, %v1672_v8  ;;  %v1681_v14 = vcombine.high %v1657_v5, %v1672_v8 }
 0x2b1   : > { %v1688_v16 = vrot.slane %v1680_v13, %v5294_v6  ;;  %v1695_v17 = vrot.slane %v1681_v14, %v5294_v6  ;;  %v1696_v18 = vcombine.low %v1664_v11, %v1679_v12  ;;  %v1697_v19 = vcombine.high %v1664_v11, %v1679_v12  ;;  %v1645_v20 = vpop.permute.xlu0 %1644 }
 0x2b2   : > { %v1731_v22 = vcombine.high %v1645_v20, %v4845_v9  ;;  %v1738_v23 = vrot.slane %v1645_v20, %v5289_v1 }
 0x2b3   : > { %v1784_v27 = vcombine.low %v1688_v16, %v1695_v17  ;;  %v1704_v32 = vrot.slane %v1696_v18, %v5294_v6  ;;  %v1711_v33 = vrot.slane %v1697_v19, %v5294_v6  ;;  %v4093_v34 = vcombine.high %v1688_v16, %v1695_v17 }
 0x2b4   : > { %v1745_v29 = vrot.slane %v1731_v22, %v5289_v1  ;;  %v1746_v30 = vcombine.low %v1723_v21, %v1738_v23  ;;  %v1747_v31 = vcombine.high %v1723_v21, %v1738_v23 }
 0x2b5   : > { %v1385_v40 = vpop.permute.xlu0 %1384  ;;  %v5325_v44 = vrot.slane %v1784_v27, %v5289_v1  ;;  %v5331_v53 = vrot.slane %v4093_v34, %v5289_v1  ;;  %v1800_v55 = vcombine.low %v1704_v32, %v1711_v33  ;;  %v4094_v58 = vcombine.high %v1704_v32, %v1711_v33 }
 0x2b6   : > { %v1754_v35 = vrot.slane %v1746_v30, %v5294_v6  ;;  %v1761_v36 = vrot.slane %v1747_v31, %v5294_v6  ;;  %v1762_v37 = vcombine.low %v1730_v28, %v1745_v29  ;;  %v1763_v38 = vcombine.high %v1730_v28, %v1745_v29  ;;  %v1647_v39 = vpop.permute.xlu1 %1646 }
 0x2b7   : > { %v1783_v45 = vcombine.low %v5269_v46, %v1647_v39  ;;  %v1471_v43 = vcombine.high %v1385_v40, %v4845_v9  ;;  %v1478_v0 = vrot.slane %v1385_v40, %v5289_v1  ;;  %v1807_v14 = vrot.slane %v1800_v55, %v5289_v1 }
 0x2b8   : > { %v1770_v47 = vrot.slane %v1762_v37, %v5294_v6  ;;  %v1777_v48 = vrot.slane %v1763_v38, %v5294_v6  ;;  %v1834_v49 = vcombine.low %v1754_v35, %v1761_v36  ;;  %v4095_v50 = vcombine.high %v1754_v35, %v1761_v36 }
 0x2b9   : > { %v1890_v57 = vrot.slane %v1783_v45, %v5294_v6  ;;  %v1485_v2 = vrot.slane %v1471_v43, %v5289_v1  ;;  %v1486_v11 = vcombine.low %v1463_v41, %v1478_v0  ;;  %v1487_v12 = vcombine.high %v1463_v41, %v1478_v0 }
 0x2ba   : > { %v1841_v59 = vrot.slane %v1834_v49, %v5289_v1  ;;  %v1850_v60 = vcombine.low %v1770_v47, %v1777_v48  ;;  %v4096_v61 = vcombine.high %v1770_v47, %v1777_v48  ;;  %v1383_v46 = vpop.permute.xlu1 %1382  ;;  %v1849_v4 = vrot.slane %v4095_v50, %v5289_v1 }
 0x2bb   : > { %v1897_v63 = vrot.slane %v1890_v57, %v5294_v6  ;;  %v1405_v3 = vcombine.high %v1383_v46, %v4845_v9  ;;  %v1412_v8 = vrot.slane %v1383_v46, %v5289_v1  ;;  %v1502_v13 = vcombine.low %v1470_v42, %v1485_v2 }
 0x2bc   : > { %v1857_v5 = vrot.slane %v1850_v60, %v5289_v1  ;;  %v1865_v7 = vrot.slane %v4096_v61, %v5289_v1  ;;  %v1815_v15 = vrot.slane %v4094_v58, %v5289_v1  ;;  %v1503_v16 = vcombine.high %v1470_v42, %v1485_v2 }
 0x2bd   : > { %v1898_v10 = vcombine.high %v1897_v63, %v4845_v9  ;;  %4459 = vmatpush3.xpose.msk.msra.mxu0 %vm2159_vm2, %v1897_v63  ;;  %v1419_v17 = vrot.slane %v1405_v3, %v5289_v1  ;;  %v1494_v18 = vrot.slane %v1486_v11, %v5294_v6  ;;  %v1501_v19 = vrot.slane %v1487_v12, %v5294_v6 }
 0x2be   : > { %4460 = vmatprep.subr.mxu0 %v4845_v9  ;;  %v1510_v20 = vrot.slane %v1502_v13, %v5294_v6  ;;  %v1420_v21 = vcombine.low %v5308_v24, %v1412_v8  ;;  %v1517_v22 = vrot.slane %v1503_v16, %v5294_v6  ;;  %v1421_v23 = vcombine.high %v5308_v24, %v1412_v8  ;;  %v1387_v60 = vpop.permute.xlu1 %1386 }
 0x2bf   : > { %4474 = vmatpush3.xpose.msk.msra.mxu1 %vm2159_vm2, %v1898_v10  ;;  %v1436_v26 = vcombine.low %v5311_v25, %v1419_v17  ;;  %v1437_v27 = vcombine.high %v5311_v25, %v1419_v17  ;;  %v1866_v28 = vcombine.low %v1841_v59, %v1849_v4  ;;  %v1874_v29 = vcombine.low %v1857_v5, %v1865_v7 }
 0x2c0   : > { %4475 = vmatprep.subr.mxu1 %v4845_v9  ;;  %v1428_v30 = vrot.slane %v1420_v21, %v5294_v6  ;;  %v1590_v31 = vcombine.low %v1510_v20, %v1517_v22  ;;  %v4092_v32 = vcombine.high %v1510_v20, %v1517_v22  ;;  %v1435_v33 = vrot.slane %v1421_v23, %v5294_v6 }
 0x2c1   : > { %v1444_v34 = vrot.slane %v1436_v26, %v5294_v6  ;;  %v1816_v35 = vcombine.low %v5325_v44, %v5331_v53  ;;  %v1824_v24 = vcombine.low %v1807_v14, %v1815_v15  ;;  %v1451_v36 = vrot.slane %v1437_v27, %v5294_v6 }
 0x2c2   : > { %v1574_v37 = vcombine.low %v1494_v18, %v1501_v19  ;;  %v4091_v25 = vcombine.high %v1494_v18, %v1501_v19  ;;  %v1524_v38 = vcombine.low %v1428_v30, %v1435_v33  ;;  %v4089_v39 = vcombine.high %v1428_v30, %v1435_v33 }
 0x2c3   : > { %v1873_v40 = vrot.slane %v1866_v28, %v5294_v6  ;;  %v1540_v41 = vcombine.low %v1444_v34, %v1451_v36  ;;  %v4090_v42 = vcombine.high %v1444_v34, %v1451_v36  ;;  %v1881_v45 = vrot.slane %v1874_v29, %v5294_v6 }
 0x2c4   : > { %v1597_v47 = vrot.slane %v1590_v31, %v5289_v1  ;;  %v1605_v48 = vrot.slane %v4092_v32, %v5289_v1  ;;  %v1531_v49 = vrot.slane %v1524_v38, %v5289_v1  ;;  %v1539_v44 = vrot.slane %v4089_v39, %v5289_v1 }
 0x2c5   : > { %v1547_v50 = vrot.slane %v1540_v41, %v5289_v1  ;;  %v1555_v53 = vrot.slane %v4090_v42, %v5289_v1  ;;  %v1882_v55 = vcombine.low %v1873_v40, %v1881_v45  ;;  %v1831_v57 = vrot.slane %v1824_v24, %v5294_v6 }
 0x2c6   : > { %v1581_v43 = vrot.slane %v1574_v37, %v5289_v1  ;;  %v1589_v58 = vrot.slane %v4091_v25, %v5289_v1  ;;  %v1556_v59 = vcombine.low %v1531_v49, %v1539_v44  ;;  %v1883_v61 = vcombine.high %v1873_v40, %v1881_v45 }
 0x2c7   : > { %v1823_v46 = vrot.slane %v1816_v35, %v5294_v6  ;;  %v1564_v63 = vcombine.low %v1547_v50, %v1555_v53  ;;  %4461 = vmatpush3.xpose.msk.msra.mxu0 %vm2159_vm2, %v1882_v55  ;;  %v1614_v0 = vcombine.low %v1597_v47, %v1605_v48  ;;  %v1523_v4 = vcombine.low %v5276_v51, %v1387_v60 }
 0x2c8   : > { %4476 = vmatpush3.xpose.msk.msra.mxu1 %vm2159_vm2, %v1883_v61  ;;  %4462 = vmatprep.subr.mxu0 %v4845_v9  ;;  %v1563_v2 = vrot.slane %v1556_v59, %v5294_v6  ;;  %v1606_v8 = vcombine.low %v1581_v43, %v1589_v58 }
 0x2c9   : > { %v1571_v3 = vrot.slane %v1564_v63, %v5294_v6  ;;  %4477 = vmatprep.subr.mxu1 %v4845_v9  ;;  %v1832_v5 = vcombine.low %v1823_v46, %v1831_v57  ;;  %v1833_v7 = vcombine.high %v1823_v46, %v1831_v57  ;;  %v1621_v12 = vrot.slane %v1614_v0, %v5294_v6  ;;  %v4088_v57 = vld [vmem:[%s6070_s29] ss:$0 sm:$0xff] }
 0x2ca   : > { %v1630_v13 = vrot.slane %v1523_v4, %v5294_v6  ;;  %v1613_v51 = vrot.slane %v1606_v8, %v5294_v6  ;;  %v1363_v43 = vadd.f32 %v4088_v57, %v5280_v52  ;;  %v1368_v58 = vadd.f32 %v4088_v57, %v5282_v54 }
 0x2cb   : > { %v1572_v10 = vcombine.low %v1563_v2, %v1571_v3  ;;  %v1573_v11 = vcombine.high %v1563_v2, %v1571_v3  ;;  %4463 = vmatpush3.xpose.msk.msra.mxu0 %vm2159_vm2, %v1832_v5  ;;  %v5448_v4 = vadd.f32 %v4088_v57, %v5284_v56 }
 0x2cc   : > { %4478 = vmatpush3.xpose.msk.msra.mxu1 %vm2159_vm2, %v1833_v7  ;;  %4503 = vmatprep.subr.mxu0 %v4845_v9  ;;  %v1622_v14 = vcombine.low %v1613_v51, %v1621_v12  ;;  %v1637_v15 = vrot.slane %v1630_v13, %v5294_v6  ;;  %v1623_v16 = vcombine.high %v1613_v51, %v1621_v12 }
 0x2cd   : > { %4488 = vmatprep.subr.mxu1 %v4845_v9 }
 0x2ce   : > { %4465 = vmatmul.mubr.msk.f32.vlgmr.msra.gmra.mxu0 %vm2159_vm2, %v1572_v10  ;;  %v1638_v17 = vcombine.high %v1637_v15, %v4845_v9 }
 0x2cf   : > { %4480 = vmatmul.mubr.msk.f32.vlgmr.msra.gmra.mxu1 %vm2159_vm2, %v1573_v11  ;;  %4467 = vmatprep.mubr.msk.f32.mxu0 %vm4846_vm1, %v4845_v9 }
 0x2d0   : > { %4482 = vmatprep.mubr.msk.f32.mxu1 %vm4846_vm1, %v4845_v9 }
 0x2d2   : > { %4468 = vmatmul.mubr.msk.f32.gmra.mxu0 %vm2159_vm2, %v1622_v14 }
 0x2d3   : > { %4483 = vmatmul.mubr.msk.f32.gmra.mxu1 %vm2159_vm2, %v1623_v16  ;;  %4470 = vmatprep.mubr.msk.f32.mxu0 %vm4846_vm1, %v4845_v9  ;;  %v1976_v16 = vcombine.high %v1368_v58, %v4845_v9 }
 0x2d4   : > { %4485 = vmatprep.mubr.msk.f32.mxu1 %vm4846_vm1, %v4845_v9 }
 0x2d6   : > { %4471 = vmatmul.mubr.msk.f32.gmra.mxu0 %vm2159_vm2, %v1637_v15 }
 0x2d7   : > { %4486 = vmatmul.mubr.msk.f32.gmra.mxu1 %vm2159_vm2, %v1638_v17  ;;  %4509 = vmatprep.mubr.msk.f32.mxu0 %vm4846_vm1, %v4845_v9 }
 0x2d8   : > { %4494 = vmatprep.mubr.msk.f32.mxu1 %vm4846_vm1, %v4845_v9 }
 0x38e   : > { %v2244_v18 = vpop.f32.mrf.mxu0 }
 0x38f   : > { %v2342_v19 = vpop.f32.mrf.mxu1  ;;  %v2357_v20 = vsel %vm2356_vm3, %v2244_v18, -inf }
 0x390   : > { %v2367_v21 = vsel %vm2356_vm3, %v2342_v19, -inf  ;;  %2358 = vmax.xlane.f32.xlu0 %v2357_v20  ;;  %v4466_v22 = vpop.f32.mrf.mxu0  ;;  %v1990_v20 = vrot.slane %v1976_v16, %v5289_v1 }
 0x391   : > { %v4481_v23 = vpop.f32.mrf.mxu1  ;;  %2368 = vmax.xlane.f32.xlu1 %v2367_v21 }
 0x392   : > { %v2249_v26 = vpop.f32.mrf.mxu0 }
 0x393   : > { %v2347_v27 = vpop.f32.mrf.mxu1  ;;  %v2360_v28 = vsel %vm2356_vm3, %v2249_v26, -inf }
 0x394   : > { %2361 = vmax.xlane.f32.xlu0 %v2360_v28  ;;  %v4469_v29 = vpop.f32.mrf.mxu0  ;;  %v2370_v33 = vsel %vm2356_vm3, %v2347_v27, -inf }
 0x395   : > { %v4484_v30 = vpop.f32.mrf.mxu1 }
 0x396   : > { %v2254_v31 = vpop.f32.mrf.mxu0  ;;  %v1917_v30 = vrot.slane %v1363_v43, %v5289_v1 }
 0x397   : > { %v2352_v32 = vpop.f32.mrf.mxu1  ;;  %v2364_v36 = vsel %vm2363_vm4, %v2254_v31, -inf }
 0x398   : > { %v2373_v34 = vsel %vm2363_vm4, %v2352_v32, -inf  ;;  %2371 = vmax.xlane.f32.xlu0 %v2370_v33  ;;  %v4472_v35 = vpop.f32.mrf.mxu0 }
 0x399   : > { %2374 = vmax.xlane.f32.xlu1 %v2373_v34  ;;  %v4487_v24 = vpop.f32.mrf.mxu1 }
 0x39c   : > { %2365 = vmax.xlane.f32.xlu0 %v2364_v36 }
 0x419   : > { %v2359_v37 = vpop.xlane.xlu0 %2358 }
 0x41a   : > { %v2369_v25 = vpop.xlane.xlu1 %2368  ;;  %v2376_v38 = vsub.f32 %v2244_v18, %v2359_v37  ;;  %v1910_v18 = vcombine.high %v1363_v43, %v4845_v9 }
 0x41b   : > { %v2379_v39 = vsub.f32 %v2342_v19, %v2369_v25 }
 0x41c   : > { %v2382_v40 = vmul.f32 1.442695, %v2376_v38  ;;  %v1924_v23 = vrot.slane %v1910_v18, %v5289_v1 }
 0x41d   : > { %v2388_v41 = vmul.f32 1.442695, %v2379_v39  ;;  %v2362_v42 = vpop.xlane.xlu0 %2361 }
 0x41e   : > { %4736 = vpow2.f32 %v2382_v40  ;;  %v2377_v45 = vsub.f32 %v2249_v26, %v2362_v42  ;;  %v1983_v26 = vrot.slane %v1368_v58, %v5289_v1 }
 0x41f   : > { %4738 = vpow2.f32 %v2388_v41 }
 0x420   : > { %v2384_v47 = vmul.f32 1.442695, %v2377_v45 }
 0x421   : > { %v2372_v59 = vpop.xlane.xlu0 %2371 }
 0x422   : > { %4740 = vpow2.f32 %v2384_v47  ;;  %v2375_v60 = vpop.xlane.xlu1 %2374  ;;  %v2380_v61 = vsub.f32 %v2347_v27, %v2372_v59 }
 0x423   : > { %v2381_v46 = vsub.f32 %v2352_v32, %v2375_v60 }
 0x424   : > { %v2390_v63 = vmul.f32 1.442695, %v2380_v61 }
 0x425   : > { %v2392_v0 = vmul.f32 1.442695, %v2381_v46  ;;  %v2366_v5 = vpop.xlane.xlu0 %2365 }
 0x426   : > { %4742 = vpow2.f32 %v2390_v63  ;;  %v2378_v7 = vsub.f32 %v2254_v31, %v2366_v5 }
 0x427   : > { %4744 = vpow2.f32 %v2392_v0 }
 0x428   : > { %v2386_v8 = vmul.f32 1.442695, %v2378_v7 }
 0x42a   : > { %4746 = vpow2.f32 %v2386_v8 }
 0x42b   : > { %v5418_v48 = vpop.eup %4736 }
 0x42c   : > { %v5420_v49 = vpop.eup %4738  ;;  %v2394_v44 = vsel %vm2356_vm3, %v5418_v48, 0.0 }
 0x42d   : > { %v2403_v50 = vsel %vm2356_vm3, %v5420_v49, 0.0  ;;  %2395 = vadd.xlane.f32.xlu0 %v2394_v44 }
 0x42e   : > { %2404 = vadd.xlane.f32.xlu1 %v2403_v50 }
 0x42f   : > { %v5426_v53 = vpop.eup %4740 }
 0x430   : > { %v2397_v55 = vsel %vm2356_vm3, %v5426_v53, 0.0 }
 0x431   : > { %2398 = vadd.xlane.f32.xlu0 %v2397_v55 }
 0x433   : > { %v5439_v2 = vpop.eup %4742 }
 0x434   : > { %v5441_v3 = vpop.eup %4744  ;;  %v2406_v52 = vsel %vm2356_vm3, %v5439_v2, 0.0 }
 0x435   : > { %v2409_v54 = vsel %vm2363_vm4, %v5441_v3, 0.0 }
 0x437   : > { %v5452_v10 = vpop.eup %4746 }
 0x438   : > { %v2400_v11 = vsel %vm2363_vm4, %v5452_v10, 0.0 }
 0x43f   : > { %1902 = vrot.lane.b32.xlu1 %v1363_v43, %s4847_s20 }
 0x447   : > { %1904 = vrot.lane.b32.xlu0 %v1368_v58, %s4847_s20 }
 0x463   : > { %2407 = vadd.xlane.f32.xlu1 %v2406_v52 }
 0x466   : > { %2410 = vadd.xlane.f32.xlu0 %v2409_v54 }
 0x474   : > { %1906 = vrot.lane.b32.xlu1 %v5448_v4, %s4847_s20 }
 0x498   : > { %2401 = vadd.xlane.f32.xlu1 %v2400_v11 }
 0x4b6   : > { %v2396_v12 = vpop.xlane.xlu0 %2395 }
 0x4b7   : > { %v2405_v51 = vpop.xlane.xlu1 %2404  ;;  %4748 = vrcp.f32 %v2396_v12 }
 0x4b8   : > { %4750 = vrcp.f32 %v2405_v51 }
 0x4ba   : > { %v2399_v13 = vpop.xlane.xlu0 %2398 }
 0x4bb   : > { %v1903_v15 = vpop.permute.xlu1 %1902  ;;  %4752 = vrcp.f32 %v2399_v13 }
 0x4bc   : > { %v1925_v17 = vcombine.high %v1903_v15, %v4845_v9  ;;  %v1932_v27 = vrot.slane %v1903_v15, %v5289_v1 }
 0x4be   : > { %v1905_v14 = vpop.permute.xlu0 %1904  ;;  %v1939_v21 = vrot.slane %v1925_v17, %v5289_v1  ;;  %v1940_v35 = vcombine.low %v1917_v30, %v1932_v27  ;;  %v1941_v24 = vcombine.high %v1917_v30, %v1932_v27 }
 0x4bf   : > { %v1991_v56 = vcombine.high %v1905_v14, %v4845_v9  ;;  %v1998_v22 = vrot.slane %v1905_v14, %v5289_v1 }
 0x4c0   : > { %v1956_v31 = vcombine.low %v1924_v23, %v1939_v21  ;;  %v1957_v32 = vcombine.high %v1924_v23, %v1939_v21  ;;  %v1948_v41 = vrot.slane %v1940_v35, %v5294_v6  ;;  %v1955_v42 = vrot.slane %v1941_v24, %v5294_v6  ;;  %v2886_v35 = vld [vmem:[%s5038_s16 + $0x78] sm:$0xff]  ;;  %v2884_v24 = vld [vmem:[%s5038_s16 + $0x68] sm:$0xff] }
 0x4c1   : > { %v2005_v19 = vrot.slane %v1991_v56, %v5289_v1  ;;  %v2006_v33 = vcombine.low %v1983_v26, %v1998_v22  ;;  %v2007_v34 = vcombine.high %v1983_v26, %v1998_v22 }
 0x4c2   : > { %v1964_v25 = vrot.slane %v1956_v31, %v5294_v6  ;;  %v1971_v38 = vrot.slane %v1957_v32, %v5294_v6  ;;  %v2044_v43 = vcombine.low %v1948_v41, %v1955_v42  ;;  %v4097_v58 = vcombine.high %v1948_v41, %v1955_v42  ;;  %v2876_v41 = vld [vmem:[%s5038_s16 + $0x28] sm:$0xff]  ;;  %v2875_v42 = vld [vmem:[%s5038_s16 + $0x20] sm:$0xff] }
 0x4c3   : > { %v2022_v28 = vcombine.low %v1990_v20, %v2005_v19  ;;  %v2023_v29 = vcombine.high %v1990_v20, %v2005_v19  ;;  %v2014_v39 = vrot.slane %v2006_v33, %v5294_v6  ;;  %v2021_v40 = vrot.slane %v2007_v34, %v5294_v6 }
 0x4c4   : > { %v2060_v44 = vcombine.low %v1964_v25, %v1971_v38  ;;  %v4098_v50 = vcombine.high %v1964_v25, %v1971_v38  ;;  %v2051_v54 = vrot.slane %v2044_v43, %v5289_v1  ;;  %v2059_v5 = vrot.slane %v4097_v58, %v5289_v1  ;;  %v4749_v19 = vpop.eup %4748  ;;  %v2880_v25 = vld [vmem:[%s5038_s16 + $0x48] sm:$0xff]  ;;  %v2879_v38 = vld [vmem:[%s5038_s16 + $0x40] sm:$0xff] }
 0x4c5   : > { %v2030_v36 = vrot.slane %v2022_v28, %v5294_v6  ;;  %v2037_v37 = vrot.slane %v2023_v29, %v5294_v6  ;;  %v2094_v55 = vcombine.low %v2014_v39, %v2021_v40  ;;  %v4099_v57 = vcombine.high %v2014_v39, %v2021_v40  ;;  %v4751_v22 = vpop.eup %4750  ;;  %v2878_v39 = vld [vmem:[%s5038_s16 + $0x38] sm:$0xff]  ;;  %v2877_v40 = vld [vmem:[%s5038_s16 + $0x30] sm:$0xff] }
 0x4c6   : > { %v2067_v46 = vrot.slane %v2060_v44, %v5289_v1  ;;  %v2075_v63 = vrot.slane %v4098_v50, %v5289_v1  ;;  %v2076_v16 = vcombine.low %v2051_v54, %v2059_v5  ;;  %v2418_v27 = vmul.f32 %v4749_v19, %v5418_v48  ;;  %v2872_v44 = vld [vmem:[%s5038_s16 + $0x8] sm:$0xff] }
 0x4c7   : > { %v2110_v45 = vcombine.low %v2030_v36, %v2037_v37  ;;  %v4100_v47 = vcombine.high %v2030_v36, %v2037_v37  ;;  %v2101_v0 = vrot.slane %v2094_v55, %v5289_v1  ;;  %v2109_v52 = vrot.slane %v4099_v57, %v5289_v1  ;;  %v2883_v36 = vld [vmem:[%s5038_s16 + $0x60] sm:$0xff]  ;;  %v2881_v37 = vld [vmem:[%s5038_s16 + $0x50] sm:$0xff] }
 0x4c8   : > { %v2084_v14 = vcombine.low %v2067_v46, %v2075_v63  ;;  %v2083_v21 = vrot.slane %v2076_v16, %v5294_v6  ;;  %v4753_v28 = vpop.eup %4752  ;;  %v2421_v30 = vmul.f32 %v4751_v22, %v5420_v49 }
 0x4c9   : > { %v2117_v59 = vrot.slane %v2110_v45, %v5289_v1  ;;  %v2125_v60 = vrot.slane %v4100_v47, %v5289_v1  ;;  %v2126_v51 = vcombine.low %v2101_v0, %v2109_v52  ;;  %v2419_v48 = vmul.f32 %v4753_v28, %v5426_v53  ;;  %v2874_v45 = vld [vmem:[%s5038_s16 + $0x18] sm:$0xff]  ;;  %v2873_v47 = vld [vmem:[%s5038_s16 + $0x10] sm:$0xff] }
 0x4ca   : > { %v2091_v18 = vrot.slane %v2084_v14, %v5294_v6 }
 0x4cb   : > { %v2134_v7 = vcombine.low %v2117_v59, %v2125_v60  ;;  %v2133_v17 = vrot.slane %v2126_v51, %v5294_v6 }
 0x4cc   : > { %v2092_v23 = vcombine.low %v2083_v21, %v2091_v18  ;;  %v2093_v29 = vcombine.high %v2083_v21, %v2091_v18 }
 0x4cd   : > { %v2141_v56 = vrot.slane %v2134_v7, %v5294_v6 }
 0x4cf   : > { %v2143_v26 = vcombine.high %v2133_v17, %v2141_v56 }
 0x4ec   : > { %v2408_v61 = vpop.xlane.xlu1 %2407 }
 0x4ed   : > { %4754 = vrcp.f32 %v2408_v61 }
 0x4ef   : > { %v2411_v12 = vpop.xlane.xlu0 %2410 }
 0x4f0   : > { %v1907_v8 = vpop.permute.xlu1 %1906  ;;  %4756 = vrcp.f32 %v2411_v12 }
 0x4f1   : > { %v2043_v11 = vcombine.low %v5448_v4, %v1907_v8  ;;  %v2142_v4 = vcombine.low %v2133_v17, %v2141_v56  ;;  %v2871_v17 = vld [vmem:[%s5038_s16] sm:$0xff] }
 0x4f3   : > { %v2150_v15 = vrot.slane %v2043_v11, %v5294_v6 }
 0x4f5   : > { %v2157_v13 = vrot.slane %v2150_v15, %v5294_v6 }
 0x4f7   : > { %v2158_v20 = vcombine.high %v2157_v13, %v4845_v9  ;;  %4489 = vmatpush3.msk.msra.mxu1 %vm1016_vm0, %v2157_v13 }
 0x4f8   : > { %4490 = vmatprep.subr.mxu1 %v4845_v9 }
 0x4f9   : > { %4491 = vmatpush3.msra.mxu1 %v2142_v4  ;;  %4504 = vmatpush3.msk.msra.mxu0 %vm1016_vm0, %v2158_v20 }
 0x4fa   : > { %4492 = vmatprep.subr.mxu1 %v4845_v9  ;;  %4505 = vmatprep.subr.mxu0 %v4845_v9  ;;  %v4755_v31 = vpop.eup %4754 }
 0x4fb   : > { %4493 = vmatpush3.msra.mxu1 %v2092_v23  ;;  %4506 = vmatpush3.msra.mxu0 %v2143_v26  ;;  %v2422_v49 = vmul.f32 %v4755_v31, %v5439_v2 }
 0x4fc   : > { %4495 = vmatmul.mubr.msk.f32.vlgmr.msra.gmra.mxu1 %vm2356_vm3, %v2418_v27  ;;  %4507 = vmatprep.subr.mxu0 %v4845_v9 }
 0x4fd   : > { %4508 = vmatpush3.msra.mxu0 %v2093_v29  ;;  %4497 = vmatprep.mubr.msk.f32.mxu1 %vm4846_vm1, %v4845_v9  ;;  %v4757_v32 = vpop.eup %4756 }
 0x4fe   : > { %4510 = vmatmul.mubr.msk.f32.vlgmr.msra.gmra.mxu0 %vm2356_vm3, %v2421_v30  ;;  %4518 = vmatprep.subr.mxu1 %v4845_v9  ;;  %v2423_v53 = vmul.f32 %v4757_v32, %v5441_v3  ;;  %v2885_v3 = vld [vmem:[%s5038_s16 + $0x70] sm:$0xff] }
 0x4ff   : > { %4512 = vmatprep.mubr.msk.f32.mxu0 %vm4846_vm1, %v4845_v9  ;;  %4519 = vmatpush3.msra.mxu1 %v2886_v35 }
 0x500   : > { %4498 = vmatmul.mubr.msk.f32.gmra.mxu1 %vm2356_vm3, %v2419_v48  ;;  %4520 = vmatprep.subr.mxu1 %v4845_v9 }
 0x501   : > { %4500 = vmatprep.mubr.msk.f32.mxu1 %vm4846_vm1, %v4845_v9  ;;  %4521 = vmatpush3.msra.mxu1 %v2885_v3 }
 0x502   : > { %4513 = vmatmul.mubr.msk.f32.gmra.mxu0 %vm2356_vm3, %v2422_v49  ;;  %4522 = vmatprep.subr.mxu1 %v4845_v9 }
 0x503   : > { %4515 = vmatprep.mubr.msk.f32.mxu0 %vm4846_vm1, %v4845_v9  ;;  %4523 = vmatpush3.msra.mxu1 %v2884_v24 }
 0x504   : > { %4524 = vmatprep.subr.mxu1 %v4845_v9 }
 0x505   : > { %4525 = vmatpush3.msra.mxu1 %v2883_v36 }
 0x506   : > { %4516 = vmatmul.mubr.msk.f32.gmra.mxu0 %vm2356_vm3, %v2423_v53  ;;  %4526 = vmatprep.subr.mxu1 %v4845_v9 }
 0x507   : > { %3171 = vmatprep.mubr.f32.mxu0 %v4845_v9 }
 0x521   : > { %v2402_v33 = vpop.xlane.xlu1 %2401 }
 0x522   : > { %4758 = vrcp.f32 %v2402_v33 }
 0x52f   : > { %v4759_v2 = vpop.eup %4758 }
 0x530   : > { %v2420_v34 = vmul.f32 %v4759_v2, %v5452_v10  ;;  %v2882_v10 = vld [vmem:[%s5038_s16 + $0x58] sm:$0xff] }
 0x531   : > { %4527 = vmatpush3.msra.mxu1 %v2882_v10 }
 0x532   : > { %4501 = vmatmul.mubr.msk.f32.gmra.mxu1 %vm2356_vm3, %v2420_v34  ;;  %4528 = vmatprep.subr.mxu1 %v4845_v9 }
 0x533   : > { %4550 = vmatprep.mubr.msk.f32.mxu1 %vm4846_vm1, %v4845_v9  ;;  %4529 = vmatpush3.msra.mxu1 %v2881_v37 }
 0x534   : > { %4530 = vmatprep.subr.mxu1 %v4845_v9 }
 0x535   : > { %4531 = vmatpush3.msra.mxu1 %v2880_v25 }
 0x536   : > { %4532 = vmatprep.subr.mxu1 %v4845_v9 }
 0x537   : > { %4533 = vmatpush3.msra.mxu1 %v2879_v38 }
 0x538   : > { %4534 = vmatprep.subr.mxu1 %v4845_v9 }
 0x539   : > { %4535 = vmatpush3.msra.mxu1 %v2878_v39 }
 0x53a   : > { %4536 = vmatprep.subr.mxu1 %v4845_v9 }
 0x53b   : > { %4537 = vmatpush3.msra.mxu1 %v2877_v40 }
 0x53c   : > { %4538 = vmatprep.subr.mxu1 %v4845_v9 }
 0x53d   : > { %4539 = vmatpush3.msra.mxu1 %v2876_v41 }
 0x53e   : > { %4540 = vmatprep.subr.mxu1 %v4845_v9 }
 0x53f   : > { %4541 = vmatpush3.msra.mxu1 %v2875_v42 }
 0x540   : > { %4542 = vmatprep.subr.mxu1 %v4845_v9 }
 0x541   : > { %4543 = vmatpush3.msra.mxu1 %v2874_v45 }
 0x542   : > { %4544 = vmatprep.subr.mxu1 %v4845_v9 }
 0x543   : > { %4545 = vmatpush3.msra.mxu1 %v2873_v47 }
 0x544   : > { %4546 = vmatprep.subr.mxu1 %v4845_v9 }
 0x545   : > { %4547 = vmatpush3.msra.mxu1 %v2872_v44 }
 0x546   : > { %4548 = vmatprep.subr.mxu1 %v4845_v9 }
 0x547   : > { %4549 = vmatpush3.msra.mxu1 %v2871_v17  ;;  %v4802_v17 = vld [vmem:[%s5094_s7] sm:$0xff] }
 0x548   : > { %4559 = vmatprep.subr.mxu1 %v4845_v9 }
 0x5bc   : > { %v2502_v50 = vpop.f32.mrf.mxu1 }
 0x5bd   : > { %v2608_v55 = vcombine.high %v2502_v50, %v4845_v9  ;;  %v2615_v58 = vrot.slane %v2502_v50, %v5289_v1 }
 0x5be   : > { %v4496_v57 = vpop.f32.mrf.mxu1  ;;  %v2594_v43 = vpop.f32.mrf.mxu0 }
 0x5bf   : > { %v2623_v59 = vcombine.high %v2594_v43, %v4845_v9  ;;  %v2630_v60 = vrot.slane %v2594_v43, %v5289_v1  ;;  %v2622_v63 = vrot.slane %v2608_v55, %v5289_v1 }
 0x5c0   : > { %v2507_v61 = vpop.f32.mrf.mxu1  ;;  %v4511_v46 = vpop.f32.mrf.mxu0 }
 0x5c1   : > { %v2637_v0 = vrot.slane %v2623_v59, %v5289_v1  ;;  %v2638_v52 = vcombine.low %v2615_v58, %v2630_v60  ;;  %v2639_v54 = vcombine.high %v2615_v58, %v2630_v60  ;;  %v2674_v5 = vcombine.high %v2507_v61, %v4845_v9 }
 0x5c2   : > { %v4499_v7 = vpop.f32.mrf.mxu1  ;;  %v2599_v8 = vpop.f32.mrf.mxu0  ;;  %v2681_v15 = vrot.slane %v2507_v61, %v5289_v1 }
 0x5c3   : > { %v2646_v11 = vrot.slane %v2638_v52, %v5294_v6  ;;  %v2653_v12 = vrot.slane %v2639_v54, %v5294_v6  ;;  %v2654_v51 = vcombine.low %v2622_v63, %v2637_v0  ;;  %v2655_v14 = vcombine.high %v2622_v63, %v2637_v0 }
 0x5c4   : > { %v2689_v56 = vcombine.high %v2599_v8, %v4845_v9  ;;  %v2696_v16 = vrot.slane %v2599_v8, %v5289_v1  ;;  %v4514_v13 = vpop.f32.mrf.mxu0  ;;  %v2688_v21 = vrot.slane %v2674_v5, %v5289_v1 }
 0x5c5   : > { %v2662_v18 = vrot.slane %v2654_v51, %v5294_v6  ;;  %v2669_v19 = vrot.slane %v2655_v14, %v5294_v6  ;;  %v2741_v20 = vcombine.low %v2646_v11, %v2653_v12  ;;  %v4121_v4 = vcombine.high %v2646_v11, %v2653_v12  ;;  %v4125_v12 = vld [vmem:[%s6071_s9] ss:$0 sm:$0xff] }
 0x5c6   : > { %v2703_v22 = vrot.slane %v2689_v56, %v5289_v1  ;;  %v2704_v23 = vcombine.low %v2681_v15, %v2696_v16  ;;  %v2705_v26 = vcombine.high %v2681_v15, %v2696_v16  ;;  %v2604_v27 = vpop.f32.mrf.mxu0  ;;  %v4126_v14 = vld [vmem:[%s6072_s14] ss:$0 sm:$0xff] }
 0x5c7   : > { %v2748_v28 = vrot.slane %v2741_v20, %v5289_v1  ;;  %v2756_v29 = vrot.slane %v4121_v4, %v5289_v1  ;;  %v2757_v30 = vcombine.low %v2662_v18, %v2669_v19  ;;  %v4122_v31 = vcombine.high %v2662_v18, %v2669_v19 }
 0x5c8   : > { %v2712_v48 = vrot.slane %v2704_v23, %v5294_v6  ;;  %v2719_v49 = vrot.slane %v2705_v26, %v5294_v6  ;;  %v2720_v32 = vcombine.low %v2688_v21, %v2703_v22  ;;  %v2721_v53 = vcombine.high %v2688_v21, %v2703_v22  ;;  %v4517_v33 = vpop.f32.mrf.mxu0  ;;  %v4803_v21 = vld [vmem:[%s5094_s7 + $0x8] sm:$0xff] }
 0x5c9   : > { %v2764_v2 = vrot.slane %v2757_v30, %v5289_v1  ;;  %v2772_v34 = vrot.slane %v4122_v31, %v5289_v1  ;;  %v2773_v35 = vcombine.low %v2748_v28, %v2756_v29  ;;  %v4804_v29 = vld [vmem:[%s5094_s7 + $0x10] sm:$0x1] }
 0x5ca   : > { %v2728_v3 = vrot.slane %v2720_v32, %v5294_v6  ;;  %v2735_v24 = vrot.slane %v2721_v53, %v5294_v6  ;;  %v2791_v36 = vcombine.low %v2712_v48, %v2719_v49  ;;  %v4123_v10 = vcombine.high %v2712_v48, %v2719_v49  ;;  %v3088_v48 = vld [vmem:[%s6073_s19 + $0x170] sm:$0xff]  ;;  %v3087_v49 = vld [vmem:[%s6073_s19 + $0x168] sm:$0xff]  ;;  %v3089_v32 = vld [vmem:[%s6073_s19 + $0x178] sm:$0xff] }
 0x5cb   : > { %v2781_v37 = vcombine.low %v2764_v2, %v2772_v34  ;;  %v2780_v41 = vrot.slane %v2773_v35, %v5294_v6  ;;  %3107 = vmatprep.subr.mxu0 %v3088_v48  ;;  %v3085_v53 = vld [vmem:[%s6073_s19 + $0x158] sm:$0xff]  ;;  %v3084_v33 = vld [vmem:[%s6073_s19 + $0x150] sm:$0xff]  ;;  %v3086_v2 = vld [vmem:[%s6073_s19 + $0x160] sm:$0xff] }
 0x5cc   : > { %v2798_v25 = vrot.slane %v2791_v36, %v5289_v1  ;;  %v2806_v38 = vrot.slane %v4123_v10, %v5289_v1  ;;  %v2807_v39 = vcombine.low %v2728_v3, %v2735_v24  ;;  %v4124_v40 = vcombine.high %v2728_v3, %v2735_v24  ;;  %3108 = vmatpush1.msra.mxu0 %v3087_v49  ;;  %v3082_v34 = vld [vmem:[%s6073_s19 + $0x140] sm:$0xff]  ;;  %v3083_v35 = vld [vmem:[%s6073_s19 + $0x148] sm:$0xff]  ;;  %v3081_v3 = vld [vmem:[%s6073_s19 + $0x138] sm:$0xff] }
 0x5cd   : > { %v2788_v42 = vrot.slane %v2781_v37, %v5294_v6  ;;  %3109 = vmatprep.subr.mxu0 %v3085_v53  ;;  %v3079_v24 = vld [vmem:[%s6073_s19 + $0x128] sm:$0xff]  ;;  %v3080_v36 = vld [vmem:[%s6073_s19 + $0x130] sm:$0xff]  ;;  %v3078_v10 = vld [vmem:[%s6073_s19 + $0x120] sm:$0xff] }
 0x5ce   : > { %v2814_v45 = vrot.slane %v2807_v39, %v5289_v1  ;;  %v2822_v47 = vrot.slane %v4124_v40, %v5289_v1  ;;  %v2823_v44 = vcombine.low %v2798_v25, %v2806_v38  ;;  %3110 = vmatpush1.msra.mxu0 %v3084_v33  ;;  %v3316_v48 = vld [vmem:[%s6074_s2 + $0x170] sm:$0xff] }
 0x5cf   : > { %v2790_v50 = vcombine.high %v2780_v41, %v2788_v42  ;;  %v2789_v55 = vcombine.low %v2780_v41, %v2788_v42  ;;  %3111 = vmatprep.subr.mxu0 %v3082_v34 }
 0x5d0   : > { %v2831_v57 = vcombine.low %v2814_v45, %v2822_v47  ;;  %v2830_v43 = vrot.slane %v2823_v44, %v5294_v6  ;;  %3112 = vmatpush1.msra.mxu0 %v3081_v3  ;;  %v3076_v47 = vld [vmem:[%s6073_s19 + $0x110] sm:$0xff]  ;;  %v3075_v44 = vld [vmem:[%s6073_s19 + $0x108] sm:$0xff] }
 0x5d1   : > { %2859 = vrot.lane.b32.xlu0 %v2790_v50, %s4847_s20  ;;  %3113 = vmatprep.subr.mxu0 %v3079_v24  ;;  %v3077_v50 = vld [vmem:[%s6073_s19 + $0x118] sm:$0xff] }
 0x5d2   : > { %v2838_v58 = vrot.slane %v2831_v57, %v5294_v6  ;;  %3114 = vmatpush1.msra.mxu0 %v3078_v10  ;;  %v3072_v57 = vld [vmem:[%s6073_s19 + $0xf0] sm:$0xff] }
 0x5d3   : > { %3115 = vmatprep.subr.mxu0 %v3076_v47  ;;  %v3317_v47 = vld [vmem:[%s6074_s2 + $0x178] sm:$0xff] }
 0x5d4   : > { %v2840_v59 = vcombine.high %v2830_v43, %v2838_v58  ;;  %v2839_v60 = vcombine.low %v2830_v43, %v2838_v58  ;;  %3116 = vmatpush1.msra.mxu0 %v3075_v44  ;;  %v3074_v43 = vld [vmem:[%s6073_s19 + $0x100] sm:$0xff] }
 0x5d5   : > { %v3070_v58 = vld [vmem:[%s6073_s19 + $0xe0] sm:$0xff] }
 0x5d6   : > { %2861 = vrot.lane.b32.xlu1 %v2840_v59, %s4847_s20  ;;  %v3069_v59 = vld [vmem:[%s6073_s19 + $0xd8] sm:$0xff] }
 0x5f2   : > { %v2512_v61 = vpop.f32.mrf.mxu1 }
 0x5f3   : > { %v2740_v46 = vcombine.low %v2512_v61, %v2604_v27  ;;  %v3067_v61 = vld [vmem:[%s6073_s19 + $0xc8] sm:$0xff] }
 0x5f4   : > { %v4502_v63 = vpop.f32.mrf.mxu1 }
 0x5f5   : > { %v2847_v0 = vrot.slane %v2740_v46, %v5294_v6  ;;  %v3066_v46 = vld [vmem:[%s6073_s19 + $0xc0] sm:$0xff]  ;;  %v3068_v63 = vld [vmem:[%s6073_s19 + $0xd0] sm:$0xff] }
 0x5f7   : > { %v2854_v1 = vrot.slane %v2847_v0, %v5294_v6  ;;  %v3064_v0 = vld [vmem:[%s6073_s19 + $0xb0] sm:$0xff] }
 0x5f9   : > { %v2855_v52 = vcombine.high %v2854_v1, %v4845_v9 }
 0x5fb   : > { %2863 = vrot.lane.b32.xlu1 %v2855_v52, %s4847_s20  ;;  %v3065_v52 = vld [vmem:[%s6073_s19 + $0xb8] sm:$0xff]  ;;  %s6077_s20 = sld [smem:[#allocation20_spill]] }
 0x601   : > { %s6078_s30 = scalar_lea.vmem %s6077_s20, %s4994_s0 }
 0x643   : > { %v2860_v54 = vpop.permute.xlu0 %2859 }
 0x644   : > { %v2868_v5 = vsel %vm2159_vm2, %v2789_v55, %v2860_v54  ;;  %v3073_v55 = vld [vmem:[%s6073_s19 + $0xf8] sm:$0xff] }
 0x645   : > { %4551 = vmatmul.mubr.f32.vlgmr.msra.gmra.mxu1 %v2868_v5  ;;  %3117 = vmatprep.subr.mxu0 %v3073_v55  ;;  %v3061_v54 = vld [vmem:[%s6073_s19 + $0x98] sm:$0xff]  ;;  %v3060_v5 = vld [vmem:[%s6073_s19 + $0x90] sm:$0xff] }
 0x646   : > { %4553 = vmatprep.mubr.msk.f32.mxu1 %vm4846_vm1, %v4845_v9  ;;  %4560 = vmatpush3.msra.mxu1 %v3089_v32 }
 0x647   : > { %4561 = vmatprep.subr.mxu1 %v4845_v9  ;;  %3118 = vmatpush1.msra.mxu0 %v3072_v57  ;;  %v3310_v57 = vld [vmem:[%s6074_s2 + $0x140] sm:$0xff] }
 0x648   : > { %v2862_v7 = vpop.permute.xlu1 %2861  ;;  %4562 = vmatpush3.msra.mxu1 %v3086_v2  ;;  %3119 = vmatprep.subr.mxu0 %v3070_v58  ;;  %v3311_v58 = vld [vmem:[%s6074_s2 + $0x148] sm:$0xff] }
 0x649   : > { %v2869_v8 = vsel %vm2159_vm2, %v2839_v60, %v2862_v7  ;;  %4563 = vmatprep.subr.mxu1 %v4845_v9  ;;  %v3071_v60 = vld [vmem:[%s6073_s19 + $0xe8] sm:$0xff]  ;;  %3120 = vmatpush1.msra.mxu0 %v3069_v59  ;;  %v3062_v7 = vld [vmem:[%s6073_s19 + $0xa0] sm:$0xff] }
 0x64a   : > { %4554 = vmatmul.mubr.f32.gmra.mxu1 %v2869_v8  ;;  %3121 = vmatprep.subr.mxu0 %v3067_v61  ;;  %v3058_v8 = vld [vmem:[%s6073_s19 + $0x80] sm:$0xff]  ;;  %v3307_v59 = vld [vmem:[%s6074_s2 + $0x128] sm:$0xff]  ;;  %v3308_v61 = vld [vmem:[%s6074_s2 + $0x130] sm:$0xff] }
 0x64b   : > { %4556 = vmatprep.mubr.msk.f32.mxu1 %vm4846_vm1, %v4845_v9  ;;  %4564 = vmatpush3.msra.mxu1 %v3083_v35 }
 0x64c   : > { %4565 = vmatprep.subr.mxu1 %v4845_v9  ;;  %3122 = vmatpush1.msra.mxu0 %v3066_v46  ;;  %v3304_v46 = vld [vmem:[%s6074_s2 + $0x110] sm:$0xff] }
 0x64d   : > { %4566 = vmatpush3.msra.mxu1 %v3080_v36  ;;  %3123 = vmatprep.subr.mxu0 %v3064_v0  ;;  %v5710_v36 = vld [vmem:[%s6076_s18] ss:$0 sm:$0xff]  ;;  %v3305_v0 = vld [vmem:[%s6074_s2 + $0x118] sm:$0xff] }
 0x64e   : > { %4567 = vmatprep.subr.mxu1 %v4845_v9 }
 0x64f   : > { %4568 = vmatpush3.msra.mxu1 %v3077_v50  ;;  %v3312_v50 = vld [vmem:[%s6074_s2 + $0x150] sm:$0xff] }
 0x650   : > { %4569 = vmatprep.subr.mxu1 %v4845_v9 }
 0x651   : > { %4570 = vmatpush3.msra.mxu1 %v3074_v43  ;;  %v3309_v43 = vld [vmem:[%s6074_s2 + $0x138] sm:$0xff] }
 0x652   : > { %4571 = vmatprep.subr.mxu1 %v4845_v9 }
 0x653   : > { %4572 = vmatpush3.msra.mxu1 %v3071_v60  ;;  %v3306_v60 = vld [vmem:[%s6074_s2 + $0x120] sm:$0xff] }
 0x654   : > { %4573 = vmatprep.subr.mxu1 %v4845_v9 }
 0x655   : > { %4574 = vmatpush3.msra.mxu1 %v3068_v63  ;;  %v3303_v63 = vld [vmem:[%s6074_s2 + $0x108] sm:$0xff] }
 0x656   : > { %4575 = vmatprep.subr.mxu1 %v4845_v9 }
 0x657   : > { %4576 = vmatpush3.msra.mxu1 %v3065_v52  ;;  %v3300_v52 = vld [vmem:[%s6074_s2 + $0xf0] sm:$0xff] }
 0x658   : > { %4577 = vmatprep.subr.mxu1 %v4845_v9 }
 0x659   : > { %4578 = vmatpush3.msra.mxu1 %v3062_v7  ;;  %v3297_v7 = vld [vmem:[%s6074_s2 + $0xd8] sm:$0xff] }
 0x65a   : > { %4579 = vmatprep.subr.mxu1 %v4845_v9 }
 0x66d   : > { %v2864_v6 = vpop.permute.xlu1 %2863 }
 0x66e   : > { %v2870_v11 = vsel %vm2159_vm2, %v2854_v1, %v2864_v6  ;;  %v3063_v1 = vld [vmem:[%s6073_s19 + $0xa8] sm:$0xff]  ;;  %v3057_v6 = vld [vmem:[%s6073_s19 + $0x78] sm:$0xff] }
 0x66f   : > { %4557 = vmatmul.mubr.f32.gmra.mxu1 %v2870_v11  ;;  %3124 = vmatpush1.msra.mxu0 %v3063_v1  ;;  %v3059_v11 = vld [vmem:[%s6073_s19 + $0x88] sm:$0xff]  ;;  %v3301_v1 = vld [vmem:[%s6074_s2 + $0xf8] sm:$0xff] }
 0x670   : > { %4591 = vmatprep.mubr.msk.f32.mxu1 %vm4846_vm1, %v4845_v9  ;;  %3125 = vmatprep.subr.mxu0 %v3061_v54  ;;  %v3302_v54 = vld [vmem:[%s6074_s2 + $0x100] sm:$0xff] }
 0x671   : > { %3126 = vmatpush1.msra.mxu0 %v3060_v5  ;;  %4580 = vmatpush3.msra.mxu1 %v3059_v11  ;;  %v3298_v5 = vld [vmem:[%s6074_s2 + $0xe0] sm:$0xff] }
 0x672   : > { %3127 = vmatprep.subr.mxu0 %v3058_v8  ;;  %4581 = vmatprep.subr.mxu1 %v4845_v9  ;;  %v3299_v8 = vld [vmem:[%s6074_s2 + $0xe8] sm:$0xff]  ;;  %v3294_v11 = vld [vmem:[%s6074_s2 + $0xc0] sm:$0xff] }
 0x673   : > { %3128 = vmatpush1.msra.mxu0 %v3057_v6  ;;  %v3295_v6 = vld [vmem:[%s6074_s2 + $0xc8] sm:$0xff] }
 0x705   : > { %v2960_v51 = vpop.f32.mrf.mxu1 }
 0x706   : > { %v2961_v15 = vadd.f32 %v4125_v12, %v2960_v51  ;;  %v3054_v51 = vld [vmem:[%s6073_s19 + $0x60] sm:$0xff] }
 0x707   : > { %v4552_v56 = vpop.f32.mrf.mxu1 }
 0x708   : > { %v2981_v16 = vmul.f32 %v4126_v14, %v2961_v15  ;;  %v3052_v15 = vld [vmem:[%s6073_s19 + $0x50] sm:$0xff]  ;;  %v3051_v56 = vld [vmem:[%s6073_s19 + $0x48] sm:$0xff] }
 0x70a   : > { %v2965_v13 = vpop.f32.mrf.mxu1  ;;  %v5612_v18 = vadd.f32 %v4802_v17, %v2981_v16  ;;  %v3053_v16 = vld [vmem:[%s6073_s19 + $0x58] sm:$0xff]  ;;  %v3048_v17 = vld [vmem:[%s6073_s19 + $0x30] sm:$0xff] }
 0x70b   : > { %v2966_v19 = vadd.f32 %v4125_v12, %v2965_v13  ;;  %v3049_v13 = vld [vmem:[%s6073_s19 + $0x38] sm:$0xff] }
 0x70c   : > { %v4555_v20 = vpop.f32.mrf.mxu1  ;;  %2989 = vadd.xlane.f32.xlu0 %v5612_v18 }
 0x70d   : > { %v2982_v4 = vmul.f32 %v4126_v14, %v2966_v19  ;;  %v3050_v19 = vld [vmem:[%s6073_s19 + $0x40] sm:$0xff] }
 0x70e   : > { %v3046_v20 = vld [vmem:[%s6073_s19 + $0x20] sm:$0xff] }
 0x70f   : > { %v5616_v22 = vadd.f32 %v4803_v21, %v2982_v4  ;;  %v3045_v4 = vld [vmem:[%s6073_s19 + $0x18] sm:$0xff]  ;;  %v3047_v21 = vld [vmem:[%s6073_s19 + $0x28] sm:$0xff] }
 0x711   : > { %2991 = vadd.xlane.f32.xlu1 %v5616_v22 }
 0x72f   : > { %v2970_v23 = vpop.f32.mrf.mxu1 }
 0x730   : > { %v2971_v26 = vadd.f32 %v4125_v12, %v2970_v23  ;;  %v3055_v12 = vld [vmem:[%s6073_s19 + $0x68] sm:$0xff] }
 0x731   : > { %v4558_v27 = vpop.f32.mrf.mxu1  ;;  %3129 = vmatprep.subr.mxu0 %v3055_v12  ;;  %v3043_v23 = vld [vmem:[%s6073_s19 + $0x8] sm:$0xff]  ;;  %v3296_v12 = vld [vmem:[%s6074_s2 + $0xd0] sm:$0xff] }
 0x732   : > { %v2983_v28 = vmul.f32 %v4126_v14, %v2971_v26  ;;  %v3056_v14 = vld [vmem:[%s6073_s19 + $0x70] sm:$0xff]  ;;  %3130 = vmatpush1.msra.mxu0 %v3054_v51  ;;  %v3042_v26 = vld [vmem:[%s6073_s19] sm:$0xff] }
 0x733   : > { %4582 = vmatpush3.msra.mxu1 %v3056_v14  ;;  %3131 = vmatprep.subr.mxu0 %v3052_v15  ;;  %v3044_v27 = vld [vmem:[%s6073_s19 + $0x10] sm:$0xff]  ;;  %v3291_v14 = vld [vmem:[%s6074_s2 + $0xa8] sm:$0xff]  ;;  %v3293_v15 = vld [vmem:[%s6074_s2 + $0xb8] sm:$0xff] }
 0x734   : > { %v5620_v30 = vadd.f32 %v4804_v29, %v2983_v28  ;;  %4583 = vmatprep.subr.mxu1 %v4845_v9  ;;  %3132 = vmatpush1.msra.mxu0 %v3051_v56  ;;  %v3292_v51 = vld [vmem:[%s6074_s2 + $0xb0] sm:$0xff]  ;;  %v3289_v56 = vld [vmem:[%s6074_s2 + $0x98] sm:$0xff] }
 0x735   : > { %4584 = vmatpush3.msra.mxu1 %v3053_v16  ;;  %3133 = vmatprep.subr.mxu0 %v3049_v13  ;;  %v3288_v16 = vld [vmem:[%s6074_s2 + $0x90] sm:$0xff]  ;;  %v3290_v13 = vld [vmem:[%s6074_s2 + $0xa0] sm:$0xff] }
 0x736   : > { %v2993_v31 = vsel %vm1016_vm0, %v5620_v30, 0.0  ;;  %4585 = vmatprep.subr.mxu1 %v4845_v9  ;;  %3134 = vmatpush1.msra.mxu0 %v3048_v17 }
 0x737   : > { %2994 = vadd.xlane.f32.xlu0 %v2993_v31  ;;  %4586 = vmatpush3.msra.mxu1 %v3050_v19  ;;  %v3286_v19 = vld [vmem:[%s6074_s2 + $0x80] sm:$0xff] }
 0x738   : > { %3135 = vmatprep.subr.mxu0 %v3046_v20  ;;  %4587 = vmatprep.subr.mxu1 %v4845_v9 }
 0x739   : > { %3136 = vmatpush1.msra.mxu0 %v3045_v4  ;;  %4588 = vmatpush3.msra.mxu1 %v3047_v21  ;;  %v3285_v4 = vld [vmem:[%s6074_s2 + $0x78] sm:$0xff]  ;;  %v3287_v21 = vld [vmem:[%s6074_s2 + $0x88] sm:$0xff] }
 0x73a   : > { %3137 = vmatprep.subr.mxu0 %v3043_v23  ;;  %4589 = vmatprep.subr.mxu1 %v4845_v9  ;;  %v3283_v23 = vld [vmem:[%s6074_s2 + $0x68] sm:$0xff] }
 0x73b   : > { %3138 = vmatpush1.msra.mxu0 %v3042_v26  ;;  %4590 = vmatpush3.msra.mxu1 %v3044_v27  ;;  %v3282_v27 = vld [vmem:[%s6074_s2 + $0x60] sm:$0xff] }
 0x73c   : > { %4600 = vmatprep.subr.mxu1 %v4845_v9  ;;  %3335 = vmatprep.subr.mxu0 %v3316_v48  ;;  %v3279_v48 = vld [vmem:[%s6074_s2 + $0x48] sm:$0xff] }
 0x795   : > { %v2990_v37 = vpop.xlane.xlu0 %2989 }
 0x796   : > { %v2996_v25 = vmul.f32 0.0078125, %v2990_v37  ;;  %v5718_v37 = vld [vmem:[%s6078_s30] ss:$0 sm:$0xff] }
 0x798   : > { %v5641_v38 = vsub.f32 %v5612_v18, %v2996_v25 }
 0x79a   : > { %v2992_v39 = vpop.xlane.xlu1 %2991  ;;  %v3002_v40 = vmul.f32 %v5641_v38, %v5641_v38 }
 0x79b   : > { %v2997_v41 = vmul.f32 0.0078125, %v2992_v39 }
 0x79c   : > { %3005 = vadd.xlane.f32.xlu0 %v3002_v40 }
 0x79d   : > { %v5646_v42 = vsub.f32 %v5616_v22, %v2997_v41 }
 0x79f   : > { %v3003_v45 = vmul.f32 %v5646_v42, %v5646_v42 }
 0x7a1   : > { %3007 = vadd.xlane.f32.xlu0 %v3003_v45  ;;  %v3315_v45 = vld [vmem:[%s6074_s2 + $0x168] sm:$0xff] }
 0x7c0   : > { %v2995_v28 = vpop.xlane.xlu0 %2994 }
 0x7c1   : > { %v2998_v29 = vmul.f32 0.0078125, %v2995_v28  ;;  %v3284_v28 = vld [vmem:[%s6074_s2 + $0x70] sm:$0xff] }
 0x7c3   : > { %v5698_v31 = vsub.f32 %v5620_v30, %v2998_v29  ;;  %v3280_v29 = vld [vmem:[%s6074_s2 + $0x50] sm:$0xff] }
 0x7c5   : > { %v3004_v49 = vmul.f32 %v5698_v31, %v5698_v31 }
 0x7c7   : > { %v3009_v32 = vsel %vm1016_vm0, %v3004_v49, 0.0  ;;  %v3281_v49 = vld [vmem:[%s6074_s2 + $0x58] sm:$0xff] }
 0x7c8   : > { %3010 = vadd.xlane.f32.xlu1 %v3009_v32  ;;  %v3277_v32 = vld [vmem:[%s6074_s2 + $0x38] sm:$0xff] }
 0x825   : > { %v3006_v53 = vpop.xlane.xlu0 %3005 }
 0x826   : > { %v3012_v33 = vmul.f32 0.0078125, %v3006_v53  ;;  %v3276_v53 = vld [vmem:[%s6074_s2 + $0x30] sm:$0xff] }
 0x828   : > { %v3015_v2 = vadd.f32 1e-06, %v3012_v33  ;;  %v3278_v33 = vld [vmem:[%s6074_s2 + $0x40] sm:$0xff] }
 0x82a   : > { %4760 = vrsqrt.f32 %v3015_v2  ;;  %v3008_v34 = vpop.xlane.xlu0 %3007  ;;  %v3274_v2 = vld [vmem:[%s6074_s2 + $0x20] sm:$0xff] }
 0x82b   : > { %v3013_v35 = vmul.f32 0.0078125, %v3008_v34  ;;  %v3273_v34 = vld [vmem:[%s6074_s2 + $0x18] sm:$0xff] }
 0x82d   : > { %v3016_v3 = vadd.f32 1e-06, %v3013_v35  ;;  %v3275_v35 = vld [vmem:[%s6074_s2 + $0x28] sm:$0xff] }
 0x82f   : > { %4762 = vrsqrt.f32 %v3016_v3  ;;  %v3271_v3 = vld [vmem:[%s6074_s2 + $0x8] sm:$0xff] }
 0x837   : > { %v4761_v24 = vpop.eup %4760 }
 0x838   : > { %v3021_v10 = vmul.f32 %v4761_v24, %v5641_v38  ;;  %v3313_v38 = vld [vmem:[%s6074_s2 + $0x158] sm:$0xff]  ;;  %v3270_v24 = vld [vmem:[%s6074_s2] sm:$0xff] }
 0x83a   : > { %v3030_v25 = vmul.f32 %v5710_v36, %v3021_v10  ;;  %v3272_v10 = vld [vmem:[%s6074_s2 + $0x10] sm:$0xff] }
 0x83c   : > { %v4763_v39 = vpop.eup %4762  ;;  %v5722_v40 = vadd.f32 %v5718_v37, %v3030_v25 }
 0x83d   : > { %v3022_v41 = vmul.f32 %v4763_v39, %v5646_v42  ;;  %v3314_v42 = vld [vmem:[%s6074_s2 + $0x160] sm:$0xff] }
 0x83e   : > { %3172 = vmatmul.mubr.f32.vlgmr.msra.gmra.mxu0 %v5722_v40  ;;  %4592 = vmatmul.mubr.f32.vlgmr.msra.gmra.mxu1 %v5722_v40 }
 0x83f   : > { %3177 = vmatprep.mubr.f32.mxu0 %v4845_v9  ;;  %4594 = vmatprep.mubr.msk.f32.mxu1 %vm4846_vm1, %v4845_v9  ;;  %v3031_v44 = vmul.f32 %v5710_v36, %v3022_v41 }
 0x840   : > { %3336 = vmatpush1.msra.mxu0 %v3315_v45  ;;  %4601 = vmatpush3.msra.mxu1 %v3317_v47  ;;  %v3591_v47 = vld [vmem:[%s5085_s1 + $0xf0] sm:$0xff] }
 0x841   : > { %v5737_v55 = vadd.f32 %v5718_v37, %v3031_v44  ;;  %3337 = vmatprep.subr.mxu0 %v3313_v38  ;;  %4602 = vmatprep.subr.mxu1 %v4845_v9  ;;  %v3606_v38 = vld [vmem:[%s5085_s1 + $0x168] sm:$0xff]  ;;  %v3575_v44 = vld [vmem:[%s5085_s1 + $0x70] sm:$0xff] }
 0x842   : > { %3338 = vmatpush1.msra.mxu0 %v3312_v50  ;;  %4603 = vmatpush3.msra.mxu1 %v3314_v42  ;;  %v3590_v50 = vld [vmem:[%s5085_s1 + $0xe8] sm:$0xff]  ;;  %v3605_v42 = vld [vmem:[%s5085_s1 + $0x160] sm:$0xff] }
 0x843   : > { %3178 = vmatmul.mubr.f32.gmra.mxu0 %v5737_v55  ;;  %4595 = vmatmul.mubr.f32.gmra.mxu1 %v5737_v55 }
 0x844   : > { %3339 = vmatprep.subr.mxu0 %v3310_v57  ;;  %4604 = vmatprep.subr.mxu1 %v4845_v9  ;;  %v3589_v57 = vld [vmem:[%s5085_s1 + $0xe0] sm:$0xff] }
 0x845   : > { %3340 = vmatpush1.msra.mxu0 %v3309_v43  ;;  %4605 = vmatpush3.msra.mxu1 %v3311_v58  ;;  %v3604_v43 = vld [vmem:[%s5085_s1 + $0x158] sm:$0xff]  ;;  %v3573_v58 = vld [vmem:[%s5085_s1 + $0x60] sm:$0xff] }
 0x846   : > { %3341 = vmatprep.subr.mxu0 %v3307_v59  ;;  %4606 = vmatprep.subr.mxu1 %v4845_v9  ;;  %v3588_v59 = vld [vmem:[%s5085_s1 + $0xd8] sm:$0xff] }
 0x847   : > { %3342 = vmatpush1.msra.mxu0 %v3306_v60  ;;  %4607 = vmatpush3.msra.mxu1 %v3308_v61  ;;  %v3603_v60 = vld [vmem:[%s5085_s1 + $0x150] sm:$0xff]  ;;  %v3572_v61 = vld [vmem:[%s5085_s1 + $0x58] sm:$0xff] }
 0x848   : > { %3343 = vmatprep.subr.mxu0 %v3304_v46  ;;  %4608 = vmatprep.subr.mxu1 %v4845_v9  ;;  %v3587_v46 = vld [vmem:[%s5085_s1 + $0xd0] sm:$0xff] }
 0x849   : > { %3344 = vmatpush1.msra.mxu0 %v3303_v63  ;;  %4609 = vmatpush3.msra.mxu1 %v3305_v0  ;;  %v3602_v63 = vld [vmem:[%s5085_s1 + $0x148] sm:$0xff]  ;;  %v3571_v0 = vld [vmem:[%s5085_s1 + $0x50] sm:$0xff] }
 0x84a   : > { %3345 = vmatprep.subr.mxu0 %v3301_v1  ;;  %4610 = vmatprep.subr.mxu1 %v4845_v9  ;;  %v3586_v1 = vld [vmem:[%s5085_s1 + $0xc8] sm:$0xff] }
 0x84b   : > { %3346 = vmatpush1.msra.mxu0 %v3300_v52  ;;  %4611 = vmatpush3.msra.mxu1 %v3302_v54  ;;  %v3601_v52 = vld [vmem:[%s5085_s1 + $0x140] sm:$0xff]  ;;  %v3570_v54 = vld [vmem:[%s5085_s1 + $0x48] sm:$0xff] }
 0x84c   : > { %3347 = vmatprep.subr.mxu0 %v3298_v5  ;;  %4612 = vmatprep.subr.mxu1 %v4845_v9  ;;  %v3585_v5 = vld [vmem:[%s5085_s1 + $0xc0] sm:$0xff] }
 0x84d   : > { %3348 = vmatpush1.msra.mxu0 %v3297_v7  ;;  %4613 = vmatpush3.msra.mxu1 %v3299_v8  ;;  %v3600_v7 = vld [vmem:[%s5085_s1 + $0x138] sm:$0xff]  ;;  %v3569_v8 = vld [vmem:[%s5085_s1 + $0x40] sm:$0xff] }
 0x84e   : > { %3349 = vmatprep.subr.mxu0 %v3295_v6  ;;  %4614 = vmatprep.subr.mxu1 %v4845_v9  ;;  %v3584_v6 = vld [vmem:[%s5085_s1 + $0xb8] sm:$0xff] }
 0x84f   : > { %3350 = vmatpush1.msra.mxu0 %v3294_v11  ;;  %4615 = vmatpush3.msra.mxu1 %v3296_v12  ;;  %v3599_v11 = vld [vmem:[%s5085_s1 + $0x130] sm:$0xff]  ;;  %v3568_v12 = vld [vmem:[%s5085_s1 + $0x38] sm:$0xff] }
 0x850   : > { %3351 = vmatprep.subr.mxu0 %v3292_v51  ;;  %4616 = vmatprep.subr.mxu1 %v4845_v9  ;;  %v3583_v51 = vld [vmem:[%s5085_s1 + $0xb0] sm:$0xff] }
 0x851   : > { %v3011_v17 = vpop.xlane.xlu1 %3010  ;;  %3352 = vmatpush1.msra.mxu0 %v3291_v14  ;;  %4617 = vmatpush3.msra.mxu1 %v3293_v15  ;;  %v3598_v14 = vld [vmem:[%s5085_s1 + $0x128] sm:$0xff]  ;;  %v3567_v15 = vld [vmem:[%s5085_s1 + $0x30] sm:$0xff] }
 0x852   : > { %v3014_v20 = vmul.f32 0.0078125, %v3011_v17  ;;  %3353 = vmatprep.subr.mxu0 %v3289_v56  ;;  %4618 = vmatprep.subr.mxu1 %v4845_v9  ;;  %v3582_v56 = vld [vmem:[%s5085_s1 + $0xa8] sm:$0xff]  ;;  %v3581_v17 = vld [vmem:[%s5085_s1 + $0xa0] sm:$0xff] }
 0x853   : > { %3354 = vmatpush1.msra.mxu0 %v3288_v16  ;;  %4619 = vmatpush3.msra.mxu1 %v3290_v13  ;;  %v3597_v16 = vld [vmem:[%s5085_s1 + $0x120] sm:$0xff]  ;;  %v3566_v13 = vld [vmem:[%s5085_s1 + $0x28] sm:$0xff] }
 0x854   : > { %v3017_v26 = vadd.f32 1e-06, %v3014_v20  ;;  %3355 = vmatprep.subr.mxu0 %v3286_v19  ;;  %4620 = vmatprep.subr.mxu1 %v4845_v9  ;;  %v3596_v19 = vld [vmem:[%s5085_s1 + $0x118] sm:$0xff]  ;;  %v3565_v20 = vld [vmem:[%s5085_s1 + $0x20] sm:$0xff] }
 0x855   : > { %3356 = vmatpush1.msra.mxu0 %v3285_v4  ;;  %4621 = vmatpush3.msra.mxu1 %v3287_v21  ;;  %v3580_v4 = vld [vmem:[%s5085_s1 + $0x98] sm:$0xff]  ;;  %v3595_v21 = vld [vmem:[%s5085_s1 + $0x110] sm:$0xff] }
 0x856   : > { %4764 = vrsqrt.f32 %v3017_v26  ;;  %3357 = vmatprep.subr.mxu0 %v3283_v23  ;;  %4622 = vmatprep.subr.mxu1 %v4845_v9  ;;  %v3564_v23 = vld [vmem:[%s5085_s1 + $0x18] sm:$0xff]  ;;  %v3579_v26 = vld [vmem:[%s5085_s1 + $0x90] sm:$0xff] }
 0x857   : > { %3358 = vmatpush1.msra.mxu0 %v3282_v27  ;;  %4623 = vmatpush3.msra.mxu1 %v3284_v28  ;;  %v3594_v27 = vld [vmem:[%s5085_s1 + $0x108] sm:$0xff]  ;;  %v3563_v28 = vld [vmem:[%s5085_s1 + $0x10] sm:$0xff] }
 0x858   : > { %3359 = vmatprep.subr.mxu0 %v3280_v29  ;;  %4624 = vmatprep.subr.mxu1 %v4845_v9  ;;  %v3578_v29 = vld [vmem:[%s5085_s1 + $0x88] sm:$0xff] }
 0x859   : > { %3360 = vmatpush1.msra.mxu0 %v3279_v48  ;;  %4625 = vmatpush3.msra.mxu1 %v3281_v49  ;;  %v3593_v48 = vld [vmem:[%s5085_s1 + $0x100] sm:$0xff]  ;;  %v3562_v49 = vld [vmem:[%s5085_s1 + $0x8] sm:$0xff] }
 0x85a   : > { %3361 = vmatprep.subr.mxu0 %v3277_v32  ;;  %4626 = vmatprep.subr.mxu1 %v4845_v9  ;;  %v3577_v32 = vld [vmem:[%s5085_s1 + $0x80] sm:$0xff] }
 0x85b   : > { %3183 = vmatprep.mubr.f32.mxu0 %v4845_v9  ;;  %4597 = vmatprep.mubr.msk.f32.mxu1 %vm4846_vm1, %v4845_v9 }
 0x85c   : > { %3362 = vmatpush1.msra.mxu0 %v3276_v53  ;;  %4627 = vmatpush3.msra.mxu1 %v3278_v33  ;;  %v3561_v53 = vld [vmem:[%s5085_s1] sm:$0xff]  ;;  %v3102_v33 = vsub.s32 2, %v5286_v62 }
 0x85d   : > { %3363 = vmatprep.subr.mxu0 %v3274_v2  ;;  %4628 = vmatprep.subr.mxu1 %v4845_v9  ;;  %v3090_v2 = vld [vmem:[%s5075_s17] sm:$0x7] }
 0x85e   : > { %3364 = vmatpush1.msra.mxu0 %v3273_v34  ;;  %4629 = vmatpush3.msra.mxu1 %v3275_v35  ;;  %v3098_v34 = vsub.s32 1, %v5286_v62  ;;  %v3094_v35 = vsub.s32 0, %v5286_v62 }
 0x85f   : > { %3365 = vmatprep.subr.mxu0 %v3271_v3  ;;  %4630 = vmatprep.subr.mxu1 %v4845_v9  ;;  %v3103_v3 = vrot.slane %v3090_v2, %v3102_v33 }
 0x860   : > { %3366 = vmatpush1.msra.mxu0 %v3270_v24  ;;  %4631 = vmatpush3.msra.mxu1 %v3272_v10  ;;  %v5891_v24 = vrot.slane %v3090_v2, %v3098_v34  ;;  %v3095_v10 = vrot.slane %v3090_v2, %v3094_v35 }
 0x861   : > { %4641 = vmatprep.subr.mxu1 %v4845_v9 }
 0x863   : > { %v4765_v25 = vpop.eup %4764 }
 0x864   : > { %v3023_v39 = vmul.f32 %v4765_v25, %v5698_v31  ;;  %v3608_v31 = vld [vmem:[%s5085_s1 + $0x178] sm:$0xff] }
 0x866   : > { %v3032_v41 = vmul.f32 %v5710_v36, %v3023_v39  ;;  %v3592_v36 = vld [vmem:[%s5085_s1 + $0xf8] sm:$0xff] }
 0x867   : > { %4275 = vmatprep.subr.mxu0 %v3592_v36 }
 0x868   : > { %v3041_v45 = vadd.f32 %v5718_v37, %v3032_v41  ;;  %v3607_v37 = vld [vmem:[%s5085_s1 + $0x170] sm:$0xff] }
 0x86a   : > { %3184 = vmatmul.mubr.f32.gmra.mxu0 %v3041_v45  ;;  %4598 = vmatmul.mubr.f32.gmra.mxu1 %v3041_v45 }
 0x86b   : > { %3399 = vmatprep.mubr.f32.mxu0 %v4845_v9  ;;  %4632 = vmatprep.mubr.msk.f32.mxu1 %vm4846_vm1, %v4845_v9 }
 0x86e   : > { %3400 = vmatmul.mubr.f32.vlgmr.msra.gmra.mxu0 %v5722_v40  ;;  %4633 = vmatmul.mubr.f32.vlgmr.msra.gmra.mxu1 %v5722_v40  ;;  %v3576_v40 = vld [vmem:[%s5085_s1 + $0x78] sm:$0xff] }
 0x86f   : > { %3405 = vmatprep.mubr.f32.mxu0 %v4845_v9  ;;  %4635 = vmatprep.mubr.msk.f32.mxu1 %vm4846_vm1, %v4845_v9 }
 0x870   : > { %4642 = vmatpush3.msra.mxu1 %v3608_v31  ;;  %4276 = vmatpush3.msra.mxu0 %v3576_v40 }
 0x871   : > { %4643 = vmatprep.subr.mxu1 %v4845_v9  ;;  %4277 = vmatprep.subr.mxu0 %v3591_v47 }
 0x872   : > { %3406 = vmatmul.mubr.f32.gmra.mxu0 %v5737_v55  ;;  %4636 = vmatmul.mubr.f32.gmra.mxu1 %v5737_v55  ;;  %v3574_v55 = vld [vmem:[%s5085_s1 + $0x68] sm:$0xff]  ;;  %s6079_s1 = sld [smem:[#allocation26_spill]] }
 0x873   : > { %3411 = vmatprep.mubr.f32.mxu0 %v4845_v9  ;;  %4638 = vmatprep.mubr.msk.f32.mxu1 %vm4846_vm1, %v4845_v9 }
 0x874   : > { %4644 = vmatpush3.msra.mxu1 %v3607_v37  ;;  %4278 = vmatpush3.msra.mxu0 %v3575_v44 }
 0x875   : > { %4645 = vmatprep.subr.mxu1 %v4845_v9  ;;  %4279 = vmatprep.subr.mxu0 %v3590_v50 }
 0x876   : > { %3412 = vmatmul.mubr.f32.gmra.mxu0 %v3041_v45  ;;  %4639 = vmatmul.mubr.f32.gmra.mxu1 %v3041_v45 }
 0x877   : > { %4673 = vmatprep.mubr.msk.f32.mxu1 %vm4846_vm1, %v4845_v9  ;;  %4646 = vmatpush3.msra.mxu1 %v3606_v38 }
 0x878   : > { %4647 = vmatprep.subr.mxu1 %v4845_v9  ;;  %4280 = vmatpush3.msra.mxu0 %v3574_v55  ;;  %s6080_s26 = scalar_lea.vmem %s6079_s1, %s4994_s0 }
 0x879   : > { %4648 = vmatpush3.msra.mxu1 %v3605_v42  ;;  %4281 = vmatprep.subr.mxu0 %v3589_v57 }
 0x87a   : > { %4649 = vmatprep.subr.mxu1 %v4845_v9  ;;  %4282 = vmatpush3.msra.mxu0 %v3573_v58 }
 0x87b   : > { %4650 = vmatpush3.msra.mxu1 %v3604_v43  ;;  %4283 = vmatprep.subr.mxu0 %v3588_v59 }
 0x87c   : > { %4651 = vmatprep.subr.mxu1 %v4845_v9  ;;  %4284 = vmatpush3.msra.mxu0 %v3572_v61 }
 0x87d   : > { %4652 = vmatpush3.msra.mxu1 %v3603_v60  ;;  %4285 = vmatprep.subr.mxu0 %v3587_v46 }
 0x87e   : > { %4653 = vmatprep.subr.mxu1 %v4845_v9  ;;  %4286 = vmatpush3.msra.mxu0 %v3571_v0 }
 0x87f   : > { %4654 = vmatpush3.msra.mxu1 %v3602_v63  ;;  %4287 = vmatprep.subr.mxu0 %v3586_v1 }
 0x880   : > { %4655 = vmatprep.subr.mxu1 %v4845_v9  ;;  %4288 = vmatpush3.msra.mxu0 %v3570_v54 }
 0x881   : > { %4656 = vmatpush3.msra.mxu1 %v3601_v52  ;;  %4289 = vmatprep.subr.mxu0 %v3585_v5 }
 0x882   : > { %4657 = vmatprep.subr.mxu1 %v4845_v9  ;;  %4290 = vmatpush3.msra.mxu0 %v3569_v8 }
 0x883   : > { %4658 = vmatpush3.msra.mxu1 %v3600_v7  ;;  %4291 = vmatprep.subr.mxu0 %v3584_v6 }
 0x884   : > { %4659 = vmatprep.subr.mxu1 %v4845_v9  ;;  %4292 = vmatpush3.msra.mxu0 %v3568_v12 }
 0x885   : > { %4660 = vmatpush3.msra.mxu1 %v3599_v11  ;;  %4293 = vmatprep.subr.mxu0 %v3583_v51 }
 0x886   : > { %4661 = vmatprep.subr.mxu1 %v4845_v9  ;;  %4294 = vmatpush3.msra.mxu0 %v3567_v15 }
 0x887   : > { %4662 = vmatpush3.msra.mxu1 %v3598_v14  ;;  %4295 = vmatprep.subr.mxu0 %v3582_v56 }
 0x888   : > { %4663 = vmatprep.subr.mxu1 %v4845_v9  ;;  %4296 = vmatpush3.msra.mxu0 %v3566_v13 }
 0x889   : > { %4664 = vmatpush3.msra.mxu1 %v3597_v16  ;;  %4297 = vmatprep.subr.mxu0 %v3581_v17  ;;  %v3318_v17 = vld [vmem:[%s5080_s21] sm:$0x7] }
 0x88a   : > { %4665 = vmatprep.subr.mxu1 %v4845_v9  ;;  %4298 = vmatpush3.msra.mxu0 %v3565_v20 }
 0x88b   : > { %4666 = vmatpush3.msra.mxu1 %v3596_v19  ;;  %4299 = vmatprep.subr.mxu0 %v3580_v4 }
 0x88c   : > { %4667 = vmatprep.subr.mxu1 %v4845_v9  ;;  %4300 = vmatpush3.msra.mxu0 %v3564_v23 }
 0x88d   : > { %4668 = vmatpush3.msra.mxu1 %v3595_v21  ;;  %4301 = vmatprep.subr.mxu0 %v3579_v26 }
 0x88e   : > { %4669 = vmatprep.subr.mxu1 %v4845_v9  ;;  %4302 = vmatpush3.msra.mxu0 %v3563_v28  ;;  %v5922_v28 = vrot.slane %v3318_v17, %v3102_v33 }
 0x88f   : > { %4670 = vmatpush3.msra.mxu1 %v3594_v27  ;;  %4303 = vmatprep.subr.mxu0 %v3578_v29  ;;  %v5918_v27 = vrot.slane %v3318_v17, %v3094_v35 }
 0x890   : > { %4671 = vmatprep.subr.mxu1 %v4845_v9  ;;  %4304 = vmatpush3.msra.mxu0 %v3562_v49 }
 0x891   : > { %4672 = vmatpush3.msra.mxu1 %v3593_v48  ;;  %4305 = vmatprep.subr.mxu0 %v3577_v32 }
 0x892   : > { %4306 = vmatpush3.msra.mxu0 %v3561_v53  ;;  %v5931_v53 = vrot.slane %v3318_v17, %v3098_v34 }
 0x8fe   : > { %v3173_v25 = vpop.f32.mrf.mxu0  ;;  %v3256_v39 = vpop.f32.mrf.mxu1 }
 0x8ff   : > { %v5893_v41 = vadd.f32 %v3256_v39, %v3103_v3  ;;  %v5898_v37 = vadd.f32 %v3173_v25, %v3095_v10 }
 0x900   : > { %v3175_v45 = vpop.f32.mrf.mxu0  ;;  %v4593_v31 = vpop.f32.mrf.mxu1 }
 0x901   : > { %v5896_v36 = vadd.f32 %v3175_v45, %v5891_v24  ;;  %v3500_v38 = vsub.f32 0.0, %v5893_v41  ;;  %v3498_v57 = vsub.f32 0.0, %v5898_v37 }
 0x903   : > { %v3179_v40 = vpop.f32.mrf.mxu0  ;;  %v3261_v47 = vpop.f32.mrf.mxu1  ;;  %v3499_v50 = vsub.f32 0.0, %v5896_v36  ;;  %v3511_v60 = vmul.f32 1.442695, %v3500_v38  ;;  %v3507_v63 = vmul.f32 1.442695, %v3498_v57 }
 0x904   : > { %v5901_v44 = vadd.f32 %v3261_v47, %v3103_v3  ;;  %v5905_v43 = vadd.f32 %v3179_v40, %v3095_v10 }
 0x905   : > { %v3181_v42 = vpop.f32.mrf.mxu0  ;;  %v4596_v55 = vpop.f32.mrf.mxu1  ;;  %v3509_v61 = vmul.f32 1.442695, %v3499_v50  ;;  %4766 = vpow2.f32 %v3511_v60 }
 0x906   : > { %v5908_v58 = vadd.f32 %v3181_v42, %v5891_v24  ;;  %v3503_v59 = vsub.f32 0.0, %v5901_v44  ;;  %v3501_v0 = vsub.f32 0.0, %v5905_v43 }
 0x907   : > { %4768 = vpow2.f32 %v3509_v61 }
 0x908   : > { %v3502_v46 = vsub.f32 0.0, %v5908_v58  ;;  %v3517_v1 = vmul.f32 1.442695, %v3503_v59  ;;  %4770 = vpow2.f32 %v3507_v63  ;;  %v3513_v54 = vmul.f32 1.442695, %v3501_v0 }
 0x90a   : > { %v3515_v52 = vmul.f32 1.442695, %v3502_v46  ;;  %4772 = vpow2.f32 %v3517_v1 }
 0x90c   : > { %4774 = vpow2.f32 %v3515_v52 }
 0x90d   : > { %4776 = vpow2.f32 %v3513_v54 }
 0x912   : > { %v4767_v5 = vpop.eup %4766 }
 0x913   : > { %v3527_v11 = vadd.f32 1.0, %v4767_v5 }
 0x914   : > { %v4769_v7 = vpop.eup %4768 }
 0x915   : > { %v4771_v8 = vpop.eup %4770  ;;  %v3526_v12 = vadd.f32 1.0, %v4769_v7  ;;  %4778 = vrcp.f32 %v3527_v11 }
 0x916   : > { %v3525_v14 = vadd.f32 1.0, %v4771_v8 }
 0x917   : > { %v4773_v6 = vpop.eup %4772  ;;  %4780 = vrcp.f32 %v3526_v12 }
 0x918   : > { %v3530_v56 = vadd.f32 1.0, %v4773_v6  ;;  %4782 = vrcp.f32 %v3525_v14 }
 0x919   : > { %v4775_v51 = vpop.eup %4774 }
 0x91a   : > { %v4777_v15 = vpop.eup %4776  ;;  %v3529_v16 = vadd.f32 1.0, %v4775_v51  ;;  %4784 = vrcp.f32 %v3530_v56 }
 0x91b   : > { %v3528_v13 = vadd.f32 1.0, %v4777_v15 }
 0x91c   : > { %4786 = vrcp.f32 %v3529_v16 }
 0x91d   : > { %4788 = vrcp.f32 %v3528_v13 }
 0x922   : > { %v4779_v29 = vpop.eup %4778 }
 0x923   : > { %v3545_v31 = vmul.f32 %v4779_v29, %v5893_v41 }
 0x924   : > { %v4781_v2 = vpop.eup %4780 }
 0x925   : > { %v3544_v62 = vmul.f32 %v4781_v2, %v5896_v36 }
 0x92a   : > { %v3185_v19 = vpop.f32.mrf.mxu0  ;;  %v3266_v20 = vpop.f32.mrf.mxu1 }
 0x92b   : > { %v5914_v4 = vadd.f32 %v3185_v19, %v3095_v10  ;;  %v5916_v21 = vadd.f32 %v3266_v20, %v3103_v3  ;;  %v4783_v10 = vpop.eup %4782 }
 0x92c   : > { %v3187_v23 = vpop.f32.mrf.mxu0  ;;  %v4599_v26 = vpop.f32.mrf.mxu1  ;;  %v3543_v55 = vmul.f32 %v4783_v10, %v5898_v37 }
 0x92d   : > { %v3504_v48 = vsub.f32 0.0, %v5914_v4  ;;  %v3506_v49 = vsub.f32 0.0, %v5916_v21  ;;  %v5927_v32 = vadd.f32 %v3187_v23, %v5891_v24  ;;  %v4785_v45 = vpop.eup %4784 }
 0x92e   : > { %v3401_v3 = vpop.f32.mrf.mxu0  ;;  %v3484_v35 = vpop.f32.mrf.mxu1  ;;  %v3548_v61 = vmul.f32 %v4785_v45, %v5901_v44 }
 0x92f   : > { %v3519_v25 = vmul.f32 1.442695, %v3504_v48  ;;  %v3523_v39 = vmul.f32 1.442695, %v3506_v49  ;;  %v3505_v33 = vsub.f32 0.0, %v5927_v32  ;;  %v3402_v40 = vadd.f32 %v3401_v3, %v5918_v27  ;;  %v4787_v42 = vpop.eup %4786 }
 0x930   : > { %v3485_v24 = vadd.f32 %v3484_v35, %v5922_v28  ;;  %v3403_v47 = vpop.f32.mrf.mxu0  ;;  %v4634_v38 = vpop.f32.mrf.mxu1  ;;  %v3547_v54 = vmul.f32 %v4787_v42, %v5908_v58 }
 0x931   : > { %4790 = vpow2.f32 %v3519_v25  ;;  %v3521_v34 = vmul.f32 1.442695, %v3505_v33  ;;  %v3404_v50 = vadd.f32 %v3403_v47, %v5931_v53  ;;  %v4789_v41 = vpop.eup %4788  ;;  %v3552_v0 = vmul.f32 %v3543_v55, %v3402_v40  ;;  %v4130_v33 = vld [vmem:[%s991_s27] ss:$0 sm:$0xff] }
 0x932   : > { %4792 = vpow2.f32 %v3523_v39  ;;  %v3554_v57 = vmul.f32 %v3545_v31, %v3485_v24  ;;  %v3407_v59 = vpop.f32.mrf.mxu0  ;;  %v3489_v60 = vpop.f32.mrf.mxu1  ;;  %v3546_v44 = vmul.f32 %v4789_v41, %v5905_v43 }
 0x933   : > { %4794 = vpow2.f32 %v3521_v34  ;;  %v3553_v46 = vmul.f32 %v3544_v62, %v3404_v50  ;;  %v3490_v63 = vadd.f32 %v3489_v60, %v5922_v28  ;;  %v3408_v36 = vadd.f32 %v3407_v59, %v5918_v27 }
 0x934   : > { %4674 = vmatmul.mubr.f32.vlgmr.msra.gmra.mxu1 %v3554_v57  ;;  %v3409_v1 = vpop.f32.mrf.mxu0  ;;  %v4637_v52 = vpop.f32.mrf.mxu1 }
 0x935   : > { %v3557_v37 = vmul.f32 %v3548_v61, %v3490_v63  ;;  %v3410_v5 = vadd.f32 %v3409_v1, %v5931_v53  ;;  %3680 = vmatprep.mubr.f32.mxu0 %v3553_v46  ;;  %4676 = vmatprep.mubr.msk.f32.mxu1 %vm4846_vm1, %v4845_v9  ;;  %v3555_v6 = vmul.f32 %v3546_v44, %v3408_v36 }
 0x936   : > { %v3494_v7 = vpop.f32.mrf.mxu1  ;;  %3681 = vmatmul.mubr.f32.vlgmr.msra.gmra.mxu0 %v3552_v0  ;;  %v3413_v43 = vpop.f32.mrf.mxu0 }
 0x937   : > { %v3556_v8 = vmul.f32 %v3547_v54, %v3410_v5  ;;  %v3495_v23 = vadd.f32 %v3494_v7, %v5922_v28  ;;  %v3414_v48 = vadd.f32 %v3413_v43, %v5918_v27  ;;  %v4129_v28 = vld [vmem:[%s6080_s26] ss:$0 sm:$0xff] }
 0x938   : > { %4677 = vmatmul.mubr.f32.gmra.mxu1 %v3557_v37  ;;  %v4640_v11 = vpop.f32.mrf.mxu1  ;;  %v3415_v13 = vpop.f32.mrf.mxu0 }
 0x939   : > { %3685 = vmatprep.mubr.f32.mxu0 %v3556_v8  ;;  %4679 = vmatprep.mubr.msk.f32.mxu1 %vm4846_vm1, %v4845_v9  ;;  %v3416_v29 = vadd.f32 %v3415_v13, %v5931_v53 }
 0x93a   : > { %3686 = vmatmul.mubr.f32.gmra.mxu0 %v3555_v6 }
 0x93e   : > { %v4791_v58 = vpop.eup %4790 }
 0x93f   : > { %v4793_v12 = vpop.eup %4792  ;;  %v3531_v51 = vadd.f32 1.0, %v4791_v58 }
 0x940   : > { %v4795_v14 = vpop.eup %4794  ;;  %v3533_v15 = vadd.f32 1.0, %v4793_v12 }
 0x941   : > { %4796 = vrcp.f32 %v3531_v51  ;;  %v3532_v56 = vadd.f32 1.0, %v4795_v14 }
 0x942   : > { %4798 = vrcp.f32 %v3533_v15 }
 0x943   : > { %4800 = vrcp.f32 %v3532_v56 }
 0x94e   : > { %v4797_v16 = vpop.eup %4796 }
 0x94f   : > { %v4799_v17 = vpop.eup %4798  ;;  %v3549_v20 = vmul.f32 %v4797_v16, %v5914_v4 }
 0x950   : > { %v4801_v19 = vpop.eup %4800  ;;  %v3551_v9 = vmul.f32 %v4799_v17, %v5916_v21 }
 0x951   : > { %v3550_v26 = vmul.f32 %v4801_v19, %v5927_v32  ;;  %v3558_v3 = vmul.f32 %v3549_v20, %v3414_v48 }
 0x952   : > { %v3560_v49 = vmul.f32 %v3551_v9, %v3495_v23 }
 0x953   : > { %v3559_v2 = vmul.f32 %v3550_v26, %v3416_v29 }
 0x954   : > { %4680 = vmatmul.mubr.f32.gmra.mxu1 %v3560_v49 }
 0x955   : > { %3690 = vmatprep.mubr.f32.mxu0 %v3559_v2 }
 0x956   : > { %3691 = vmatmul.mubr.f32.gmra.mxu0 %v3558_v3 }
 0x9f4   : > { %v3762_v35 = vpop.f32.mrf.mxu1 }
 0x9f6   : > { %v4675_v4 = vpop.f32.mrf.mxu1  ;;  %v4307_v10 = vpop.f32.mrf.mxu0 }
 0x9f8   : > { %v3767_v21 = vpop.f32.mrf.mxu1  ;;  %v4308_v32 = vpop.f32.mrf.mxu0 }
 0x9f9   : > { %v4309_v27 = vadd.f32 %v4308_v32, %v4307_v10 }
 0x9fa   : > { %v4678_v53 = vpop.f32.mrf.mxu1  ;;  %v4310_v25 = vpop.f32.mrf.mxu0 }
 0x9fb   : > { %v3683_v39 = vadd.f32 %v4309_v27, %v4129_v28 }
 0x9fc   : > { %v4311_v45 = vpop.f32.mrf.mxu0 }
 0x9fd   : > { %v3763_v31 = vadd.f32 %v3762_v35, %v3683_v39  ;;  %v4312_v40 = vadd.f32 %v4311_v45, %v4310_v25 }
 0x9ff   : > { %v3783_v24 = vmul.f32 %v4130_v33, %v3763_v31  ;;  %v3688_v47 = vadd.f32 %v4312_v40, %v4129_v28 }
 0xa01   : > { %v3786_v38 = vadd.f32 %v3783_v24, %v5612_v18  ;;  %v3768_v62 = vadd.f32 %v3767_v21, %v3688_v47 }
 0xa03   : > { %3789 = vst [vmem:[%s5094_s7] sm:$0xff] %v3786_v38  ;;  %v3784_v34 = vmul.f32 %v4130_v33, %v3768_v62 }
 0xa05   : > { %v3787_v50 = vadd.f32 %v3784_v34, %v5616_v22 }
 0xa07   : > { %3790 = vst [vmem:[%s5094_s7 + $0x8] sm:$0xff] %v3787_v50 }
 0xa14   : > { %v3772_v42 = vpop.f32.mrf.mxu1 }
 0xa16   : > { %v4681_v55 = vpop.f32.mrf.mxu1  ;;  %v4313_v57 = vpop.f32.mrf.mxu0 }
 0xa18   : > { %v4314_v59 = vpop.f32.mrf.mxu0 }
 0xa19   : > { %v4315_v60 = vadd.f32 %v4314_v59, %v4313_v57 }
 0xa1b   : > { %v3693_v41 = vadd.f32 %v4315_v60, %v4129_v28 }
 0xa1d   : > { %v3773_v61 = vadd.f32 %v3772_v42, %v3693_v41 }
 0xa1f   : > { %v3785_v46 = vmul.f32 %v4130_v33, %v3773_v61 }
 0xa21   : > { %v3788_v63 = vadd.f32 %v3785_v46, %v5620_v30 }
 0xa23   : > { %3791 = vst [vmem:[%s5094_s7 + $0x10] sm:$0x1] %v3788_v63 }
 0xa24 PF: > { %s6082_s0 = sld [smem:[#allocation5_spill]] }
 0xa25   : > { %s6083_s2 = sld [smem:[#allocation3_spill]] }
 0xa26   : > { %s6084_s25 = sld [smem:[#allocation4_spill]] }
 0xa27   : > { %s6085_s26 = sld [smem:[#allocation6_spill]] }
 0xa28   : > { %s6086_s27 = sld [smem:[#allocation7_spill]] }
 0xa2a   : > { %s31_s3 = sadd.s32 1, %s6082_s0  }
 0xa2b   : > { %p28_p8 = scmp.ge.s32.totalorder %s31_s3, 6  }
 0xa2d   :  { %30 = sbr.rel (!%p28_p8) target bundleno = 20 (0x14), region = 198 }

</bundles_post_ra>
